<compile_context>
chip_gen: v5e
topology: v5e:2x2
jax: 0.10.0
libtpu: 0.0.40
codegen_flags: <defaults>
</compile_context>

<pallas_src>
import functools

import numpy as np
import jax
import jax.numpy as jnp
from jax import lax
from jax.experimental import pallas as pl
from jax.experimental.pallas import tpu as pltpu

HIDDEN = 768            # module hardcodes hidden_size = 768
NUM_LABELS = 10         # tag set incl. START / STOP
START_ID = NUM_LABELS - 2
STOP_ID = NUM_LABELS - 1
BATCH = 2
SEQ = 8
VOCAB = 30

LANES = 128             # label dim padded to the 128-lane axis
SEQ_PAD = 128           # decode output padded to a lane-dense store
TRANS_ROWS = 16         # transitions sublane-padded 10 -> 16 (two 8-sublane tiles)
NEG = -1e30             # fill for padded transition entries (keep f32!)


# ---------------------------------------------------------------------------
# Fused kernel: hidden2label linear + CRF Viterbi decode.
# One program handles a (B_tile, S) batch chunk; batch lives on sublanes.
# ---------------------------------------------------------------------------
def fused_crf_kernel(lens_ref,           # SMEM (B,)              int32  [scalar prefetch]
                     hid_ref,            # VMEM (B_tile, S, H)    bf16
                     w_ref,              # VMEM (H, LANES)        bf16
                     b_ref,              # VMEM (1, LANES)        f32
                     trans_ref,          # VMEM (TRANS_ROWS,LANES)f32
                     stop_ref,           # VMEM (1, LANES)        f32  (trans[:,STOP] lane-dense)
                     dec_ref,            # VMEM (B_tile, SEQ_PAD) int32 [out]
                     emit_ref):          # VMEM (B_tile, S, LANES)f32   [out]
    B_tile, S, H = hid_ref.shape
    p = pl.program_id(0)

    # ---- per-sample lengths as a (B_tile, 1) int32 column -----------------
    row_iota = lax.broadcasted_iota(jnp.int32, (B_tile, 1), 0)
    length = jnp.zeros((B_tile, 1), jnp.int32)
    for b in range(B_tile):
        length = jnp.where(row_iota == b, lens_ref[p * B_tile + b], length)

    # ---- hidden2label: (B_tile*S, H) @ (H, 128) + b on the MXU ------------
    hid2d = hid_ref[...].reshape(B_tile * S, H)
    emit2d = jnp.dot(hid2d, w_ref[...],
                     preferred_element_type=jnp.float32) + b_ref[...]
    emit3d = emit2d.reshape(B_tile, S, LANES)
    emit_ref[...] = emit3d                                     # lane-dense store

    trans_rows = trans_ref[0:NUM_LABELS, :]                    # (10, LANES) f32

    def emit_t(t):
        return emit3d[:, t, :]                                 # (B_tile, LANES)

    def max_argmax_prev(part):
        # part: (B_tile, LANES).  Running max / first-index argmax over the 10
        # previous tags, fully unrolled -> pure VPU maximum/select ops shared
        # by all B_tile samples (batch rides on sublanes).
        best = part[:, 0:1] + trans_rows[0:1, :]
        best_i = jnp.zeros((B_tile, LANES), jnp.int32)
        for i in range(1, NUM_LABELS):
            cand = part[:, i:i + 1] + trans_rows[i:i + 1, :]
            take = cand > best                                 # ">" => first max idx
            best_i = jnp.where(take, jnp.int32(i), best_i)
            best = jnp.maximum(best, cand)
        return best, best_i

    # ---- Viterbi forward pass, fully unrolled over time -------------------
    # TODO(synk): for real BERT sequence lengths (128-512) switch this unrolled
    # loop to lax.fori_loop + an (S, LANES) VMEM back-pointer scratch to avoid
    # vreg pressure; at S=8 the unrolled form is optimal.
    part = emit_t(0) + trans_rows[START_ID:START_ID + 1, :]    # (B_tile, LANES)
    last_part = part                                           # partition at lens-1
    bp_rows = []                                               # back_points[0..S-2]
    for t in range(1, S):
        best, best_i = max_argmax_prev(part)
        part = best + emit_t(t)
        last_part = jnp.where(length - 1 == t, part, last_part)
        bp_rows.append(jnp.where(t < length, best_i,
                                 jnp.zeros_like(best_i)))      # masked_fill(mask==0, 0)

    # ---- terminal transition: lane-dense first-index argmax ---------------
    #   pointer[b] = argmax_i (last_part[b,i] + trans[i, STOP])
    tag_iota = lax.broadcasted_iota(jnp.int32, (B_tile, LANES), 1)
    term = last_part + stop_ref[...]                           # pad lanes ~ -2e30 (f32 safe)
    term_max = jnp.max(term, axis=1, keepdims=True)            # (B_tile, 1)
    pointer = jnp.min(jnp.where(term == term_max, tag_iota, LANES),
                      axis=1, keepdims=True)                   # first max index
    final_ptr = pointer                                        # (B_tile, 1) int32

    # ---- backtracking, accumulated in a lane-dense (B_tile, SEQ_PAD) vreg -
    seq_iota = lax.broadcasted_iota(jnp.int32, (B_tile, SEQ_PAD), 1)
    dec = jnp.where(seq_iota == (S - 1), pointer,
                    jnp.zeros((B_tile, SEQ_PAD), jnp.int32))
    ptr = pointer
    for idx in range(S - 2, -1, -1):
        bp_row = bp_rows[idx]                                  # (B_tile, LANES) int32
        raw = jnp.sum(jnp.where(tag_iota == ptr, bp_row, 0),
                      axis=1, keepdims=True)                   # bp_row[b, ptr[b]]
        # scatter of `pointer` into back_points at position lens-1:
        ptr = jnp.where(length - 1 == idx, final_ptr, raw)
        dec = jnp.where(seq_iota == idx, ptr, dec)
    dec_ref[...] = dec                                         # single lane-dense store


# ---------------------------------------------------------------------------
# Grid choice: 1 program on single-TC chips (v5e/v6e), 2 on dual-TC (v7x/v4).
# ---------------------------------------------------------------------------
def _num_viterbi_programs(batch):
    try:
        kind = jax.devices()[0].device_kind.lower()
    except Exception:
        kind = ""
    n_tc = 2 if ("v7" in kind or "7x" in kind or "v4" in kind) else 1
    while n_tc > 1 and batch % n_tc:
        n_tc -= 1
    return max(n_tc, 1)


# ---------------------------------------------------------------------------
# Parameters (deterministic, in-script).  Padded / pre-cast kernel operands
# are built ONCE here (hoisted out of the per-call forward).
# ---------------------------------------------------------------------------
def make_params(key):
    ks = jax.random.split(key, 5)
    tok_emb = jax.random.normal(ks[0], (VOCAB, HIDDEN), jnp.float32) * 0.02
    seg_emb = jax.random.normal(ks[1], (2, HIDDEN), jnp.float32) * 0.02
    pos_emb = jax.random.normal(ks[2], (SEQ, HIDDEN), jnp.float32) * 0.02
    bound = float(np.sqrt(6.0 / (HIDDEN + NUM_LABELS)))        # xavier_uniform_
    w = jax.random.uniform(ks[3], (NUM_LABELS, HIDDEN), jnp.float32, -bound, bound)
    b = jnp.zeros((NUM_LABELS,), jnp.float32)                  # constant_(bias, 0.0)
    transitions = jax.random.normal(ks[4], (NUM_LABELS, NUM_LABELS), jnp.float32)

    # one-time lane-dense padding + bf16 cast of the constant kernel operands
    w_pad = jnp.zeros((HIDDEN, LANES), jnp.float32).at[:, :NUM_LABELS].set(w.T)
    b_pad = jnp.zeros((1, LANES), jnp.float32).at[:, :NUM_LABELS].set(b[None, :])
    trans_pad = jnp.full((TRANS_ROWS, LANES), NEG, jnp.float32).at[
        :NUM_LABELS, :NUM_LABELS].set(transitions)
    stop_col = jnp.full((1, LANES), NEG, jnp.float32).at[
        0, :NUM_LABELS].set(transitions[:, STOP_ID])

    return dict(tok_emb=tok_emb, seg_emb=seg_emb, pos_emb=pos_emb,
                w=w, b=b, transitions=transitions,
                w_pad_bf16=w_pad.astype(jnp.bfloat16), b_pad=b_pad,
                trans_pad=trans_pad, stop_col=stop_col)


# ---------------------------------------------------------------------------
# Forward wrapper
# ---------------------------------------------------------------------------
def bert_crf_forward(params, input_ids, segment_ids, input_mask, *, num_programs=1):
    # --- _get_bert_features ---
    # TODO(synk): the external 12-layer BERT encoder (bert_model) is not reproduced;
    # it is replaced by a deterministic embedding stand-in producing (B, S, 768).
    hidden = (params['tok_emb'][input_ids]
              + params['seg_emb'][segment_ids]
              + params['pos_emb'][None, :, :])                 # (B, S, H)
    # Dropout(p=0.3) is identity in eval mode.
    B, S, H = hidden.shape
    L = NUM_LABELS
    P = num_programs
    Bt = B // P

    lens = jnp.sum(input_mask.astype(jnp.int32), axis=1)       # (B,) int32
    hid_bf16 = hidden.astype(jnp.bfloat16).reshape(P, Bt, S, H)

    grid_spec = pltpu.PrefetchScalarGridSpec(
        num_scalar_prefetch=1,
        grid=(P,),
        in_specs=[
            pl.BlockSpec((None, Bt, S, H), lambda p, _l: (p, 0, 0, 0)),       # hidden
            pl.BlockSpec((H, LANES), lambda p, _l: (0, 0)),                   # weight
            pl.BlockSpec((1, LANES), lambda p, _l: (0, 0)),                   # bias
            pl.BlockSpec((TRANS_ROWS, LANES), lambda p, _l: (0, 0)),          # transitions
            pl.BlockSpec((1, LANES), lambda p, _l: (0, 0)),                   # trans[:,STOP]
        ],
        out_specs=[
            pl.BlockSpec((None, Bt, SEQ_PAD), lambda p, _l: (p, 0, 0)),       # decode
            pl.BlockSpec((None, Bt, S, LANES), lambda p, _l: (p, 0, 0, 0)),   # emissions
        ],
    )

    cost = pl.CostEstimate(
        flops=2 * B * S * H * LANES,
        transcendentals=0,
        bytes_accessed=(B * 4 + B * S * H * 2 + H * LANES * 2 + LANES * 4
                        + TRANS_ROWS * LANES * 4 + LANES * 4
                        + B * SEQ_PAD * 4 + B * S * LANES * 4))

    dec_pad, emit_pad = pl.pallas_call(
        fused_crf_kernel,
        out_shape=(jax.ShapeDtypeStruct((P, Bt, SEQ_PAD), jnp.int32),
                   jax.ShapeDtypeStruct((P, Bt, S, LANES), jnp.float32)),
        grid_spec=grid_spec,
        compiler_params=pltpu.CompilerParams(
            dimension_semantics=("parallel",)),
        cost_estimate=cost,
    )(lens, hid_bf16, params['w_pad_bf16'], params['b_pad'],
      params['trans_pad'], params['stop_col'])

    decode_idx = dec_pad.reshape(B, SEQ_PAD)[:, :S]             # (B, S)
    feats = emit_pad.reshape(B, S, LANES)[:, :, :L]             # (B, S, L)
    path_score = None                                           # matches PyTorch forward
    return path_score, decode_idx, feats


# ---------------------------------------------------------------------------
# Pure-numpy reference for the Viterbi decode (same semantics as PyTorch
# _viterbi_decode; emissions added after the max, matching the kernel's
# floating-point order so the comparison is exact).
# ---------------------------------------------------------------------------
def viterbi_ref_numpy(feats, mask, trans, start_id, stop_id):
    feats = np.asarray(feats, np.float32)
    mask = np.asarray(mask)
    trans = np.asarray(trans, np.float32)
    B, S, L = feats.shape
    lens = mask.sum(axis=1).astype(np.int64)
    partition = feats[:, 0, :] + trans[start_id][None, :]
    ph = [partition]
    bps = []
    for t in range(1, S):
        cur = partition[:, :, None] + trans[None, :, :]
        mx = cur.max(axis=1)
        bp = cur.argmax(axis=1)
        new_part = mx + feats[:, t, :]
        bp = np.where(mask[:, t][:, None] > 0, bp, 0)
        ph.append(new_part)
        bps.append(bp)
        partition = new_part
    ph = np.stack(ph, axis=1)                                    # (B, S, L)
    last_part = ph[np.arange(B), lens - 1]
    last_values = last_part[:, :, None] + trans[None, :, :]
    last_bp = last_values.argmax(axis=1)
    pointer = last_bp[:, stop_id]
    bps.append(np.zeros((B, L), np.int64))
    bp_arr = np.stack(bps, axis=1)                               # (B, S, L)
    bp_arr[np.arange(B), lens - 1, :] = pointer[:, None]
    decode = np.zeros((B, S), np.int64)
    decode[:, S - 1] = pointer
    for idx in range(S - 2, -1, -1):
        pointer = bp_arr[np.arange(B), idx, pointer]
        decode[:, idx] = pointer
    return decode


if __name__ == "__main__":
    key = jax.random.PRNGKey(0)
    pkey, dkey = jax.random.split(key)
    params = make_params(pkey)

    input_ids = jax.random.randint(dkey, (BATCH, SEQ), 0, VOCAB, dtype=jnp.int32)
    segment_ids = jnp.zeros((BATCH, SEQ), jnp.int32)
    input_mask = jnp.array([[1] * SEQ, [1] * 6 + [0] * 2], dtype=jnp.int32)

    nprog = _num_viterbi_programs(BATCH)                        # 1 on v5e/v6e, 2 on v7x
    fwd = jax.jit(functools.partial(bert_crf_forward, num_programs=nprog))

    path_score, decode_idx, feats = fwd(params, input_ids, segment_ids, input_mask)
    decode_idx = jax.block_until_ready(decode_idx)

    ref = viterbi_ref_numpy(np.asarray(feats), np.asarray(input_mask),
                            np.asarray(params['transitions']), START_ID, STOP_ID)
    assert np.array_equal(np.asarray(decode_idx, np.int64), ref), (decode_idx, ref)
    print("KERNEL_OK")
</pallas_src>

<mosaic_0001>
module attributes {stable_mosaic.version = 11 : i64} {
  func.func @fused_crf_kernel(%arg0: i32, %arg1: memref<2xi32, #tpu.memory_space<smem>>, %arg2: memref<1x2x8x768xbf16, #tpu.memory_space<vmem>>, %arg3: memref<768x128xbf16, #tpu.memory_space<vmem>>, %arg4: memref<1x128xf32, #tpu.memory_space<vmem>>, %arg5: memref<16x128xf32, #tpu.memory_space<vmem>>, %arg6: memref<1x128xf32, #tpu.memory_space<vmem>>, %arg7: memref<1x2x128xi32, #tpu.memory_space<vmem>>, %arg8: memref<1x2x8x128xf32, #tpu.memory_space<vmem>>) attributes {dimension_semantics = [#tpu.dimension_semantics<parallel>], iteration_bounds = array<i64: 1>, scalar_prefetch = 1 : i64, scratch_operands = 0 : i64, tpu.core_type = #tpu.core_type<tc>, window_params = [{transform_indices = @transform_0, window_bounds = array<i64: 1, 2, 8, 768>}, {pipeline_mode = #tpu.pipeline_mode<synchronous>, transform_indices = @transform_1, window_bounds = array<i64: 768, 128>}, {pipeline_mode = #tpu.pipeline_mode<synchronous>, transform_indices = @transform_2, window_bounds = array<i64: 1, 128>}, {pipeline_mode = #tpu.pipeline_mode<synchronous>, transform_indices = @transform_3, window_bounds = array<i64: 16, 128>}, {pipeline_mode = #tpu.pipeline_mode<synchronous>, transform_indices = @transform_4, window_bounds = array<i64: 1, 128>}, {transform_indices = @transform_5, window_bounds = array<i64: 1, 2, 128>}, {transform_indices = @transform_6, window_bounds = array<i64: 1, 2, 8, 128>}]} {
    %0 = tpu.iota {dimensions = array<i32: 0>} : vector<2x1xi32>
    %c0_i32 = arith.constant 0 : i32
    %1 = vector.broadcast %c0_i32 : i32 to vector<2x1xi32>
    %c0_i32_0 = arith.constant 0 : i32
    %2 = vector.broadcast %c0_i32_0 : i32 to vector<2x1xi32>
    %3 = arith.cmpi eq, %0, %2 : vector<2x1xi32>
    %c2_i32 = arith.constant 2 : i32
    %4 = arith.muli %arg0, %c2_i32 : i32
    %c0_i32_1 = arith.constant 0 : i32
    %5 = arith.addi %4, %c0_i32_1 : i32
    %6 = arith.index_cast %5 : i32 to index
    %7 = memref.load %arg1[%6] : memref<2xi32, #tpu.memory_space<smem>>
    %8 = vector.broadcast %7 : i32 to vector<2x1xi32>
    %9 = arith.select %3, %8, %1 : vector<2x1xi1>, vector<2x1xi32>
    %c1_i32 = arith.constant 1 : i32
    %10 = vector.broadcast %c1_i32 : i32 to vector<2x1xi32>
    %11 = arith.cmpi eq, %0, %10 : vector<2x1xi32>
    %c2_i32_2 = arith.constant 2 : i32
    %12 = arith.muli %arg0, %c2_i32_2 : i32
    %c1_i32_3 = arith.constant 1 : i32
    %13 = arith.addi %12, %c1_i32_3 : i32
    %14 = arith.index_cast %13 : i32 to index
    %15 = memref.load %arg1[%14] : memref<2xi32, #tpu.memory_space<smem>>
    %16 = vector.broadcast %15 : i32 to vector<2x1xi32>
    %17 = arith.select %11, %16, %9 : vector<2x1xi1>, vector<2x1xi32>
    %c0 = arith.constant 0 : index
    %c0_4 = arith.constant 0 : index
    %c0_5 = arith.constant 0 : index
    %c0_6 = arith.constant 0 : index
    %18 = vector.load %arg2[%c0, %c0_4, %c0_5, %c0_6] : memref<1x2x8x768xbf16, #tpu.memory_space<vmem>>, vector<1x2x8x768xbf16>
    %19 = vector.shape_cast %18 : vector<1x2x8x768xbf16> to vector<2x8x768xbf16>
    %20 = vector.shape_cast %19 : vector<2x8x768xbf16> to vector<16x768xbf16>
    %c0_7 = arith.constant 0 : index
    %c0_8 = arith.constant 0 : index
    %21 = vector.load %arg3[%c0_7, %c0_8] : memref<768x128xbf16, #tpu.memory_space<vmem>>, vector<768x128xbf16>
    %cst = arith.constant dense<0.000000e+00> : vector<16x128xf32>
    %22 = tpu.matmul %20, %21, %cst {dimension_numbers = #tpu.dot_dimension_numbers<[1], [0], [0], [1], [0, 0, 1, 1], [], []>} : vector<16x768xbf16>, vector<768x128xbf16>, vector<16x128xf32> -> vector<16x128xf32>
    %c0_9 = arith.constant 0 : index
    %c0_10 = arith.constant 0 : index
    %23 = vector.load %arg4[%c0_9, %c0_10] : memref<1x128xf32, #tpu.memory_space<vmem>>, vector<1x128xf32>
    %24 = vector.broadcast %23 : vector<1x128xf32> to vector<16x128xf32>
    %25 = arith.addf %22, %24 : vector<16x128xf32>
    %26 = vector.shape_cast %25 : vector<16x128xf32> to vector<2x8x128xf32>
    %c0_11 = arith.constant 0 : index
    %c0_12 = arith.constant 0 : index
    %c0_13 = arith.constant 0 : index
    %c0_14 = arith.constant 0 : index
    %27 = vector.load %arg8[%c0_11, %c0_12, %c0_13, %c0_14] : memref<1x2x8x128xf32, #tpu.memory_space<vmem>>, vector<1x2x8x128xf32>
    %28 = vector.shape_cast %27 : vector<1x2x8x128xf32> to vector<2x8x128xf32>
    %29 = vector.shape_cast %26 : vector<2x8x128xf32> to vector<1x2x8x128xf32>
    tpu.vector_store %arg8[%c0_11, %c0_12, %c0_13, %c0_14], %29 {strides = array<i32>} : memref<1x2x8x128xf32, #tpu.memory_space<vmem>>, vector<1x2x8x128xf32>,
    %c0_15 = arith.constant 0 : index
    %c0_16 = arith.constant 0 : index
    %30 = vector.load %arg5[%c0_15, %c0_16] : memref<16x128xf32, #tpu.memory_space<vmem>>, vector<10x128xf32>
    %31 = vector.extract_strided_slice %26 {offsets = [0, 0, 0], sizes = [2, 1, 128], strides = [1, 1, 1]} : vector<2x8x128xf32> to vector<2x1x128xf32>
    %32 = vector.shape_cast %31 : vector<2x1x128xf32> to vector<2x128xf32>
    %33 = vector.extract_strided_slice %30 {offsets = [8, 0], sizes = [1, 128], strides = [1, 1]} : vector<10x128xf32> to vector<1x128xf32>
    %34 = vector.broadcast %33 : vector<1x128xf32> to vector<2x128xf32>
    %35 = arith.addf %32, %34 : vector<2x128xf32>
    %36 = vector.extract_strided_slice %35 {offsets = [0, 0], sizes = [2, 1], strides = [1, 1]} : vector<2x128xf32> to vector<2x1xf32>
    %37 = vector.extract_strided_slice %30 {offsets = [0, 0], sizes = [1, 128], strides = [1, 1]} : vector<10x128xf32> to vector<1x128xf32>
    %38 = vector.broadcast %36 : vector<2x1xf32> to vector<2x128xf32>
    %39 = vector.broadcast %37 : vector<1x128xf32> to vector<2x128xf32>
    %40 = arith.addf %38, %39 : vector<2x128xf32>
    %c0_i32_17 = arith.constant 0 : i32
    %41 = vector.broadcast %c0_i32_17 : i32 to vector<2x128xi32>
    %42 = vector.extract_strided_slice %35 {offsets = [0, 1], sizes = [2, 1], strides = [1, 1]} : vector<2x128xf32> to vector<2x1xf32>
    %43 = vector.extract_strided_slice %30 {offsets = [1, 0], sizes = [1, 128], strides = [1, 1]} : vector<10x128xf32> to vector<1x128xf32>
    %44 = vector.broadcast %42 : vector<2x1xf32> to vector<2x128xf32>
    %45 = vector.broadcast %43 : vector<1x128xf32> to vector<2x128xf32>
    %46 = arith.addf %44, %45 : vector<2x128xf32>
    %47 = arith.cmpf ogt, %46, %40 : vector<2x128xf32>
    %c1_i32_18 = arith.constant 1 : i32
    %48 = vector.broadcast %c1_i32_18 : i32 to vector<2x128xi32>
    %49 = arith.select %47, %48, %41 : vector<2x128xi1>, vector<2x128xi32>
    %50 = arith.maximumf %40, %46 : vector<2x128xf32>
    %51 = vector.extract_strided_slice %35 {offsets = [0, 2], sizes = [2, 1], strides = [1, 1]} : vector<2x128xf32> to vector<2x1xf32>
    %52 = vector.extract_strided_slice %30 {offsets = [2, 0], sizes = [1, 128], strides = [1, 1]} : vector<10x128xf32> to vector<1x128xf32>
    %53 = vector.broadcast %51 : vector<2x1xf32> to vector<2x128xf32>
    %54 = vector.broadcast %52 : vector<1x128xf32> to vector<2x128xf32>
    %55 = arith.addf %53, %54 : vector<2x128xf32>
    %56 = arith.cmpf ogt, %55, %50 : vector<2x128xf32>
    %c2_i32_19 = arith.constant 2 : i32
    %57 = vector.broadcast %c2_i32_19 : i32 to vector<2x128xi32>
    %58 = arith.select %56, %57, %49 : vector<2x128xi1>, vector<2x128xi32>
    %59 = arith.maximumf %50, %55 : vector<2x128xf32>
    %60 = vector.extract_strided_slice %35 {offsets = [0, 3], sizes = [2, 1], strides = [1, 1]} : vector<2x128xf32> to vector<2x1xf32>
    %61 = vector.extract_strided_slice %30 {offsets = [3, 0], sizes = [1, 128], strides = [1, 1]} : vector<10x128xf32> to vector<1x128xf32>
    %62 = vector.broadcast %60 : vector<2x1xf32> to vector<2x128xf32>
    %63 = vector.broadcast %61 : vector<1x128xf32> to vector<2x128xf32>
    %64 = arith.addf %62, %63 : vector<2x128xf32>
    %65 = arith.cmpf ogt, %64, %59 : vector<2x128xf32>
    %c3_i32 = arith.constant 3 : i32
    %66 = vector.broadcast %c3_i32 : i32 to vector<2x128xi32>
    %67 = arith.select %65, %66, %58 : vector<2x128xi1>, vector<2x128xi32>
    %68 = arith.maximumf %59, %64 : vector<2x128xf32>
    %69 = vector.extract_strided_slice %35 {offsets = [0, 4], sizes = [2, 1], strides = [1, 1]} : vector<2x128xf32> to vector<2x1xf32>
    %70 = vector.extract_strided_slice %30 {offsets = [4, 0], sizes = [1, 128], strides = [1, 1]} : vector<10x128xf32> to vector<1x128xf32>
    %71 = vector.broadcast %69 : vector<2x1xf32> to vector<2x128xf32>
    %72 = vector.broadcast %70 : vector<1x128xf32> to vector<2x128xf32>
    %73 = arith.addf %71, %72 : vector<2x128xf32>
    %74 = arith.cmpf ogt, %73, %68 : vector<2x128xf32>
    %c4_i32 = arith.constant 4 : i32
    %75 = vector.broadcast %c4_i32 : i32 to vector<2x128xi32>
    %76 = arith.select %74, %75, %67 : vector<2x128xi1>, vector<2x128xi32>
    %77 = arith.maximumf %68, %73 : vector<2x128xf32>
    %78 = vector.extract_strided_slice %35 {offsets = [0, 5], sizes = [2, 1], strides = [1, 1]} : vector<2x128xf32> to vector<2x1xf32>
    %79 = vector.extract_strided_slice %30 {offsets = [5, 0], sizes = [1, 128], strides = [1, 1]} : vector<10x128xf32> to vector<1x128xf32>
    %80 = vector.broadcast %78 : vector<2x1xf32> to vector<2x128xf32>
    %81 = vector.broadcast %79 : vector<1x128xf32> to vector<2x128xf32>
    %82 = arith.addf %80, %81 : vector<2x128xf32>
    %83 = arith.cmpf ogt, %82, %77 : vector<2x128xf32>
    %c5_i32 = arith.constant 5 : i32
    %84 = vector.broadcast %c5_i32 : i32 to vector<2x128xi32>
    %85 = arith.select %83, %84, %76 : vector<2x128xi1>, vector<2x128xi32>
    %86 = arith.maximumf %77, %82 : vector<2x128xf32>
    %87 = vector.extract_strided_slice %35 {offsets = [0, 6], sizes = [2, 1], strides = [1, 1]} : vector<2x128xf32> to vector<2x1xf32>
    %88 = vector.extract_strided_slice %30 {offsets = [6, 0], sizes = [1, 128], strides = [1, 1]} : vector<10x128xf32> to vector<1x128xf32>
    %89 = vector.broadcast %87 : vector<2x1xf32> to vector<2x128xf32>
    %90 = vector.broadcast %88 : vector<1x128xf32> to vector<2x128xf32>
    %91 = arith.addf %89, %90 : vector<2x128xf32>
    %92 = arith.cmpf ogt, %91, %86 : vector<2x128xf32>
    %c6_i32 = arith.constant 6 : i32
    %93 = vector.broadcast %c6_i32 : i32 to vector<2x128xi32>
    %94 = arith.select %92, %93, %85 : vector<2x128xi1>, vector<2x128xi32>
    %95 = arith.maximumf %86, %91 : vector<2x128xf32>
    %96 = vector.extract_strided_slice %35 {offsets = [0, 7], sizes = [2, 1], strides = [1, 1]} : vector<2x128xf32> to vector<2x1xf32>
    %97 = vector.extract_strided_slice %30 {offsets = [7, 0], sizes = [1, 128], strides = [1, 1]} : vector<10x128xf32> to vector<1x128xf32>
    %98 = vector.broadcast %96 : vector<2x1xf32> to vector<2x128xf32>
    %99 = vector.broadcast %97 : vector<1x128xf32> to vector<2x128xf32>
    %100 = arith.addf %98, %99 : vector<2x128xf32>
    %101 = arith.cmpf ogt, %100, %95 : vector<2x128xf32>
    %c7_i32 = arith.constant 7 : i32
    %102 = vector.broadcast %c7_i32 : i32 to vector<2x128xi32>
    %103 = arith.select %101, %102, %94 : vector<2x128xi1>, vector<2x128xi32>
    %104 = arith.maximumf %95, %100 : vector<2x128xf32>
    %105 = vector.extract_strided_slice %35 {offsets = [0, 8], sizes = [2, 1], strides = [1, 1]} : vector<2x128xf32> to vector<2x1xf32>
    %106 = vector.extract_strided_slice %30 {offsets = [8, 0], sizes = [1, 128], strides = [1, 1]} : vector<10x128xf32> to vector<1x128xf32>
    %107 = vector.broadcast %105 : vector<2x1xf32> to vector<2x128xf32>
    %108 = vector.broadcast %106 : vector<1x128xf32> to vector<2x128xf32>
    %109 = arith.addf %107, %108 : vector<2x128xf32>
    %110 = arith.cmpf ogt, %109, %104 : vector<2x128xf32>
    %c8_i32 = arith.constant 8 : i32
    %111 = vector.broadcast %c8_i32 : i32 to vector<2x128xi32>
    %112 = arith.select %110, %111, %103 : vector<2x128xi1>, vector<2x128xi32>
    %113 = arith.maximumf %104, %109 : vector<2x128xf32>
    %114 = vector.extract_strided_slice %35 {offsets = [0, 9], sizes = [2, 1], strides = [1, 1]} : vector<2x128xf32> to vector<2x1xf32>
    %115 = vector.extract_strided_slice %30 {offsets = [9, 0], sizes = [1, 128], strides = [1, 1]} : vector<10x128xf32> to vector<1x128xf32>
    %116 = vector.broadcast %114 : vector<2x1xf32> to vector<2x128xf32>
    %117 = vector.broadcast %115 : vector<1x128xf32> to vector<2x128xf32>
    %118 = arith.addf %116, %117 : vector<2x128xf32>
    %119 = arith.cmpf ogt, %118, %113 : vector<2x128xf32>
    %c9_i32 = arith.constant 9 : i32
    %120 = vector.broadcast %c9_i32 : i32 to vector<2x128xi32>
    %121 = arith.select %119, %120, %112 : vector<2x128xi1>, vector<2x128xi32>
    %122 = arith.maximumf %113, %118 : vector<2x128xf32>
    %123 = vector.extract_strided_slice %26 {offsets = [0, 1, 0], sizes = [2, 1, 128], strides = [1, 1, 1]} : vector<2x8x128xf32> to vector<2x1x128xf32>
    %124 = vector.shape_cast %123 : vector<2x1x128xf32> to vector<2x128xf32>
    %125 = arith.addf %122, %124 : vector<2x128xf32>
    %c1_i32_20 = arith.constant 1 : i32
    %126 = vector.broadcast %c1_i32_20 : i32 to vector<2x1xi32>
    %127 = arith.subi %17, %126 : vector<2x1xi32>
    %c1_i32_21 = arith.constant 1 : i32
    %128 = vector.broadcast %c1_i32_21 : i32 to vector<2x1xi32>
    %129 = arith.cmpi eq, %127, %128 : vector<2x1xi32>
    %130 = vector.shape_cast %129 : vector<2x1xi1> to vector<2x1xi1>
    %131 = vector.broadcast %130 : vector<2x1xi1> to vector<2x128xi1>
    %132 = arith.select %131, %125, %35 : vector<2x128xi1>, vector<2x128xf32>
    %c1_i32_22 = arith.constant 1 : i32
    %133 = vector.broadcast %c1_i32_22 : i32 to vector<2x1xi32>
    %134 = arith.cmpi sgt, %17, %133 : vector<2x1xi32>
    %c0_i32_23 = arith.constant 0 : i32
    %135 = vector.broadcast %c0_i32_23 : i32 to vector<2x128xi32>
    %136 = vector.shape_cast %134 : vector<2x1xi1> to vector<2x1xi1>
    %137 = vector.broadcast %136 : vector<2x1xi1> to vector<2x128xi1>
    %138 = arith.select %137, %121, %135 : vector<2x128xi1>, vector<2x128xi32>
    %139 = vector.extract_strided_slice %125 {offsets = [0, 0], sizes = [2, 1], strides = [1, 1]} : vector<2x128xf32> to vector<2x1xf32>
    %140 = vector.extract_strided_slice %30 {offsets = [0, 0], sizes = [1, 128], strides = [1, 1]} : vector<10x128xf32> to vector<1x128xf32>
    %141 = vector.broadcast %139 : vector<2x1xf32> to vector<2x128xf32>
    %142 = vector.broadcast %140 : vector<1x128xf32> to vector<2x128xf32>
    %143 = arith.addf %141, %142 : vector<2x128xf32>
    %c0_i32_24 = arith.constant 0 : i32
    %144 = vector.broadcast %c0_i32_24 : i32 to vector<2x128xi32>
    %145 = vector.extract_strided_slice %125 {offsets = [0, 1], sizes = [2, 1], strides = [1, 1]} : vector<2x128xf32> to vector<2x1xf32>
    %146 = vector.extract_strided_slice %30 {offsets = [1, 0], sizes = [1, 128], strides = [1, 1]} : vector<10x128xf32> to vector<1x128xf32>
    %147 = vector.broadcast %145 : vector<2x1xf32> to vector<2x128xf32>
    %148 = vector.broadcast %146 : vector<1x128xf32> to vector<2x128xf32>
    %149 = arith.addf %147, %148 : vector<2x128xf32>
    %150 = arith.cmpf ogt, %149, %143 : vector<2x128xf32>
    %c1_i32_25 = arith.constant 1 : i32
    %151 = vector.broadcast %c1_i32_25 : i32 to vector<2x128xi32>
    %152 = arith.select %150, %151, %144 : vector<2x128xi1>, vector<2x128xi32>
    %153 = arith.maximumf %143, %149 : vector<2x128xf32>
    %154 = vector.extract_strided_slice %125 {offsets = [0, 2], sizes = [2, 1], strides = [1, 1]} : vector<2x128xf32> to vector<2x1xf32>
    %155 = vector.extract_strided_slice %30 {offsets = [2, 0], sizes = [1, 128], strides = [1, 1]} : vector<10x128xf32> to vector<1x128xf32>
    %156 = vector.broadcast %154 : vector<2x1xf32> to vector<2x128xf32>
    %157 = vector.broadcast %155 : vector<1x128xf32> to vector<2x128xf32>
    %158 = arith.addf %156, %157 : vector<2x128xf32>
    %159 = arith.cmpf ogt, %158, %153 : vector<2x128xf32>
    %c2_i32_26 = arith.constant 2 : i32
    %160 = vector.broadcast %c2_i32_26 : i32 to vector<2x128xi32>
    %161 = arith.select %159, %160, %152 : vector<2x128xi1>, vector<2x128xi32>
    %162 = arith.maximumf %153, %158 : vector<2x128xf32>
    %163 = vector.extract_strided_slice %125 {offsets = [0, 3], sizes = [2, 1], strides = [1, 1]} : vector<2x128xf32> to vector<2x1xf32>
    %164 = vector.extract_strided_slice %30 {offsets = [3, 0], sizes = [1, 128], strides = [1, 1]} : vector<10x128xf32> to vector<1x128xf32>
    %165 = vector.broadcast %163 : vector<2x1xf32> to vector<2x128xf32>
    %166 = vector.broadcast %164 : vector<1x128xf32> to vector<2x128xf32>
    %167 = arith.addf %165, %166 : vector<2x128xf32>
    %168 = arith.cmpf ogt, %167, %162 : vector<2x128xf32>
    %c3_i32_27 = arith.constant 3 : i32
    %169 = vector.broadcast %c3_i32_27 : i32 to vector<2x128xi32>
    %170 = arith.select %168, %169, %161 : vector<2x128xi1>, vector<2x128xi32>
    %171 = arith.maximumf %162, %167 : vector<2x128xf32>
    %172 = vector.extract_strided_slice %125 {offsets = [0, 4], sizes = [2, 1], strides = [1, 1]} : vector<2x128xf32> to vector<2x1xf32>
    %173 = vector.extract_strided_slice %30 {offsets = [4, 0], sizes = [1, 128], strides = [1, 1]} : vector<10x128xf32> to vector<1x128xf32>
    %174 = vector.broadcast %172 : vector<2x1xf32> to vector<2x128xf32>
    %175 = vector.broadcast %173 : vector<1x128xf32> to vector<2x128xf32>
    %176 = arith.addf %174, %175 : vector<2x128xf32>
    %177 = arith.cmpf ogt, %176, %171 : vector<2x128xf32>
    %c4_i32_28 = arith.constant 4 : i32
    %178 = vector.broadcast %c4_i32_28 : i32 to vector<2x128xi32>
    %179 = arith.select %177, %178, %170 : vector<2x128xi1>, vector<2x128xi32>
    %180 = arith.maximumf %171, %176 : vector<2x128xf32>
    %181 = vector.extract_strided_slice %125 {offsets = [0, 5], sizes = [2, 1], strides = [1, 1]} : vector<2x128xf32> to vector<2x1xf32>
    %182 = vector.extract_strided_slice %30 {offsets = [5, 0], sizes = [1, 128], strides = [1, 1]} : vector<10x128xf32> to vector<1x128xf32>
    %183 = vector.broadcast %181 : vector<2x1xf32> to vector<2x128xf32>
    %184 = vector.broadcast %182 : vector<1x128xf32> to vector<2x128xf32>
    %185 = arith.addf %183, %184 : vector<2x128xf32>
    %186 = arith.cmpf ogt, %185, %180 : vector<2x128xf32>
    %c5_i32_29 = arith.constant 5 : i32
    %187 = vector.broadcast %c5_i32_29 : i32 to vector<2x128xi32>
    %188 = arith.select %186, %187, %179 : vector<2x128xi1>, vector<2x128xi32>
    %189 = arith.maximumf %180, %185 : vector<2x128xf32>
    %190 = vector.extract_strided_slice %125 {offsets = [0, 6], sizes = [2, 1], strides = [1, 1]} : vector<2x128xf32> to vector<2x1xf32>
    %191 = vector.extract_strided_slice %30 {offsets = [6, 0], sizes = [1, 128], strides = [1, 1]} : vector<10x128xf32> to vector<1x128xf32>
    %192 = vector.broadcast %190 : vector<2x1xf32> to vector<2x128xf32>
    %193 = vector.broadcast %191 : vector<1x128xf32> to vector<2x128xf32>
    %194 = arith.addf %192, %193 : vector<2x128xf32>
    %195 = arith.cmpf ogt, %194, %189 : vector<2x128xf32>
    %c6_i32_30 = arith.constant 6 : i32
    %196 = vector.broadcast %c6_i32_30 : i32 to vector<2x128xi32>
    %197 = arith.select %195, %196, %188 : vector<2x128xi1>, vector<2x128xi32>
    %198 = arith.maximumf %189, %194 : vector<2x128xf32>
    %199 = vector.extract_strided_slice %125 {offsets = [0, 7], sizes = [2, 1], strides = [1, 1]} : vector<2x128xf32> to vector<2x1xf32>
    %200 = vector.extract_strided_slice %30 {offsets = [7, 0], sizes = [1, 128], strides = [1, 1]} : vector<10x128xf32> to vector<1x128xf32>
    %201 = vector.broadcast %199 : vector<2x1xf32> to vector<2x128xf32>
    %202 = vector.broadcast %200 : vector<1x128xf32> to vector<2x128xf32>
    %203 = arith.addf %201, %202 : vector<2x128xf32>
    %204 = arith.cmpf ogt, %203, %198 : vector<2x128xf32>
    %c7_i32_31 = arith.constant 7 : i32
    %205 = vector.broadcast %c7_i32_31 : i32 to vector<2x128xi32>
    %206 = arith.select %204, %205, %197 : vector<2x128xi1>, vector<2x128xi32>
    %207 = arith.maximumf %198, %203 : vector<2x128xf32>
    %208 = vector.extract_strided_slice %125 {offsets = [0, 8], sizes = [2, 1], strides = [1, 1]} : vector<2x128xf32> to vector<2x1xf32>
    %209 = vector.extract_strided_slice %30 {offsets = [8, 0], sizes = [1, 128], strides = [1, 1]} : vector<10x128xf32> to vector<1x128xf32>
    %210 = vector.broadcast %208 : vector<2x1xf32> to vector<2x128xf32>
    %211 = vector.broadcast %209 : vector<1x128xf32> to vector<2x128xf32>
    %212 = arith.addf %210, %211 : vector<2x128xf32>
    %213 = arith.cmpf ogt, %212, %207 : vector<2x128xf32>
    %c8_i32_32 = arith.constant 8 : i32
    %214 = vector.broadcast %c8_i32_32 : i32 to vector<2x128xi32>
    %215 = arith.select %213, %214, %206 : vector<2x128xi1>, vector<2x128xi32>
    %216 = arith.maximumf %207, %212 : vector<2x128xf32>
    %217 = vector.extract_strided_slice %125 {offsets = [0, 9], sizes = [2, 1], strides = [1, 1]} : vector<2x128xf32> to vector<2x1xf32>
    %218 = vector.extract_strided_slice %30 {offsets = [9, 0], sizes = [1, 128], strides = [1, 1]} : vector<10x128xf32> to vector<1x128xf32>
    %219 = vector.broadcast %217 : vector<2x1xf32> to vector<2x128xf32>
    %220 = vector.broadcast %218 : vector<1x128xf32> to vector<2x128xf32>
    %221 = arith.addf %219, %220 : vector<2x128xf32>
    %222 = arith.cmpf ogt, %221, %216 : vector<2x128xf32>
    %c9_i32_33 = arith.constant 9 : i32
    %223 = vector.broadcast %c9_i32_33 : i32 to vector<2x128xi32>
    %224 = arith.select %222, %223, %215 : vector<2x128xi1>, vector<2x128xi32>
    %225 = arith.maximumf %216, %221 : vector<2x128xf32>
    %226 = vector.extract_strided_slice %26 {offsets = [0, 2, 0], sizes = [2, 1, 128], strides = [1, 1, 1]} : vector<2x8x128xf32> to vector<2x1x128xf32>
    %227 = vector.shape_cast %226 : vector<2x1x128xf32> to vector<2x128xf32>
    %228 = arith.addf %225, %227 : vector<2x128xf32>
    %c1_i32_34 = arith.constant 1 : i32
    %229 = vector.broadcast %c1_i32_34 : i32 to vector<2x1xi32>
    %230 = arith.subi %17, %229 : vector<2x1xi32>
    %c2_i32_35 = arith.constant 2 : i32
    %231 = vector.broadcast %c2_i32_35 : i32 to vector<2x1xi32>
    %232 = arith.cmpi eq, %230, %231 : vector<2x1xi32>
    %233 = vector.shape_cast %232 : vector<2x1xi1> to vector<2x1xi1>
    %234 = vector.broadcast %233 : vector<2x1xi1> to vector<2x128xi1>
    %235 = arith.select %234, %228, %132 : vector<2x128xi1>, vector<2x128xf32>
    %c2_i32_36 = arith.constant 2 : i32
    %236 = vector.broadcast %c2_i32_36 : i32 to vector<2x1xi32>
    %237 = arith.cmpi sgt, %17, %236 : vector<2x1xi32>
    %c0_i32_37 = arith.constant 0 : i32
    %238 = vector.broadcast %c0_i32_37 : i32 to vector<2x128xi32>
    %239 = vector.shape_cast %237 : vector<2x1xi1> to vector<2x1xi1>
    %240 = vector.broadcast %239 : vector<2x1xi1> to vector<2x128xi1>
    %241 = arith.select %240, %224, %238 : vector<2x128xi1>, vector<2x128xi32>
    %242 = vector.extract_strided_slice %228 {offsets = [0, 0], sizes = [2, 1], strides = [1, 1]} : vector<2x128xf32> to vector<2x1xf32>
    %243 = vector.extract_strided_slice %30 {offsets = [0, 0], sizes = [1, 128], strides = [1, 1]} : vector<10x128xf32> to vector<1x128xf32>
    %244 = vector.broadcast %242 : vector<2x1xf32> to vector<2x128xf32>
    %245 = vector.broadcast %243 : vector<1x128xf32> to vector<2x128xf32>
    %246 = arith.addf %244, %245 : vector<2x128xf32>
    %c0_i32_38 = arith.constant 0 : i32
    %247 = vector.broadcast %c0_i32_38 : i32 to vector<2x128xi32>
    %248 = vector.extract_strided_slice %228 {offsets = [0, 1], sizes = [2, 1], strides = [1, 1]} : vector<2x128xf32> to vector<2x1xf32>
    %249 = vector.extract_strided_slice %30 {offsets = [1, 0], sizes = [1, 128], strides = [1, 1]} : vector<10x128xf32> to vector<1x128xf32>
    %250 = vector.broadcast %248 : vector<2x1xf32> to vector<2x128xf32>
    %251 = vector.broadcast %249 : vector<1x128xf32> to vector<2x128xf32>
    %252 = arith.addf %250, %251 : vector<2x128xf32>
    %253 = arith.cmpf ogt, %252, %246 : vector<2x128xf32>
    %c1_i32_39 = arith.constant 1 : i32
    %254 = vector.broadcast %c1_i32_39 : i32 to vector<2x128xi32>
    %255 = arith.select %253, %254, %247 : vector<2x128xi1>, vector<2x128xi32>
    %256 = arith.maximumf %246, %252 : vector<2x128xf32>
    %257 = vector.extract_strided_slice %228 {offsets = [0, 2], sizes = [2, 1], strides = [1, 1]} : vector<2x128xf32> to vector<2x1xf32>
    %258 = vector.extract_strided_slice %30 {offsets = [2, 0], sizes = [1, 128], strides = [1, 1]} : vector<10x128xf32> to vector<1x128xf32>
    %259 = vector.broadcast %257 : vector<2x1xf32> to vector<2x128xf32>
    %260 = vector.broadcast %258 : vector<1x128xf32> to vector<2x128xf32>
    %261 = arith.addf %259, %260 : vector<2x128xf32>
    %262 = arith.cmpf ogt, %261, %256 : vector<2x128xf32>
    %c2_i32_40 = arith.constant 2 : i32
    %263 = vector.broadcast %c2_i32_40 : i32 to vector<2x128xi32>
    %264 = arith.select %262, %263, %255 : vector<2x128xi1>, vector<2x128xi32>
    %265 = arith.maximumf %256, %261 : vector<2x128xf32>
    %266 = vector.extract_strided_slice %228 {offsets = [0, 3], sizes = [2, 1], strides = [1, 1]} : vector<2x128xf32> to vector<2x1xf32>
    %267 = vector.extract_strided_slice %30 {offsets = [3, 0], sizes = [1, 128], strides = [1, 1]} : vector<10x128xf32> to vector<1x128xf32>
    %268 = vector.broadcast %266 : vector<2x1xf32> to vector<2x128xf32>
    %269 = vector.broadcast %267 : vector<1x128xf32> to vector<2x128xf32>
    %270 = arith.addf %268, %269 : vector<2x128xf32>
    %271 = arith.cmpf ogt, %270, %265 : vector<2x128xf32>
    %c3_i32_41 = arith.constant 3 : i32
    %272 = vector.broadcast %c3_i32_41 : i32 to vector<2x128xi32>
    %273 = arith.select %271, %272, %264 : vector<2x128xi1>, vector<2x128xi32>
    %274 = arith.maximumf %265, %270 : vector<2x128xf32>
    %275 = vector.extract_strided_slice %228 {offsets = [0, 4], sizes = [2, 1], strides = [1, 1]} : vector<2x128xf32> to vector<2x1xf32>
    %276 = vector.extract_strided_slice %30 {offsets = [4, 0], sizes = [1, 128], strides = [1, 1]} : vector<10x128xf32> to vector<1x128xf32>
    %277 = vector.broadcast %275 : vector<2x1xf32> to vector<2x128xf32>
    %278 = vector.broadcast %276 : vector<1x128xf32> to vector<2x128xf32>
    %279 = arith.addf %277, %278 : vector<2x128xf32>
    %280 = arith.cmpf ogt, %279, %274 : vector<2x128xf32>
    %c4_i32_42 = arith.constant 4 : i32
    %281 = vector.broadcast %c4_i32_42 : i32 to vector<2x128xi32>
    %282 = arith.select %280, %281, %273 : vector<2x128xi1>, vector<2x128xi32>
    %283 = arith.maximumf %274, %279 : vector<2x128xf32>
    %284 = vector.extract_strided_slice %228 {offsets = [0, 5], sizes = [2, 1], strides = [1, 1]} : vector<2x128xf32> to vector<2x1xf32>
    %285 = vector.extract_strided_slice %30 {offsets = [5, 0], sizes = [1, 128], strides = [1, 1]} : vector<10x128xf32> to vector<1x128xf32>
    %286 = vector.broadcast %284 : vector<2x1xf32> to vector<2x128xf32>
    %287 = vector.broadcast %285 : vector<1x128xf32> to vector<2x128xf32>
    %288 = arith.addf %286, %287 : vector<2x128xf32>
    %289 = arith.cmpf ogt, %288, %283 : vector<2x128xf32>
    %c5_i32_43 = arith.constant 5 : i32
    %290 = vector.broadcast %c5_i32_43 : i32 to vector<2x128xi32>
    %291 = arith.select %289, %290, %282 : vector<2x128xi1>, vector<2x128xi32>
    %292 = arith.maximumf %283, %288 : vector<2x128xf32>
    %293 = vector.extract_strided_slice %228 {offsets = [0, 6], sizes = [2, 1], strides = [1, 1]} : vector<2x128xf32> to vector<2x1xf32>
    %294 = vector.extract_strided_slice %30 {offsets = [6, 0], sizes = [1, 128], strides = [1, 1]} : vector<10x128xf32> to vector<1x128xf32>
    %295 = vector.broadcast %293 : vector<2x1xf32> to vector<2x128xf32>
    %296 = vector.broadcast %294 : vector<1x128xf32> to vector<2x128xf32>
    %297 = arith.addf %295, %296 : vector<2x128xf32>
    %298 = arith.cmpf ogt, %297, %292 : vector<2x128xf32>
    %c6_i32_44 = arith.constant 6 : i32
    %299 = vector.broadcast %c6_i32_44 : i32 to vector<2x128xi32>
    %300 = arith.select %298, %299, %291 : vector<2x128xi1>, vector<2x128xi32>
    %301 = arith.maximumf %292, %297 : vector<2x128xf32>
    %302 = vector.extract_strided_slice %228 {offsets = [0, 7], sizes = [2, 1], strides = [1, 1]} : vector<2x128xf32> to vector<2x1xf32>
    %303 = vector.extract_strided_slice %30 {offsets = [7, 0], sizes = [1, 128], strides = [1, 1]} : vector<10x128xf32> to vector<1x128xf32>
    %304 = vector.broadcast %302 : vector<2x1xf32> to vector<2x128xf32>
    %305 = vector.broadcast %303 : vector<1x128xf32> to vector<2x128xf32>
    %306 = arith.addf %304, %305 : vector<2x128xf32>
    %307 = arith.cmpf ogt, %306, %301 : vector<2x128xf32>
    %c7_i32_45 = arith.constant 7 : i32
    %308 = vector.broadcast %c7_i32_45 : i32 to vector<2x128xi32>
    %309 = arith.select %307, %308, %300 : vector<2x128xi1>, vector<2x128xi32>
    %310 = arith.maximumf %301, %306 : vector<2x128xf32>
    %311 = vector.extract_strided_slice %228 {offsets = [0, 8], sizes = [2, 1], strides = [1, 1]} : vector<2x128xf32> to vector<2x1xf32>
    %312 = vector.extract_strided_slice %30 {offsets = [8, 0], sizes = [1, 128], strides = [1, 1]} : vector<10x128xf32> to vector<1x128xf32>
    %313 = vector.broadcast %311 : vector<2x1xf32> to vector<2x128xf32>
    %314 = vector.broadcast %312 : vector<1x128xf32> to vector<2x128xf32>
    %315 = arith.addf %313, %314 : vector<2x128xf32>
    %316 = arith.cmpf ogt, %315, %310 : vector<2x128xf32>
    %c8_i32_46 = arith.constant 8 : i32
    %317 = vector.broadcast %c8_i32_46 : i32 to vector<2x128xi32>
    %318 = arith.select %316, %317, %309 : vector<2x128xi1>, vector<2x128xi32>
    %319 = arith.maximumf %310, %315 : vector<2x128xf32>
    %320 = vector.extract_strided_slice %228 {offsets = [0, 9], sizes = [2, 1], strides = [1, 1]} : vector<2x128xf32> to vector<2x1xf32>
    %321 = vector.extract_strided_slice %30 {offsets = [9, 0], sizes = [1, 128], strides = [1, 1]} : vector<10x128xf32> to vector<1x128xf32>
    %322 = vector.broadcast %320 : vector<2x1xf32> to vector<2x128xf32>
    %323 = vector.broadcast %321 : vector<1x128xf32> to vector<2x128xf32>
    %324 = arith.addf %322, %323 : vector<2x128xf32>
    %325 = arith.cmpf ogt, %324, %319 : vector<2x128xf32>
    %c9_i32_47 = arith.constant 9 : i32
    %326 = vector.broadcast %c9_i32_47 : i32 to vector<2x128xi32>
    %327 = arith.select %325, %326, %318 : vector<2x128xi1>, vector<2x128xi32>
    %328 = arith.maximumf %319, %324 : vector<2x128xf32>
    %329 = vector.extract_strided_slice %26 {offsets = [0, 3, 0], sizes = [2, 1, 128], strides = [1, 1, 1]} : vector<2x8x128xf32> to vector<2x1x128xf32>
    %330 = vector.shape_cast %329 : vector<2x1x128xf32> to vector<2x128xf32>
    %331 = arith.addf %328, %330 : vector<2x128xf32>
    %c1_i32_48 = arith.constant 1 : i32
    %332 = vector.broadcast %c1_i32_48 : i32 to vector<2x1xi32>
    %333 = arith.subi %17, %332 : vector<2x1xi32>
    %c3_i32_49 = arith.constant 3 : i32
    %334 = vector.broadcast %c3_i32_49 : i32 to vector<2x1xi32>
    %335 = arith.cmpi eq, %333, %334 : vector<2x1xi32>
    %336 = vector.shape_cast %335 : vector<2x1xi1> to vector<2x1xi1>
    %337 = vector.broadcast %336 : vector<2x1xi1> to vector<2x128xi1>
    %338 = arith.select %337, %331, %235 : vector<2x128xi1>, vector<2x128xf32>
    %c3_i32_50 = arith.constant 3 : i32
    %339 = vector.broadcast %c3_i32_50 : i32 to vector<2x1xi32>
    %340 = arith.cmpi sgt, %17, %339 : vector<2x1xi32>
    %c0_i32_51 = arith.constant 0 : i32
    %341 = vector.broadcast %c0_i32_51 : i32 to vector<2x128xi32>
    %342 = vector.shape_cast %340 : vector<2x1xi1> to vector<2x1xi1>
    %343 = vector.broadcast %342 : vector<2x1xi1> to vector<2x128xi1>
    %344 = arith.select %343, %327, %341 : vector<2x128xi1>, vector<2x128xi32>
    %345 = vector.extract_strided_slice %331 {offsets = [0, 0], sizes = [2, 1], strides = [1, 1]} : vector<2x128xf32> to vector<2x1xf32>
    %346 = vector.extract_strided_slice %30 {offsets = [0, 0], sizes = [1, 128], strides = [1, 1]} : vector<10x128xf32> to vector<1x128xf32>
    %347 = vector.broadcast %345 : vector<2x1xf32> to vector<2x128xf32>
    %348 = vector.broadcast %346 : vector<1x128xf32> to vector<2x128xf32>
    %349 = arith.addf %347, %348 : vector<2x128xf32>
    %c0_i32_52 = arith.constant 0 : i32
    %350 = vector.broadcast %c0_i32_52 : i32 to vector<2x128xi32>
    %351 = vector.extract_strided_slice %331 {offsets = [0, 1], sizes = [2, 1], strides = [1, 1]} : vector<2x128xf32> to vector<2x1xf32>
    %352 = vector.extract_strided_slice %30 {offsets = [1, 0], sizes = [1, 128], strides = [1, 1]} : vector<10x128xf32> to vector<1x128xf32>
    %353 = vector.broadcast %351 : vector<2x1xf32> to vector<2x128xf32>
    %354 = vector.broadcast %352 : vector<1x128xf32> to vector<2x128xf32>
    %355 = arith.addf %353, %354 : vector<2x128xf32>
    %356 = arith.cmpf ogt, %355, %349 : vector<2x128xf32>
    %c1_i32_53 = arith.constant 1 : i32
    %357 = vector.broadcast %c1_i32_53 : i32 to vector<2x128xi32>
    %358 = arith.select %356, %357, %350 : vector<2x128xi1>, vector<2x128xi32>
    %359 = arith.maximumf %349, %355 : vector<2x128xf32>
    %360 = vector.extract_strided_slice %331 {offsets = [0, 2], sizes = [2, 1], strides = [1, 1]} : vector<2x128xf32> to vector<2x1xf32>
    %361 = vector.extract_strided_slice %30 {offsets = [2, 0], sizes = [1, 128], strides = [1, 1]} : vector<10x128xf32> to vector<1x128xf32>
    %362 = vector.broadcast %360 : vector<2x1xf32> to vector<2x128xf32>
    %363 = vector.broadcast %361 : vector<1x128xf32> to vector<2x128xf32>
    %364 = arith.addf %362, %363 : vector<2x128xf32>
    %365 = arith.cmpf ogt, %364, %359 : vector<2x128xf32>
    %c2_i32_54 = arith.constant 2 : i32
    %366 = vector.broadcast %c2_i32_54 : i32 to vector<2x128xi32>
    %367 = arith.select %365, %366, %358 : vector<2x128xi1>, vector<2x128xi32>
    %368 = arith.maximumf %359, %364 : vector<2x128xf32>
    %369 = vector.extract_strided_slice %331 {offsets = [0, 3], sizes = [2, 1], strides = [1, 1]} : vector<2x128xf32> to vector<2x1xf32>
    %370 = vector.extract_strided_slice %30 {offsets = [3, 0], sizes = [1, 128], strides = [1, 1]} : vector<10x128xf32> to vector<1x128xf32>
    %371 = vector.broadcast %369 : vector<2x1xf32> to vector<2x128xf32>
    %372 = vector.broadcast %370 : vector<1x128xf32> to vector<2x128xf32>
    %373 = arith.addf %371, %372 : vector<2x128xf32>
    %374 = arith.cmpf ogt, %373, %368 : vector<2x128xf32>
    %c3_i32_55 = arith.constant 3 : i32
    %375 = vector.broadcast %c3_i32_55 : i32 to vector<2x128xi32>
    %376 = arith.select %374, %375, %367 : vector<2x128xi1>, vector<2x128xi32>
    %377 = arith.maximumf %368, %373 : vector<2x128xf32>
    %378 = vector.extract_strided_slice %331 {offsets = [0, 4], sizes = [2, 1], strides = [1, 1]} : vector<2x128xf32> to vector<2x1xf32>
    %379 = vector.extract_strided_slice %30 {offsets = [4, 0], sizes = [1, 128], strides = [1, 1]} : vector<10x128xf32> to vector<1x128xf32>
    %380 = vector.broadcast %378 : vector<2x1xf32> to vector<2x128xf32>
    %381 = vector.broadcast %379 : vector<1x128xf32> to vector<2x128xf32>
    %382 = arith.addf %380, %381 : vector<2x128xf32>
    %383 = arith.cmpf ogt, %382, %377 : vector<2x128xf32>
    %c4_i32_56 = arith.constant 4 : i32
    %384 = vector.broadcast %c4_i32_56 : i32 to vector<2x128xi32>
    %385 = arith.select %383, %384, %376 : vector<2x128xi1>, vector<2x128xi32>
    %386 = arith.maximumf %377, %382 : vector<2x128xf32>
    %387 = vector.extract_strided_slice %331 {offsets = [0, 5], sizes = [2, 1], strides = [1, 1]} : vector<2x128xf32> to vector<2x1xf32>
    %388 = vector.extract_strided_slice %30 {offsets = [5, 0], sizes = [1, 128], strides = [1, 1]} : vector<10x128xf32> to vector<1x128xf32>
    %389 = vector.broadcast %387 : vector<2x1xf32> to vector<2x128xf32>
    %390 = vector.broadcast %388 : vector<1x128xf32> to vector<2x128xf32>
    %391 = arith.addf %389, %390 : vector<2x128xf32>
    %392 = arith.cmpf ogt, %391, %386 : vector<2x128xf32>
    %c5_i32_57 = arith.constant 5 : i32
    %393 = vector.broadcast %c5_i32_57 : i32 to vector<2x128xi32>
    %394 = arith.select %392, %393, %385 : vector<2x128xi1>, vector<2x128xi32>
    %395 = arith.maximumf %386, %391 : vector<2x128xf32>
    %396 = vector.extract_strided_slice %331 {offsets = [0, 6], sizes = [2, 1], strides = [1, 1]} : vector<2x128xf32> to vector<2x1xf32>
    %397 = vector.extract_strided_slice %30 {offsets = [6, 0], sizes = [1, 128], strides = [1, 1]} : vector<10x128xf32> to vector<1x128xf32>
    %398 = vector.broadcast %396 : vector<2x1xf32> to vector<2x128xf32>
    %399 = vector.broadcast %397 : vector<1x128xf32> to vector<2x128xf32>
    %400 = arith.addf %398, %399 : vector<2x128xf32>
    %401 = arith.cmpf ogt, %400, %395 : vector<2x128xf32>
    %c6_i32_58 = arith.constant 6 : i32
    %402 = vector.broadcast %c6_i32_58 : i32 to vector<2x128xi32>
    %403 = arith.select %401, %402, %394 : vector<2x128xi1>, vector<2x128xi32>
    %404 = arith.maximumf %395, %400 : vector<2x128xf32>
    %405 = vector.extract_strided_slice %331 {offsets = [0, 7], sizes = [2, 1], strides = [1, 1]} : vector<2x128xf32> to vector<2x1xf32>
    %406 = vector.extract_strided_slice %30 {offsets = [7, 0], sizes = [1, 128], strides = [1, 1]} : vector<10x128xf32> to vector<1x128xf32>
    %407 = vector.broadcast %405 : vector<2x1xf32> to vector<2x128xf32>
    %408 = vector.broadcast %406 : vector<1x128xf32> to vector<2x128xf32>
    %409 = arith.addf %407, %408 : vector<2x128xf32>
    %410 = arith.cmpf ogt, %409, %404 : vector<2x128xf32>
    %c7_i32_59 = arith.constant 7 : i32
    %411 = vector.broadcast %c7_i32_59 : i32 to vector<2x128xi32>
    %412 = arith.select %410, %411, %403 : vector<2x128xi1>, vector<2x128xi32>
    %413 = arith.maximumf %404, %409 : vector<2x128xf32>
    %414 = vector.extract_strided_slice %331 {offsets = [0, 8], sizes = [2, 1], strides = [1, 1]} : vector<2x128xf32> to vector<2x1xf32>
    %415 = vector.extract_strided_slice %30 {offsets = [8, 0], sizes = [1, 128], strides = [1, 1]} : vector<10x128xf32> to vector<1x128xf32>
    %416 = vector.broadcast %414 : vector<2x1xf32> to vector<2x128xf32>
    %417 = vector.broadcast %415 : vector<1x128xf32> to vector<2x128xf32>
    %418 = arith.addf %416, %417 : vector<2x128xf32>
    %419 = arith.cmpf ogt, %418, %413 : vector<2x128xf32>
    %c8_i32_60 = arith.constant 8 : i32
    %420 = vector.broadcast %c8_i32_60 : i32 to vector<2x128xi32>
    %421 = arith.select %419, %420, %412 : vector<2x128xi1>, vector<2x128xi32>
    %422 = arith.maximumf %413, %418 : vector<2x128xf32>
    %423 = vector.extract_strided_slice %331 {offsets = [0, 9], sizes = [2, 1], strides = [1, 1]} : vector<2x128xf32> to vector<2x1xf32>
    %424 = vector.extract_strided_slice %30 {offsets = [9, 0], sizes = [1, 128], strides = [1, 1]} : vector<10x128xf32> to vector<1x128xf32>
    %425 = vector.broadcast %423 : vector<2x1xf32> to vector<2x128xf32>
    %426 = vector.broadcast %424 : vector<1x128xf32> to vector<2x128xf32>
    %427 = arith.addf %425, %426 : vector<2x128xf32>
    %428 = arith.cmpf ogt, %427, %422 : vector<2x128xf32>
    %c9_i32_61 = arith.constant 9 : i32
    %429 = vector.broadcast %c9_i32_61 : i32 to vector<2x128xi32>
    %430 = arith.select %428, %429, %421 : vector<2x128xi1>, vector<2x128xi32>
    %431 = arith.maximumf %422, %427 : vector<2x128xf32>
    %432 = vector.extract_strided_slice %26 {offsets = [0, 4, 0], sizes = [2, 1, 128], strides = [1, 1, 1]} : vector<2x8x128xf32> to vector<2x1x128xf32>
    %433 = vector.shape_cast %432 : vector<2x1x128xf32> to vector<2x128xf32>
    %434 = arith.addf %431, %433 : vector<2x128xf32>
    %c1_i32_62 = arith.constant 1 : i32
    %435 = vector.broadcast %c1_i32_62 : i32 to vector<2x1xi32>
    %436 = arith.subi %17, %435 : vector<2x1xi32>
    %c4_i32_63 = arith.constant 4 : i32
    %437 = vector.broadcast %c4_i32_63 : i32 to vector<2x1xi32>
    %438 = arith.cmpi eq, %436, %437 : vector<2x1xi32>
    %439 = vector.shape_cast %438 : vector<2x1xi1> to vector<2x1xi1>
    %440 = vector.broadcast %439 : vector<2x1xi1> to vector<2x128xi1>
    %441 = arith.select %440, %434, %338 : vector<2x128xi1>, vector<2x128xf32>
    %c4_i32_64 = arith.constant 4 : i32
    %442 = vector.broadcast %c4_i32_64 : i32 to vector<2x1xi32>
    %443 = arith.cmpi sgt, %17, %442 : vector<2x1xi32>
    %c0_i32_65 = arith.constant 0 : i32
    %444 = vector.broadcast %c0_i32_65 : i32 to vector<2x128xi32>
    %445 = vector.shape_cast %443 : vector<2x1xi1> to vector<2x1xi1>
    %446 = vector.broadcast %445 : vector<2x1xi1> to vector<2x128xi1>
    %447 = arith.select %446, %430, %444 : vector<2x128xi1>, vector<2x128xi32>
    %448 = vector.extract_strided_slice %434 {offsets = [0, 0], sizes = [2, 1], strides = [1, 1]} : vector<2x128xf32> to vector<2x1xf32>
    %449 = vector.extract_strided_slice %30 {offsets = [0, 0], sizes = [1, 128], strides = [1, 1]} : vector<10x128xf32> to vector<1x128xf32>
    %450 = vector.broadcast %448 : vector<2x1xf32> to vector<2x128xf32>
    %451 = vector.broadcast %449 : vector<1x128xf32> to vector<2x128xf32>
    %452 = arith.addf %450, %451 : vector<2x128xf32>
    %c0_i32_66 = arith.constant 0 : i32
    %453 = vector.broadcast %c0_i32_66 : i32 to vector<2x128xi32>
    %454 = vector.extract_strided_slice %434 {offsets = [0, 1], sizes = [2, 1], strides = [1, 1]} : vector<2x128xf32> to vector<2x1xf32>
    %455 = vector.extract_strided_slice %30 {offsets = [1, 0], sizes = [1, 128], strides = [1, 1]} : vector<10x128xf32> to vector<1x128xf32>
    %456 = vector.broadcast %454 : vector<2x1xf32> to vector<2x128xf32>
    %457 = vector.broadcast %455 : vector<1x128xf32> to vector<2x128xf32>
    %458 = arith.addf %456, %457 : vector<2x128xf32>
    %459 = arith.cmpf ogt, %458, %452 : vector<2x128xf32>
    %c1_i32_67 = arith.constant 1 : i32
    %460 = vector.broadcast %c1_i32_67 : i32 to vector<2x128xi32>
    %461 = arith.select %459, %460, %453 : vector<2x128xi1>, vector<2x128xi32>
    %462 = arith.maximumf %452, %458 : vector<2x128xf32>
    %463 = vector.extract_strided_slice %434 {offsets = [0, 2], sizes = [2, 1], strides = [1, 1]} : vector<2x128xf32> to vector<2x1xf32>
    %464 = vector.extract_strided_slice %30 {offsets = [2, 0], sizes = [1, 128], strides = [1, 1]} : vector<10x128xf32> to vector<1x128xf32>
    %465 = vector.broadcast %463 : vector<2x1xf32> to vector<2x128xf32>
    %466 = vector.broadcast %464 : vector<1x128xf32> to vector<2x128xf32>
    %467 = arith.addf %465, %466 : vector<2x128xf32>
    %468 = arith.cmpf ogt, %467, %462 : vector<2x128xf32>
    %c2_i32_68 = arith.constant 2 : i32
    %469 = vector.broadcast %c2_i32_68 : i32 to vector<2x128xi32>
    %470 = arith.select %468, %469, %461 : vector<2x128xi1>, vector<2x128xi32>
    %471 = arith.maximumf %462, %467 : vector<2x128xf32>
    %472 = vector.extract_strided_slice %434 {offsets = [0, 3], sizes = [2, 1], strides = [1, 1]} : vector<2x128xf32> to vector<2x1xf32>
    %473 = vector.extract_strided_slice %30 {offsets = [3, 0], sizes = [1, 128], strides = [1, 1]} : vector<10x128xf32> to vector<1x128xf32>
    %474 = vector.broadcast %472 : vector<2x1xf32> to vector<2x128xf32>
    %475 = vector.broadcast %473 : vector<1x128xf32> to vector<2x128xf32>
    %476 = arith.addf %474, %475 : vector<2x128xf32>
    %477 = arith.cmpf ogt, %476, %471 : vector<2x128xf32>
    %c3_i32_69 = arith.constant 3 : i32
    %478 = vector.broadcast %c3_i32_69 : i32 to vector<2x128xi32>
    %479 = arith.select %477, %478, %470 : vector<2x128xi1>, vector<2x128xi32>
    %480 = arith.maximumf %471, %476 : vector<2x128xf32>
    %481 = vector.extract_strided_slice %434 {offsets = [0, 4], sizes = [2, 1], strides = [1, 1]} : vector<2x128xf32> to vector<2x1xf32>
    %482 = vector.extract_strided_slice %30 {offsets = [4, 0], sizes = [1, 128], strides = [1, 1]} : vector<10x128xf32> to vector<1x128xf32>
    %483 = vector.broadcast %481 : vector<2x1xf32> to vector<2x128xf32>
    %484 = vector.broadcast %482 : vector<1x128xf32> to vector<2x128xf32>
    %485 = arith.addf %483, %484 : vector<2x128xf32>
    %486 = arith.cmpf ogt, %485, %480 : vector<2x128xf32>
    %c4_i32_70 = arith.constant 4 : i32
    %487 = vector.broadcast %c4_i32_70 : i32 to vector<2x128xi32>
    %488 = arith.select %486, %487, %479 : vector<2x128xi1>, vector<2x128xi32>
    %489 = arith.maximumf %480, %485 : vector<2x128xf32>
    %490 = vector.extract_strided_slice %434 {offsets = [0, 5], sizes = [2, 1], strides = [1, 1]} : vector<2x128xf32> to vector<2x1xf32>
    %491 = vector.extract_strided_slice %30 {offsets = [5, 0], sizes = [1, 128], strides = [1, 1]} : vector<10x128xf32> to vector<1x128xf32>
    %492 = vector.broadcast %490 : vector<2x1xf32> to vector<2x128xf32>
    %493 = vector.broadcast %491 : vector<1x128xf32> to vector<2x128xf32>
    %494 = arith.addf %492, %493 : vector<2x128xf32>
    %495 = arith.cmpf ogt, %494, %489 : vector<2x128xf32>
    %c5_i32_71 = arith.constant 5 : i32
    %496 = vector.broadcast %c5_i32_71 : i32 to vector<2x128xi32>
    %497 = arith.select %495, %496, %488 : vector<2x128xi1>, vector<2x128xi32>
    %498 = arith.maximumf %489, %494 : vector<2x128xf32>
    %499 = vector.extract_strided_slice %434 {offsets = [0, 6], sizes = [2, 1], strides = [1, 1]} : vector<2x128xf32> to vector<2x1xf32>
    %500 = vector.extract_strided_slice %30 {offsets = [6, 0], sizes = [1, 128], strides = [1, 1]} : vector<10x128xf32> to vector<1x128xf32>
    %501 = vector.broadcast %499 : vector<2x1xf32> to vector<2x128xf32>
    %502 = vector.broadcast %500 : vector<1x128xf32> to vector<2x128xf32>
    %503 = arith.addf %501, %502 : vector<2x128xf32>
    %504 = arith.cmpf ogt, %503, %498 : vector<2x128xf32>
    %c6_i32_72 = arith.constant 6 : i32
    %505 = vector.broadcast %c6_i32_72 : i32 to vector<2x128xi32>
    %506 = arith.select %504, %505, %497 : vector<2x128xi1>, vector<2x128xi32>
    %507 = arith.maximumf %498, %503 : vector<2x128xf32>
    %508 = vector.extract_strided_slice %434 {offsets = [0, 7], sizes = [2, 1], strides = [1, 1]} : vector<2x128xf32> to vector<2x1xf32>
    %509 = vector.extract_strided_slice %30 {offsets = [7, 0], sizes = [1, 128], strides = [1, 1]} : vector<10x128xf32> to vector<1x128xf32>
    %510 = vector.broadcast %508 : vector<2x1xf32> to vector<2x128xf32>
    %511 = vector.broadcast %509 : vector<1x128xf32> to vector<2x128xf32>
    %512 = arith.addf %510, %511 : vector<2x128xf32>
    %513 = arith.cmpf ogt, %512, %507 : vector<2x128xf32>
    %c7_i32_73 = arith.constant 7 : i32
    %514 = vector.broadcast %c7_i32_73 : i32 to vector<2x128xi32>
    %515 = arith.select %513, %514, %506 : vector<2x128xi1>, vector<2x128xi32>
    %516 = arith.maximumf %507, %512 : vector<2x128xf32>
    %517 = vector.extract_strided_slice %434 {offsets = [0, 8], sizes = [2, 1], strides = [1, 1]} : vector<2x128xf32> to vector<2x1xf32>
    %518 = vector.extract_strided_slice %30 {offsets = [8, 0], sizes = [1, 128], strides = [1, 1]} : vector<10x128xf32> to vector<1x128xf32>
    %519 = vector.broadcast %517 : vector<2x1xf32> to vector<2x128xf32>
    %520 = vector.broadcast %518 : vector<1x128xf32> to vector<2x128xf32>
    %521 = arith.addf %519, %520 : vector<2x128xf32>
    %522 = arith.cmpf ogt, %521, %516 : vector<2x128xf32>
    %c8_i32_74 = arith.constant 8 : i32
    %523 = vector.broadcast %c8_i32_74 : i32 to vector<2x128xi32>
    %524 = arith.select %522, %523, %515 : vector<2x128xi1>, vector<2x128xi32>
    %525 = arith.maximumf %516, %521 : vector<2x128xf32>
    %526 = vector.extract_strided_slice %434 {offsets = [0, 9], sizes = [2, 1], strides = [1, 1]} : vector<2x128xf32> to vector<2x1xf32>
    %527 = vector.extract_strided_slice %30 {offsets = [9, 0], sizes = [1, 128], strides = [1, 1]} : vector<10x128xf32> to vector<1x128xf32>
    %528 = vector.broadcast %526 : vector<2x1xf32> to vector<2x128xf32>
    %529 = vector.broadcast %527 : vector<1x128xf32> to vector<2x128xf32>
    %530 = arith.addf %528, %529 : vector<2x128xf32>
    %531 = arith.cmpf ogt, %530, %525 : vector<2x128xf32>
    %c9_i32_75 = arith.constant 9 : i32
    %532 = vector.broadcast %c9_i32_75 : i32 to vector<2x128xi32>
    %533 = arith.select %531, %532, %524 : vector<2x128xi1>, vector<2x128xi32>
    %534 = arith.maximumf %525, %530 : vector<2x128xf32>
    %535 = vector.extract_strided_slice %26 {offsets = [0, 5, 0], sizes = [2, 1, 128], strides = [1, 1, 1]} : vector<2x8x128xf32> to vector<2x1x128xf32>
    %536 = vector.shape_cast %535 : vector<2x1x128xf32> to vector<2x128xf32>
    %537 = arith.addf %534, %536 : vector<2x128xf32>
    %c1_i32_76 = arith.constant 1 : i32
    %538 = vector.broadcast %c1_i32_76 : i32 to vector<2x1xi32>
    %539 = arith.subi %17, %538 : vector<2x1xi32>
    %c5_i32_77 = arith.constant 5 : i32
    %540 = vector.broadcast %c5_i32_77 : i32 to vector<2x1xi32>
    %541 = arith.cmpi eq, %539, %540 : vector<2x1xi32>
    %542 = vector.shape_cast %541 : vector<2x1xi1> to vector<2x1xi1>
    %543 = vector.broadcast %542 : vector<2x1xi1> to vector<2x128xi1>
    %544 = arith.select %543, %537, %441 : vector<2x128xi1>, vector<2x128xf32>
    %c5_i32_78 = arith.constant 5 : i32
    %545 = vector.broadcast %c5_i32_78 : i32 to vector<2x1xi32>
    %546 = arith.cmpi sgt, %17, %545 : vector<2x1xi32>
    %c0_i32_79 = arith.constant 0 : i32
    %547 = vector.broadcast %c0_i32_79 : i32 to vector<2x128xi32>
    %548 = vector.shape_cast %546 : vector<2x1xi1> to vector<2x1xi1>
    %549 = vector.broadcast %548 : vector<2x1xi1> to vector<2x128xi1>
    %550 = arith.select %549, %533, %547 : vector<2x128xi1>, vector<2x128xi32>
    %551 = vector.extract_strided_slice %537 {offsets = [0, 0], sizes = [2, 1], strides = [1, 1]} : vector<2x128xf32> to vector<2x1xf32>
    %552 = vector.extract_strided_slice %30 {offsets = [0, 0], sizes = [1, 128], strides = [1, 1]} : vector<10x128xf32> to vector<1x128xf32>
    %553 = vector.broadcast %551 : vector<2x1xf32> to vector<2x128xf32>
    %554 = vector.broadcast %552 : vector<1x128xf32> to vector<2x128xf32>
    %555 = arith.addf %553, %554 : vector<2x128xf32>
    %c0_i32_80 = arith.constant 0 : i32
    %556 = vector.broadcast %c0_i32_80 : i32 to vector<2x128xi32>
    %557 = vector.extract_strided_slice %537 {offsets = [0, 1], sizes = [2, 1], strides = [1, 1]} : vector<2x128xf32> to vector<2x1xf32>
    %558 = vector.extract_strided_slice %30 {offsets = [1, 0], sizes = [1, 128], strides = [1, 1]} : vector<10x128xf32> to vector<1x128xf32>
    %559 = vector.broadcast %557 : vector<2x1xf32> to vector<2x128xf32>
    %560 = vector.broadcast %558 : vector<1x128xf32> to vector<2x128xf32>
    %561 = arith.addf %559, %560 : vector<2x128xf32>
    %562 = arith.cmpf ogt, %561, %555 : vector<2x128xf32>
    %c1_i32_81 = arith.constant 1 : i32
    %563 = vector.broadcast %c1_i32_81 : i32 to vector<2x128xi32>
    %564 = arith.select %562, %563, %556 : vector<2x128xi1>, vector<2x128xi32>
    %565 = arith.maximumf %555, %561 : vector<2x128xf32>
    %566 = vector.extract_strided_slice %537 {offsets = [0, 2], sizes = [2, 1], strides = [1, 1]} : vector<2x128xf32> to vector<2x1xf32>
    %567 = vector.extract_strided_slice %30 {offsets = [2, 0], sizes = [1, 128], strides = [1, 1]} : vector<10x128xf32> to vector<1x128xf32>
    %568 = vector.broadcast %566 : vector<2x1xf32> to vector<2x128xf32>
    %569 = vector.broadcast %567 : vector<1x128xf32> to vector<2x128xf32>
    %570 = arith.addf %568, %569 : vector<2x128xf32>
    %571 = arith.cmpf ogt, %570, %565 : vector<2x128xf32>
    %c2_i32_82 = arith.constant 2 : i32
    %572 = vector.broadcast %c2_i32_82 : i32 to vector<2x128xi32>
    %573 = arith.select %571, %572, %564 : vector<2x128xi1>, vector<2x128xi32>
    %574 = arith.maximumf %565, %570 : vector<2x128xf32>
    %575 = vector.extract_strided_slice %537 {offsets = [0, 3], sizes = [2, 1], strides = [1, 1]} : vector<2x128xf32> to vector<2x1xf32>
    %576 = vector.extract_strided_slice %30 {offsets = [3, 0], sizes = [1, 128], strides = [1, 1]} : vector<10x128xf32> to vector<1x128xf32>
    %577 = vector.broadcast %575 : vector<2x1xf32> to vector<2x128xf32>
    %578 = vector.broadcast %576 : vector<1x128xf32> to vector<2x128xf32>
    %579 = arith.addf %577, %578 : vector<2x128xf32>
    %580 = arith.cmpf ogt, %579, %574 : vector<2x128xf32>
    %c3_i32_83 = arith.constant 3 : i32
    %581 = vector.broadcast %c3_i32_83 : i32 to vector<2x128xi32>
    %582 = arith.select %580, %581, %573 : vector<2x128xi1>, vector<2x128xi32>
    %583 = arith.maximumf %574, %579 : vector<2x128xf32>
    %584 = vector.extract_strided_slice %537 {offsets = [0, 4], sizes = [2, 1], strides = [1, 1]} : vector<2x128xf32> to vector<2x1xf32>
    %585 = vector.extract_strided_slice %30 {offsets = [4, 0], sizes = [1, 128], strides = [1, 1]} : vector<10x128xf32> to vector<1x128xf32>
    %586 = vector.broadcast %584 : vector<2x1xf32> to vector<2x128xf32>
    %587 = vector.broadcast %585 : vector<1x128xf32> to vector<2x128xf32>
    %588 = arith.addf %586, %587 : vector<2x128xf32>
    %589 = arith.cmpf ogt, %588, %583 : vector<2x128xf32>
    %c4_i32_84 = arith.constant 4 : i32
    %590 = vector.broadcast %c4_i32_84 : i32 to vector<2x128xi32>
    %591 = arith.select %589, %590, %582 : vector<2x128xi1>, vector<2x128xi32>
    %592 = arith.maximumf %583, %588 : vector<2x128xf32>
    %593 = vector.extract_strided_slice %537 {offsets = [0, 5], sizes = [2, 1], strides = [1, 1]} : vector<2x128xf32> to vector<2x1xf32>
    %594 = vector.extract_strided_slice %30 {offsets = [5, 0], sizes = [1, 128], strides = [1, 1]} : vector<10x128xf32> to vector<1x128xf32>
    %595 = vector.broadcast %593 : vector<2x1xf32> to vector<2x128xf32>
    %596 = vector.broadcast %594 : vector<1x128xf32> to vector<2x128xf32>
    %597 = arith.addf %595, %596 : vector<2x128xf32>
    %598 = arith.cmpf ogt, %597, %592 : vector<2x128xf32>
    %c5_i32_85 = arith.constant 5 : i32
    %599 = vector.broadcast %c5_i32_85 : i32 to vector<2x128xi32>
    %600 = arith.select %598, %599, %591 : vector<2x128xi1>, vector<2x128xi32>
    %601 = arith.maximumf %592, %597 : vector<2x128xf32>
    %602 = vector.extract_strided_slice %537 {offsets = [0, 6], sizes = [2, 1], strides = [1, 1]} : vector<2x128xf32> to vector<2x1xf32>
    %603 = vector.extract_strided_slice %30 {offsets = [6, 0], sizes = [1, 128], strides = [1, 1]} : vector<10x128xf32> to vector<1x128xf32>
    %604 = vector.broadcast %602 : vector<2x1xf32> to vector<2x128xf32>
    %605 = vector.broadcast %603 : vector<1x128xf32> to vector<2x128xf32>
    %606 = arith.addf %604, %605 : vector<2x128xf32>
    %607 = arith.cmpf ogt, %606, %601 : vector<2x128xf32>
    %c6_i32_86 = arith.constant 6 : i32
    %608 = vector.broadcast %c6_i32_86 : i32 to vector<2x128xi32>
    %609 = arith.select %607, %608, %600 : vector<2x128xi1>, vector<2x128xi32>
    %610 = arith.maximumf %601, %606 : vector<2x128xf32>
    %611 = vector.extract_strided_slice %537 {offsets = [0, 7], sizes = [2, 1], strides = [1, 1]} : vector<2x128xf32> to vector<2x1xf32>
    %612 = vector.extract_strided_slice %30 {offsets = [7, 0], sizes = [1, 128], strides = [1, 1]} : vector<10x128xf32> to vector<1x128xf32>
    %613 = vector.broadcast %611 : vector<2x1xf32> to vector<2x128xf32>
    %614 = vector.broadcast %612 : vector<1x128xf32> to vector<2x128xf32>
    %615 = arith.addf %613, %614 : vector<2x128xf32>
    %616 = arith.cmpf ogt, %615, %610 : vector<2x128xf32>
    %c7_i32_87 = arith.constant 7 : i32
    %617 = vector.broadcast %c7_i32_87 : i32 to vector<2x128xi32>
    %618 = arith.select %616, %617, %609 : vector<2x128xi1>, vector<2x128xi32>
    %619 = arith.maximumf %610, %615 : vector<2x128xf32>
    %620 = vector.extract_strided_slice %537 {offsets = [0, 8], sizes = [2, 1], strides = [1, 1]} : vector<2x128xf32> to vector<2x1xf32>
    %621 = vector.extract_strided_slice %30 {offsets = [8, 0], sizes = [1, 128], strides = [1, 1]} : vector<10x128xf32> to vector<1x128xf32>
    %622 = vector.broadcast %620 : vector<2x1xf32> to vector<2x128xf32>
    %623 = vector.broadcast %621 : vector<1x128xf32> to vector<2x128xf32>
    %624 = arith.addf %622, %623 : vector<2x128xf32>
    %625 = arith.cmpf ogt, %624, %619 : vector<2x128xf32>
    %c8_i32_88 = arith.constant 8 : i32
    %626 = vector.broadcast %c8_i32_88 : i32 to vector<2x128xi32>
    %627 = arith.select %625, %626, %618 : vector<2x128xi1>, vector<2x128xi32>
    %628 = arith.maximumf %619, %624 : vector<2x128xf32>
    %629 = vector.extract_strided_slice %537 {offsets = [0, 9], sizes = [2, 1], strides = [1, 1]} : vector<2x128xf32> to vector<2x1xf32>
    %630 = vector.extract_strided_slice %30 {offsets = [9, 0], sizes = [1, 128], strides = [1, 1]} : vector<10x128xf32> to vector<1x128xf32>
    %631 = vector.broadcast %629 : vector<2x1xf32> to vector<2x128xf32>
    %632 = vector.broadcast %630 : vector<1x128xf32> to vector<2x128xf32>
    %633 = arith.addf %631, %632 : vector<2x128xf32>
    %634 = arith.cmpf ogt, %633, %628 : vector<2x128xf32>
    %c9_i32_89 = arith.constant 9 : i32
    %635 = vector.broadcast %c9_i32_89 : i32 to vector<2x128xi32>
    %636 = arith.select %634, %635, %627 : vector<2x128xi1>, vector<2x128xi32>
    %637 = arith.maximumf %628, %633 : vector<2x128xf32>
    %638 = vector.extract_strided_slice %26 {offsets = [0, 6, 0], sizes = [2, 1, 128], strides = [1, 1, 1]} : vector<2x8x128xf32> to vector<2x1x128xf32>
    %639 = vector.shape_cast %638 : vector<2x1x128xf32> to vector<2x128xf32>
    %640 = arith.addf %637, %639 : vector<2x128xf32>
    %c1_i32_90 = arith.constant 1 : i32
    %641 = vector.broadcast %c1_i32_90 : i32 to vector<2x1xi32>
    %642 = arith.subi %17, %641 : vector<2x1xi32>
    %c6_i32_91 = arith.constant 6 : i32
    %643 = vector.broadcast %c6_i32_91 : i32 to vector<2x1xi32>
    %644 = arith.cmpi eq, %642, %643 : vector<2x1xi32>
    %645 = vector.shape_cast %644 : vector<2x1xi1> to vector<2x1xi1>
    %646 = vector.broadcast %645 : vector<2x1xi1> to vector<2x128xi1>
    %647 = arith.select %646, %640, %544 : vector<2x128xi1>, vector<2x128xf32>
    %c6_i32_92 = arith.constant 6 : i32
    %648 = vector.broadcast %c6_i32_92 : i32 to vector<2x1xi32>
    %649 = arith.cmpi sgt, %17, %648 : vector<2x1xi32>
    %c0_i32_93 = arith.constant 0 : i32
    %650 = vector.broadcast %c0_i32_93 : i32 to vector<2x128xi32>
    %651 = vector.shape_cast %649 : vector<2x1xi1> to vector<2x1xi1>
    %652 = vector.broadcast %651 : vector<2x1xi1> to vector<2x128xi1>
    %653 = arith.select %652, %636, %650 : vector<2x128xi1>, vector<2x128xi32>
    %654 = vector.extract_strided_slice %640 {offsets = [0, 0], sizes = [2, 1], strides = [1, 1]} : vector<2x128xf32> to vector<2x1xf32>
    %655 = vector.extract_strided_slice %30 {offsets = [0, 0], sizes = [1, 128], strides = [1, 1]} : vector<10x128xf32> to vector<1x128xf32>
    %656 = vector.broadcast %654 : vector<2x1xf32> to vector<2x128xf32>
    %657 = vector.broadcast %655 : vector<1x128xf32> to vector<2x128xf32>
    %658 = arith.addf %656, %657 : vector<2x128xf32>
    %c0_i32_94 = arith.constant 0 : i32
    %659 = vector.broadcast %c0_i32_94 : i32 to vector<2x128xi32>
    %660 = vector.extract_strided_slice %640 {offsets = [0, 1], sizes = [2, 1], strides = [1, 1]} : vector<2x128xf32> to vector<2x1xf32>
    %661 = vector.extract_strided_slice %30 {offsets = [1, 0], sizes = [1, 128], strides = [1, 1]} : vector<10x128xf32> to vector<1x128xf32>
    %662 = vector.broadcast %660 : vector<2x1xf32> to vector<2x128xf32>
    %663 = vector.broadcast %661 : vector<1x128xf32> to vector<2x128xf32>
    %664 = arith.addf %662, %663 : vector<2x128xf32>
    %665 = arith.cmpf ogt, %664, %658 : vector<2x128xf32>
    %c1_i32_95 = arith.constant 1 : i32
    %666 = vector.broadcast %c1_i32_95 : i32 to vector<2x128xi32>
    %667 = arith.select %665, %666, %659 : vector<2x128xi1>, vector<2x128xi32>
    %668 = arith.maximumf %658, %664 : vector<2x128xf32>
    %669 = vector.extract_strided_slice %640 {offsets = [0, 2], sizes = [2, 1], strides = [1, 1]} : vector<2x128xf32> to vector<2x1xf32>
    %670 = vector.extract_strided_slice %30 {offsets = [2, 0], sizes = [1, 128], strides = [1, 1]} : vector<10x128xf32> to vector<1x128xf32>
    %671 = vector.broadcast %669 : vector<2x1xf32> to vector<2x128xf32>
    %672 = vector.broadcast %670 : vector<1x128xf32> to vector<2x128xf32>
    %673 = arith.addf %671, %672 : vector<2x128xf32>
    %674 = arith.cmpf ogt, %673, %668 : vector<2x128xf32>
    %c2_i32_96 = arith.constant 2 : i32
    %675 = vector.broadcast %c2_i32_96 : i32 to vector<2x128xi32>
    %676 = arith.select %674, %675, %667 : vector<2x128xi1>, vector<2x128xi32>
    %677 = arith.maximumf %668, %673 : vector<2x128xf32>
    %678 = vector.extract_strided_slice %640 {offsets = [0, 3], sizes = [2, 1], strides = [1, 1]} : vector<2x128xf32> to vector<2x1xf32>
    %679 = vector.extract_strided_slice %30 {offsets = [3, 0], sizes = [1, 128], strides = [1, 1]} : vector<10x128xf32> to vector<1x128xf32>
    %680 = vector.broadcast %678 : vector<2x1xf32> to vector<2x128xf32>
    %681 = vector.broadcast %679 : vector<1x128xf32> to vector<2x128xf32>
    %682 = arith.addf %680, %681 : vector<2x128xf32>
    %683 = arith.cmpf ogt, %682, %677 : vector<2x128xf32>
    %c3_i32_97 = arith.constant 3 : i32
    %684 = vector.broadcast %c3_i32_97 : i32 to vector<2x128xi32>
    %685 = arith.select %683, %684, %676 : vector<2x128xi1>, vector<2x128xi32>
    %686 = arith.maximumf %677, %682 : vector<2x128xf32>
    %687 = vector.extract_strided_slice %640 {offsets = [0, 4], sizes = [2, 1], strides = [1, 1]} : vector<2x128xf32> to vector<2x1xf32>
    %688 = vector.extract_strided_slice %30 {offsets = [4, 0], sizes = [1, 128], strides = [1, 1]} : vector<10x128xf32> to vector<1x128xf32>
    %689 = vector.broadcast %687 : vector<2x1xf32> to vector<2x128xf32>
    %690 = vector.broadcast %688 : vector<1x128xf32> to vector<2x128xf32>
    %691 = arith.addf %689, %690 : vector<2x128xf32>
    %692 = arith.cmpf ogt, %691, %686 : vector<2x128xf32>
    %c4_i32_98 = arith.constant 4 : i32
    %693 = vector.broadcast %c4_i32_98 : i32 to vector<2x128xi32>
    %694 = arith.select %692, %693, %685 : vector<2x128xi1>, vector<2x128xi32>
    %695 = arith.maximumf %686, %691 : vector<2x128xf32>
    %696 = vector.extract_strided_slice %640 {offsets = [0, 5], sizes = [2, 1], strides = [1, 1]} : vector<2x128xf32> to vector<2x1xf32>
    %697 = vector.extract_strided_slice %30 {offsets = [5, 0], sizes = [1, 128], strides = [1, 1]} : vector<10x128xf32> to vector<1x128xf32>
    %698 = vector.broadcast %696 : vector<2x1xf32> to vector<2x128xf32>
    %699 = vector.broadcast %697 : vector<1x128xf32> to vector<2x128xf32>
    %700 = arith.addf %698, %699 : vector<2x128xf32>
    %701 = arith.cmpf ogt, %700, %695 : vector<2x128xf32>
    %c5_i32_99 = arith.constant 5 : i32
    %702 = vector.broadcast %c5_i32_99 : i32 to vector<2x128xi32>
    %703 = arith.select %701, %702, %694 : vector<2x128xi1>, vector<2x128xi32>
    %704 = arith.maximumf %695, %700 : vector<2x128xf32>
    %705 = vector.extract_strided_slice %640 {offsets = [0, 6], sizes = [2, 1], strides = [1, 1]} : vector<2x128xf32> to vector<2x1xf32>
    %706 = vector.extract_strided_slice %30 {offsets = [6, 0], sizes = [1, 128], strides = [1, 1]} : vector<10x128xf32> to vector<1x128xf32>
    %707 = vector.broadcast %705 : vector<2x1xf32> to vector<2x128xf32>
    %708 = vector.broadcast %706 : vector<1x128xf32> to vector<2x128xf32>
    %709 = arith.addf %707, %708 : vector<2x128xf32>
    %710 = arith.cmpf ogt, %709, %704 : vector<2x128xf32>
    %c6_i32_100 = arith.constant 6 : i32
    %711 = vector.broadcast %c6_i32_100 : i32 to vector<2x128xi32>
    %712 = arith.select %710, %711, %703 : vector<2x128xi1>, vector<2x128xi32>
    %713 = arith.maximumf %704, %709 : vector<2x128xf32>
    %714 = vector.extract_strided_slice %640 {offsets = [0, 7], sizes = [2, 1], strides = [1, 1]} : vector<2x128xf32> to vector<2x1xf32>
    %715 = vector.extract_strided_slice %30 {offsets = [7, 0], sizes = [1, 128], strides = [1, 1]} : vector<10x128xf32> to vector<1x128xf32>
    %716 = vector.broadcast %714 : vector<2x1xf32> to vector<2x128xf32>
    %717 = vector.broadcast %715 : vector<1x128xf32> to vector<2x128xf32>
    %718 = arith.addf %716, %717 : vector<2x128xf32>
    %719 = arith.cmpf ogt, %718, %713 : vector<2x128xf32>
    %c7_i32_101 = arith.constant 7 : i32
    %720 = vector.broadcast %c7_i32_101 : i32 to vector<2x128xi32>
    %721 = arith.select %719, %720, %712 : vector<2x128xi1>, vector<2x128xi32>
    %722 = arith.maximumf %713, %718 : vector<2x128xf32>
    %723 = vector.extract_strided_slice %640 {offsets = [0, 8], sizes = [2, 1], strides = [1, 1]} : vector<2x128xf32> to vector<2x1xf32>
    %724 = vector.extract_strided_slice %30 {offsets = [8, 0], sizes = [1, 128], strides = [1, 1]} : vector<10x128xf32> to vector<1x128xf32>
    %725 = vector.broadcast %723 : vector<2x1xf32> to vector<2x128xf32>
    %726 = vector.broadcast %724 : vector<1x128xf32> to vector<2x128xf32>
    %727 = arith.addf %725, %726 : vector<2x128xf32>
    %728 = arith.cmpf ogt, %727, %722 : vector<2x128xf32>
    %c8_i32_102 = arith.constant 8 : i32
    %729 = vector.broadcast %c8_i32_102 : i32 to vector<2x128xi32>
    %730 = arith.select %728, %729, %721 : vector<2x128xi1>, vector<2x128xi32>
    %731 = arith.maximumf %722, %727 : vector<2x128xf32>
    %732 = vector.extract_strided_slice %640 {offsets = [0, 9], sizes = [2, 1], strides = [1, 1]} : vector<2x128xf32> to vector<2x1xf32>
    %733 = vector.extract_strided_slice %30 {offsets = [9, 0], sizes = [1, 128], strides = [1, 1]} : vector<10x128xf32> to vector<1x128xf32>
    %734 = vector.broadcast %732 : vector<2x1xf32> to vector<2x128xf32>
    %735 = vector.broadcast %733 : vector<1x128xf32> to vector<2x128xf32>
    %736 = arith.addf %734, %735 : vector<2x128xf32>
    %737 = arith.cmpf ogt, %736, %731 : vector<2x128xf32>
    %c9_i32_103 = arith.constant 9 : i32
    %738 = vector.broadcast %c9_i32_103 : i32 to vector<2x128xi32>
    %739 = arith.select %737, %738, %730 : vector<2x128xi1>, vector<2x128xi32>
    %740 = arith.maximumf %731, %736 : vector<2x128xf32>
    %741 = vector.extract_strided_slice %26 {offsets = [0, 7, 0], sizes = [2, 1, 128], strides = [1, 1, 1]} : vector<2x8x128xf32> to vector<2x1x128xf32>
    %742 = vector.shape_cast %741 : vector<2x1x128xf32> to vector<2x128xf32>
    %743 = arith.addf %740, %742 : vector<2x128xf32>
    %c1_i32_104 = arith.constant 1 : i32
    %744 = vector.broadcast %c1_i32_104 : i32 to vector<2x1xi32>
    %745 = arith.subi %17, %744 : vector<2x1xi32>
    %c7_i32_105 = arith.constant 7 : i32
    %746 = vector.broadcast %c7_i32_105 : i32 to vector<2x1xi32>
    %747 = arith.cmpi eq, %745, %746 : vector<2x1xi32>
    %748 = vector.shape_cast %747 : vector<2x1xi1> to vector<2x1xi1>
    %749 = vector.broadcast %748 : vector<2x1xi1> to vector<2x128xi1>
    %750 = arith.select %749, %743, %647 : vector<2x128xi1>, vector<2x128xf32>
    %c7_i32_106 = arith.constant 7 : i32
    %751 = vector.broadcast %c7_i32_106 : i32 to vector<2x1xi32>
    %752 = arith.cmpi sgt, %17, %751 : vector<2x1xi32>
    %c0_i32_107 = arith.constant 0 : i32
    %753 = vector.broadcast %c0_i32_107 : i32 to vector<2x128xi32>
    %754 = vector.shape_cast %752 : vector<2x1xi1> to vector<2x1xi1>
    %755 = vector.broadcast %754 : vector<2x1xi1> to vector<2x128xi1>
    %756 = arith.select %755, %739, %753 : vector<2x128xi1>, vector<2x128xi32>
    %757 = tpu.iota {dimensions = array<i32: 1>} : vector<2x128xi32>
    %c0_108 = arith.constant 0 : index
    %c0_109 = arith.constant 0 : index
    %758 = vector.load %arg6[%c0_108, %c0_109] : memref<1x128xf32, #tpu.memory_space<vmem>>, vector<1x128xf32>
    %759 = vector.broadcast %758 : vector<1x128xf32> to vector<2x128xf32>
    %760 = arith.addf %750, %759 : vector<2x128xf32>
    %cst_110 = arith.constant dense<0xFF800000> : vector<2xf32>
    %761 = vector.multi_reduction <maximumf>, %760, %cst_110 [1] : vector<2x128xf32> to vector<2xf32>
    %762 = vector.shape_cast %761 : vector<2xf32> to vector<2x1xf32>
    %763 = vector.broadcast %762 : vector<2x1xf32> to vector<2x128xf32>
    %764 = arith.cmpf oeq, %760, %763 : vector<2x128xf32>
    %c128_i32 = arith.constant 128 : i32
    %765 = vector.broadcast %c128_i32 : i32 to vector<2x128xi32>
    %766 = arith.select %764, %757, %765 : vector<2x128xi1>, vector<2x128xi32>
    %cst_111 = arith.constant dense<2147483647> : vector<2xi32>
    %767 = vector.multi_reduction <minsi>, %766, %cst_111 [1] : vector<2x128xi32> to vector<2xi32>
    %768 = vector.shape_cast %767 : vector<2xi32> to vector<2x1xi32>
    %769 = tpu.iota {dimensions = array<i32: 1>} : vector<2x128xi32>
    %c7_i32_112 = arith.constant 7 : i32
    %770 = vector.broadcast %c7_i32_112 : i32 to vector<2x128xi32>
    %771 = arith.cmpi eq, %769, %770 : vector<2x128xi32>
    %c0_i32_113 = arith.constant 0 : i32
    %772 = vector.broadcast %c0_i32_113 : i32 to vector<2x128xi32>
    %773 = vector.shape_cast %768 : vector<2x1xi32> to vector<2x1xi32>
    %774 = vector.broadcast %773 : vector<2x1xi32> to vector<2x128xi32>
    %775 = arith.select %771, %774, %772 : vector<2x128xi1>, vector<2x128xi32>
    %776 = vector.broadcast %768 : vector<2x1xi32> to vector<2x128xi32>
    %777 = arith.cmpi eq, %757, %776 : vector<2x128xi32>
    %c0_i32_114 = arith.constant 0 : i32
    %778 = vector.broadcast %c0_i32_114 : i32 to vector<2x128xi32>
    %779 = arith.select %777, %756, %778 : vector<2x128xi1>, vector<2x128xi32>
    %cst_115 = arith.constant dense<0> : vector<2xi32>
    %780 = vector.multi_reduction <add>, %779, %cst_115 [1] : vector<2x128xi32> to vector<2xi32>
    %781 = vector.shape_cast %780 : vector<2xi32> to vector<2x1xi32>
    %c1_i32_116 = arith.constant 1 : i32
    %782 = vector.broadcast %c1_i32_116 : i32 to vector<2x1xi32>
    %783 = arith.subi %17, %782 : vector<2x1xi32>
    %c6_i32_117 = arith.constant 6 : i32
    %784 = vector.broadcast %c6_i32_117 : i32 to vector<2x1xi32>
    %785 = arith.cmpi eq, %783, %784 : vector<2x1xi32>
    %786 = arith.select %785, %768, %781 : vector<2x1xi1>, vector<2x1xi32>
    %c6_i32_118 = arith.constant 6 : i32
    %787 = vector.broadcast %c6_i32_118 : i32 to vector<2x128xi32>
    %788 = arith.cmpi eq, %769, %787 : vector<2x128xi32>
    %789 = vector.shape_cast %786 : vector<2x1xi32> to vector<2x1xi32>
    %790 = vector.broadcast %789 : vector<2x1xi32> to vector<2x128xi32>
    %791 = arith.select %788, %790, %775 : vector<2x128xi1>, vector<2x128xi32>
    %792 = vector.broadcast %786 : vector<2x1xi32> to vector<2x128xi32>
    %793 = arith.cmpi eq, %757, %792 : vector<2x128xi32>
    %c0_i32_119 = arith.constant 0 : i32
    %794 = vector.broadcast %c0_i32_119 : i32 to vector<2x128xi32>
    %795 = arith.select %793, %653, %794 : vector<2x128xi1>, vector<2x128xi32>
    %cst_120 = arith.constant dense<0> : vector<2xi32>
    %796 = vector.multi_reduction <add>, %795, %cst_120 [1] : vector<2x128xi32> to vector<2xi32>
    %797 = vector.shape_cast %796 : vector<2xi32> to vector<2x1xi32>
    %c1_i32_121 = arith.constant 1 : i32
    %798 = vector.broadcast %c1_i32_121 : i32 to vector<2x1xi32>
    %799 = arith.subi %17, %798 : vector<2x1xi32>
    %c5_i32_122 = arith.constant 5 : i32
    %800 = vector.broadcast %c5_i32_122 : i32 to vector<2x1xi32>
    %801 = arith.cmpi eq, %799, %800 : vector<2x1xi32>
    %802 = arith.select %801, %768, %797 : vector<2x1xi1>, vector<2x1xi32>
    %c5_i32_123 = arith.constant 5 : i32
    %803 = vector.broadcast %c5_i32_123 : i32 to vector<2x128xi32>
    %804 = arith.cmpi eq, %769, %803 : vector<2x128xi32>
    %805 = vector.shape_cast %802 : vector<2x1xi32> to vector<2x1xi32>
    %806 = vector.broadcast %805 : vector<2x1xi32> to vector<2x128xi32>
    %807 = arith.select %804, %806, %791 : vector<2x128xi1>, vector<2x128xi32>
    %808 = vector.broadcast %802 : vector<2x1xi32> to vector<2x128xi32>
    %809 = arith.cmpi eq, %757, %808 : vector<2x128xi32>
    %c0_i32_124 = arith.constant 0 : i32
    %810 = vector.broadcast %c0_i32_124 : i32 to vector<2x128xi32>
    %811 = arith.select %809, %550, %810 : vector<2x128xi1>, vector<2x128xi32>
    %cst_125 = arith.constant dense<0> : vector<2xi32>
    %812 = vector.multi_reduction <add>, %811, %cst_125 [1] : vector<2x128xi32> to vector<2xi32>
    %813 = vector.shape_cast %812 : vector<2xi32> to vector<2x1xi32>
    %c1_i32_126 = arith.constant 1 : i32
    %814 = vector.broadcast %c1_i32_126 : i32 to vector<2x1xi32>
    %815 = arith.subi %17, %814 : vector<2x1xi32>
    %c4_i32_127 = arith.constant 4 : i32
    %816 = vector.broadcast %c4_i32_127 : i32 to vector<2x1xi32>
    %817 = arith.cmpi eq, %815, %816 : vector<2x1xi32>
    %818 = arith.select %817, %768, %813 : vector<2x1xi1>, vector<2x1xi32>
    %c4_i32_128 = arith.constant 4 : i32
    %819 = vector.broadcast %c4_i32_128 : i32 to vector<2x128xi32>
    %820 = arith.cmpi eq, %769, %819 : vector<2x128xi32>
    %821 = vector.shape_cast %818 : vector<2x1xi32> to vector<2x1xi32>
    %822 = vector.broadcast %821 : vector<2x1xi32> to vector<2x128xi32>
    %823 = arith.select %820, %822, %807 : vector<2x128xi1>, vector<2x128xi32>
    %824 = vector.broadcast %818 : vector<2x1xi32> to vector<2x128xi32>
    %825 = arith.cmpi eq, %757, %824 : vector<2x128xi32>
    %c0_i32_129 = arith.constant 0 : i32
    %826 = vector.broadcast %c0_i32_129 : i32 to vector<2x128xi32>
    %827 = arith.select %825, %447, %826 : vector<2x128xi1>, vector<2x128xi32>
    %cst_130 = arith.constant dense<0> : vector<2xi32>
    %828 = vector.multi_reduction <add>, %827, %cst_130 [1] : vector<2x128xi32> to vector<2xi32>
    %829 = vector.shape_cast %828 : vector<2xi32> to vector<2x1xi32>
    %c1_i32_131 = arith.constant 1 : i32
    %830 = vector.broadcast %c1_i32_131 : i32 to vector<2x1xi32>
    %831 = arith.subi %17, %830 : vector<2x1xi32>
    %c3_i32_132 = arith.constant 3 : i32
    %832 = vector.broadcast %c3_i32_132 : i32 to vector<2x1xi32>
    %833 = arith.cmpi eq, %831, %832 : vector<2x1xi32>
    %834 = arith.select %833, %768, %829 : vector<2x1xi1>, vector<2x1xi32>
    %c3_i32_133 = arith.constant 3 : i32
    %835 = vector.broadcast %c3_i32_133 : i32 to vector<2x128xi32>
    %836 = arith.cmpi eq, %769, %835 : vector<2x128xi32>
    %837 = vector.shape_cast %834 : vector<2x1xi32> to vector<2x1xi32>
    %838 = vector.broadcast %837 : vector<2x1xi32> to vector<2x128xi32>
    %839 = arith.select %836, %838, %823 : vector<2x128xi1>, vector<2x128xi32>
    %840 = vector.broadcast %834 : vector<2x1xi32> to vector<2x128xi32>
    %841 = arith.cmpi eq, %757, %840 : vector<2x128xi32>
    %c0_i32_134 = arith.constant 0 : i32
    %842 = vector.broadcast %c0_i32_134 : i32 to vector<2x128xi32>
    %843 = arith.select %841, %344, %842 : vector<2x128xi1>, vector<2x128xi32>
    %cst_135 = arith.constant dense<0> : vector<2xi32>
    %844 = vector.multi_reduction <add>, %843, %cst_135 [1] : vector<2x128xi32> to vector<2xi32>
    %845 = vector.shape_cast %844 : vector<2xi32> to vector<2x1xi32>
    %c1_i32_136 = arith.constant 1 : i32
    %846 = vector.broadcast %c1_i32_136 : i32 to vector<2x1xi32>
    %847 = arith.subi %17, %846 : vector<2x1xi32>
    %c2_i32_137 = arith.constant 2 : i32
    %848 = vector.broadcast %c2_i32_137 : i32 to vector<2x1xi32>
    %849 = arith.cmpi eq, %847, %848 : vector<2x1xi32>
    %850 = arith.select %849, %768, %845 : vector<2x1xi1>, vector<2x1xi32>
    %c2_i32_138 = arith.constant 2 : i32
    %851 = vector.broadcast %c2_i32_138 : i32 to vector<2x128xi32>
    %852 = arith.cmpi eq, %769, %851 : vector<2x128xi32>
    %853 = vector.shape_cast %850 : vector<2x1xi32> to vector<2x1xi32>
    %854 = vector.broadcast %853 : vector<2x1xi32> to vector<2x128xi32>
    %855 = arith.select %852, %854, %839 : vector<2x128xi1>, vector<2x128xi32>
    %856 = vector.broadcast %850 : vector<2x1xi32> to vector<2x128xi32>
    %857 = arith.cmpi eq, %757, %856 : vector<2x128xi32>
    %c0_i32_139 = arith.constant 0 : i32
    %858 = vector.broadcast %c0_i32_139 : i32 to vector<2x128xi32>
    %859 = arith.select %857, %241, %858 : vector<2x128xi1>, vector<2x128xi32>
    %cst_140 = arith.constant dense<0> : vector<2xi32>
    %860 = vector.multi_reduction <add>, %859, %cst_140 [1] : vector<2x128xi32> to vector<2xi32>
    %861 = vector.shape_cast %860 : vector<2xi32> to vector<2x1xi32>
    %c1_i32_141 = arith.constant 1 : i32
    %862 = vector.broadcast %c1_i32_141 : i32 to vector<2x1xi32>
    %863 = arith.subi %17, %862 : vector<2x1xi32>
    %c1_i32_142 = arith.constant 1 : i32
    %864 = vector.broadcast %c1_i32_142 : i32 to vector<2x1xi32>
    %865 = arith.cmpi eq, %863, %864 : vector<2x1xi32>
    %866 = arith.select %865, %768, %861 : vector<2x1xi1>, vector<2x1xi32>
    %c1_i32_143 = arith.constant 1 : i32
    %867 = vector.broadcast %c1_i32_143 : i32 to vector<2x128xi32>
    %868 = arith.cmpi eq, %769, %867 : vector<2x128xi32>
    %869 = vector.shape_cast %866 : vector<2x1xi32> to vector<2x1xi32>
    %870 = vector.broadcast %869 : vector<2x1xi32> to vector<2x128xi32>
    %871 = arith.select %868, %870, %855 : vector<2x128xi1>, vector<2x128xi32>
    %872 = vector.broadcast %866 : vector<2x1xi32> to vector<2x128xi32>
    %873 = arith.cmpi eq, %757, %872 : vector<2x128xi32>
    %c0_i32_144 = arith.constant 0 : i32
    %874 = vector.broadcast %c0_i32_144 : i32 to vector<2x128xi32>
    %875 = arith.select %873, %138, %874 : vector<2x128xi1>, vector<2x128xi32>
    %cst_145 = arith.constant dense<0> : vector<2xi32>
    %876 = vector.multi_reduction <add>, %875, %cst_145 [1] : vector<2x128xi32> to vector<2xi32>
    %877 = vector.shape_cast %876 : vector<2xi32> to vector<2x1xi32>
    %c1_i32_146 = arith.constant 1 : i32
    %878 = vector.broadcast %c1_i32_146 : i32 to vector<2x1xi32>
    %879 = arith.subi %17, %878 : vector<2x1xi32>
    %c0_i32_147 = arith.constant 0 : i32
    %880 = vector.broadcast %c0_i32_147 : i32 to vector<2x1xi32>
    %881 = arith.cmpi eq, %879, %880 : vector<2x1xi32>
    %882 = arith.select %881, %768, %877 : vector<2x1xi1>, vector<2x1xi32>
    %c0_i32_148 = arith.constant 0 : i32
    %883 = vector.broadcast %c0_i32_148 : i32 to vector<2x128xi32>
    %884 = arith.cmpi eq, %769, %883 : vector<2x128xi32>
    %885 = vector.shape_cast %882 : vector<2x1xi32> to vector<2x1xi32>
    %886 = vector.broadcast %885 : vector<2x1xi32> to vector<2x128xi32>
    %887 = arith.select %884, %886, %871 : vector<2x128xi1>, vector<2x128xi32>
    %c0_149 = arith.constant 0 : index
    %c0_150 = arith.constant 0 : index
    %c0_151 = arith.constant 0 : index
    %888 = vector.load %arg7[%c0_149, %c0_150, %c0_151] : memref<1x2x128xi32, #tpu.memory_space<vmem>>, vector<1x2x128xi32>
    %889 = vector.shape_cast %888 : vector<1x2x128xi32> to vector<2x128xi32>
    %890 = vector.shape_cast %887 : vector<2x128xi32> to vector<1x2x128xi32>
    tpu.vector_store %arg7[%c0_149, %c0_150, %c0_151], %890 {strides = array<i32>} : memref<1x2x128xi32, #tpu.memory_space<vmem>>, vector<1x2x128xi32>,
    return
  }
  func.func @transform_0(%arg0: i32, %arg1: memref<2xi32, #tpu.memory_space<smem>>) -> (i32, i32, i32, i32) {
    %c0_i32 = arith.constant 0 : i32
    %c0_i32_0 = arith.constant 0 : i32
    %c0_i32_1 = arith.constant 0 : i32
    %c0_i32_2 = arith.constant 0 : i32
    return %arg0, %c0_i32, %c0_i32_0, %c0_i32_1 : i32, i32, i32, i32
  }
  func.func @transform_1(%arg0: i32, %arg1: memref<2xi32, #tpu.memory_space<smem>>) -> (i32, i32) {
    %c0_i32 = arith.constant 0 : i32
    %c0_i32_0 = arith.constant 0 : i32
    %c0_i32_1 = arith.constant 0 : i32
    return %c0_i32, %c0_i32_0 : i32, i32
  }
  func.func @transform_2(%arg0: i32, %arg1: memref<2xi32, #tpu.memory_space<smem>>) -> (i32, i32) {
    %c0_i32 = arith.constant 0 : i32
    %c0_i32_0 = arith.constant 0 : i32
    %c0_i32_1 = arith.constant 0 : i32
    return %c0_i32, %c0_i32_0 : i32, i32
  }
  func.func @transform_3(%arg0: i32, %arg1: memref<2xi32, #tpu.memory_space<smem>>) -> (i32, i32) {
    %c0_i32 = arith.constant 0 : i32
    %c0_i32_0 = arith.constant 0 : i32
    %c0_i32_1 = arith.constant 0 : i32
    return %c0_i32, %c0_i32_0 : i32, i32
  }
  func.func @transform_4(%arg0: i32, %arg1: memref<2xi32, #tpu.memory_space<smem>>) -> (i32, i32) {
    %c0_i32 = arith.constant 0 : i32
    %c0_i32_0 = arith.constant 0 : i32
    %c0_i32_1 = arith.constant 0 : i32
    return %c0_i32, %c0_i32_0 : i32, i32
  }
  func.func @transform_5(%arg0: i32, %arg1: memref<2xi32, #tpu.memory_space<smem>>) -> (i32, i32, i32) {
    %c0_i32 = arith.constant 0 : i32
    %c0_i32_0 = arith.constant 0 : i32
    %c0_i32_1 = arith.constant 0 : i32
    return %arg0, %c0_i32, %c0_i32_0 : i32, i32, i32
  }
  func.func @transform_6(%arg0: i32, %arg1: memref<2xi32, #tpu.memory_space<smem>>) -> (i32, i32, i32, i32) {
    %c0_i32 = arith.constant 0 : i32
    %c0_i32_0 = arith.constant 0 : i32
    %c0_i32_1 = arith.constant 0 : i32
    %c0_i32_2 = arith.constant 0 : i32
    return %arg0, %c0_i32, %c0_i32_0, %c0_i32_1 : i32, i32, i32, i32
  }
}

</mosaic_0001>

<bundles_post_ra>
// kernel: bert_crf_forward.1
= control target key start
LH: loop header
LB: loop body
LE: loop exit
PB: predicated region body
PF: predicated region fallthrough
CT: control target
= control target key end

     0   :  { %s2492_s27 = smov [#allocation3]   ;;  %s3312_s0 = inlined_call_operand.vmem [shape: s32[2], index: 0, kind: input, shape index: {}]   ;;  %s3313_s1 = inlined_call_operand.vmem [shape: bf16[1,2,8,768], index: 1, kind: input, shape index: {}]   ;;  %s3314_s2 = inlined_call_operand.vmem [shape: bf16[768,128], index: 2, kind: input, shape index: {}]   ;;  %s3315_s3 = inlined_call_operand.vmem [shape: f32[1,128], index: 3, kind: input, shape index: {}]   ;;  %s3316_s4 = inlined_call_operand.vmem [shape: f32[16,128], index: 4, kind: input, shape index: {}]   ;;  %s3317_s5 = inlined_call_operand.vmem [shape: f32[1,128], index: 5, kind: input, shape index: {}]   ;;  %s3318_s6 = inlined_call_operand.hbm [shape: s32[1,2,128], index: 6, kind: output, shape index: {0}]   ;;  %s3319_s7 = inlined_call_operand.hbm [shape: f32[1,2,8,128], index: 7, kind: output, shape index: {1}]  }
   0x1   :  { %s14_s26 = sshll.u32 %s3312_s0, 4  ;;  %s15_s26 = int_to_ptr.vmem [resolvable:$true] %s14_s26 }
   0x2   :  { %17 = dma.vmem_to_smem %s15_s26, 16, %s2492_s27, [#allocation2] }
   0x3   :  { %2486 = dma.done.wait [#allocation2], 16 }
   0x4   :  { %2487 = vsyncadd [#allocation2], 4294967280 }
   0x5   :  { %20 = sfence }
   0x6   :  { %21 = vsyncpa [#allocation5], 0  ;;  %v2226_v0 = vld [vmem:[%s3314_s2 + $0x38] sm:$0xff]  ;;  %v2225_v4 = vld [vmem:[%s3314_s2 + $0x30] sm:$0xff] }
   0x7   :  { %v2234_v1 = vld [vmem:[%s3314_s2 + $0x78] sm:$0xff]  ;;  %469 = vmatpush.bf16.msra.mxu0 %v2226_v0  ;;  %v2233_v5 = vld [vmem:[%s3314_s2 + $0x70] sm:$0xff]  ;;  %v2224_v8 = vld [vmem:[%s3314_s2 + $0x28] sm:$0xff] }
   0x8   :  { %v2242_v2 = vld [vmem:[%s3314_s2 + $0xb8] sm:$0xff]  ;;  %483 = vmatpush.bf16.msra.mxu1 %v2234_v1  ;;  %v2241_v6 = vld [vmem:[%s3314_s2 + $0xb0] sm:$0xff]  ;;  %v2232_v9 = vld [vmem:[%s3314_s2 + $0x68] sm:$0xff] }
   0x9   :  { %v2250_v3 = vld [vmem:[%s3314_s2 + $0xf8] sm:$0xff]  ;;  %497 = vmatpush.bf16.msra.mxu2 %v2242_v2  ;;  %v2249_v7 = vld [vmem:[%s3314_s2 + $0xf0] sm:$0xff]  ;;  %v2240_v10 = vld [vmem:[%s3314_s2 + $0xa8] sm:$0xff] }
   0xa   :  { %511 = vmatpush.bf16.msra.mxu3 %v2250_v3  ;;  %v2248_v11 = vld [vmem:[%s3314_s2 + $0xe8] sm:$0xff]  ;;  %v2223_v12 = vld [vmem:[%s3314_s2 + $0x20] sm:$0xff]  ;;  %v2222_v16 = vld [vmem:[%s3314_s2 + $0x18] sm:$0xff] }
   0xb   :  { %470 = vmatpush.bf16.msra.mxu0 %v2225_v4  ;;  %v2231_v13 = vld [vmem:[%s3314_s2 + $0x60] sm:$0xff]  ;;  %v2230_v17 = vld [vmem:[%s3314_s2 + $0x58] sm:$0xff]  ;;  %v2221_v20 = vld [vmem:[%s3314_s2 + $0x10] sm:$0xff] }
   0xc   :  { %484 = vmatpush.bf16.msra.mxu1 %v2233_v5  ;;  %v2239_v14 = vld [vmem:[%s3314_s2 + $0xa0] sm:$0xff]  ;;  %v2238_v18 = vld [vmem:[%s3314_s2 + $0x98] sm:$0xff]  ;;  %v2229_v21 = vld [vmem:[%s3314_s2 + $0x50] sm:$0xff] }
   0xd   :  { %498 = vmatpush.bf16.msra.mxu2 %v2241_v6  ;;  %v2247_v15 = vld [vmem:[%s3314_s2 + $0xe0] sm:$0xff]  ;;  %v2246_v19 = vld [vmem:[%s3314_s2 + $0xd8] sm:$0xff] }
   0xe   :  { %512 = vmatpush.bf16.msra.mxu3 %v2249_v7 }
   0xf   :  { %471 = vmatpush.bf16.msra.mxu0 %v2224_v8 }
  0x10   :  { %485 = vmatpush.bf16.msra.mxu1 %v2232_v9 }
  0x11   :  { %499 = vmatpush.bf16.msra.mxu2 %v2240_v10 }
  0x12   :  { %513 = vmatpush.bf16.msra.mxu3 %v2248_v11 }
  0x13   :  { %472 = vmatpush.bf16.msra.mxu0 %v2223_v12 }
  0x14   :  { %486 = vmatpush.bf16.msra.mxu1 %v2231_v13 }
  0x15   :  { %500 = vmatpush.bf16.msra.mxu2 %v2239_v14 }
  0x16   :  { %514 = vmatpush.bf16.msra.mxu3 %v2247_v15 }
  0x17   :  { %473 = vmatpush.bf16.msra.mxu0 %v2222_v16 }
  0x18   :  { %487 = vmatpush.bf16.msra.mxu1 %v2230_v17 }
  0x19   :  { %22 = vsyncpa [#allocation7], 0  ;;  %501 = vmatpush.bf16.msra.mxu2 %v2238_v18  ;;  %v2237_v22 = vld [vmem:[%s3314_s2 + $0x90] sm:$0xff]  ;;  %v2220_v24 = vld [vmem:[%s3314_s2 + $0x8] sm:$0xff]  ;;  %v2493_v2 = vmov 6   ;;  %v2494_v3 = vmov 2  }
  0x1a   :  { %515 = vmatpush.bf16.msra.mxu3 %v2246_v19  ;;  %v2245_v23 = vld [vmem:[%s3314_s2 + $0xd0] sm:$0xff]  ;;  %v2228_v25 = vld [vmem:[%s3314_s2 + $0x48] sm:$0xff]  ;;  %v2219_v28 = vld [vmem:[%s3314_s2] sm:$0xff]  ;;  %2288 = vset.pattern.permute.xlu0 %v2493_v2  ;;  %v2495_v4 = vmov 0   ;;  %vm740_vm0 = vcmask 1041409   ;;  %s1995_s8 = sld [smem:[#allocation3 + $0x1]] }
  0x1b   :  { %474 = vmatpush.bf16.msra.mxu0 %v2221_v20  ;;  %v2236_v26 = vld [vmem:[%s3314_s2 + $0x88] sm:$0xff]  ;;  %v2227_v29 = vld [vmem:[%s3314_s2 + $0x40] sm:$0xff]  ;;  %v2216_v31 = vld [vmem:[%s3313_s1 + $0x14] sm:$0xf0]  ;;  %2284 = vset.pattern.permute.xlu2 %v2494_v3  ;;  %s1978_s13 = sshll.u32 %s3319_s7, 4  ;;  %s2504_s14 = smov 128   ;;  %s1979_s13 = int_to_ptr.hbm [resolvable:$true] %s1978_s13 }
  0x1c   :  { %488 = vmatpush.bf16.msra.mxu1 %v2229_v21  ;;  %v2244_v27 = vld [vmem:[%s3314_s2 + $0xc8] sm:$0xff]  ;;  %v1998_v30 = vld [vmem:[%s3313_s1] sm:$0xf]  ;;  %v2213_v32 = vld [vmem:[%s3313_s1 + $0x4] sm:$0xf]  ;;  %2282 = vset.pattern.permute.xlu1 %v2495_v4  ;;  %s2505_s15 = smov 8  }
  0x1d   :  { %502 = vmatpush.bf16.msra.mxu2 %v2237_v22  ;;  %v2000_v33 = vld [vmem:[%s3313_s1 + $0x18] sm:$0xf0]  ;;  %v2235_v36 = vld [vmem:[%s3314_s2 + $0x80] sm:$0xff]  ;;  %v2006_v38 = vld [vmem:[%s3313_s1 + $0x8] sm:$0xf]  ;;  %v1999_v40 = vor.u32 %v2216_v31, %v1998_v30  ;;  %s2506_s16 = smov [#allocation4]  }
  0x1e   :  { %516 = vmatpush.bf16.msra.mxu3 %v2245_v23  ;;  %v2258_v34 = vld [vmem:[%s3314_s2 + $0x138] sm:$0xff]  ;;  %v2243_v37 = vld [vmem:[%s3314_s2 + $0xc0] sm:$0xff]  ;;  %v2214_v41 = vld [vmem:[%s3313_s1 + $0xc] sm:$0xf]  ;;  %v2003_v43 = vor.u32 %v2213_v32, %v2000_v33  ;;  %s1966_s17 = sshll.u32 %s2506_s16, 4  ;;  %s1968_s7 = sshll.u32 %s3318_s6, 4  ;;  %s1967_s17 = int_to_ptr.vmem [resolvable:$true] %s1966_s17  ;;  %s1969_s7 = int_to_ptr.hbm [resolvable:$true] %s1968_s7 }
  0x1f   :  { %475 = vmatpush.bf16.msra.mxu0 %v2220_v24  ;;  %v2266_v35 = vld [vmem:[%s3314_s2 + $0x178] sm:$0xff]  ;;  %v2217_v39 = vld [vmem:[%s3313_s1 + $0x1c] sm:$0xf0]  ;;  %v2008_v42 = vld [vmem:[%s3313_s1 + $0x20] sm:$0xf0] }
  0x20   :  { %489 = vmatpush.bf16.msra.mxu1 %v2228_v25  ;;  %v2257_v44 = vld [vmem:[%s3314_s2 + $0x130] sm:$0xff]  ;;  %v2007_v46 = vor.u32 %v2217_v39, %v2006_v38  ;;  %v2011_v47 = vor.u32 %v2214_v41, %v2008_v42  ;;  %v2256_v48 = vld [vmem:[%s3314_s2 + $0x128] sm:$0xff]  ;;  %v2255_v50 = vld [vmem:[%s3314_s2 + $0x120] sm:$0xff]  ;;  %v2498_v38 = vmov 7   ;;  %v2499_v39 = vmov 4  }
  0x21   :  { %503 = vmatpush.bf16.msra.mxu2 %v2236_v26  ;;  %v2265_v45 = vld [vmem:[%s3314_s2 + $0x170] sm:$0xff]  ;;  %v2264_v49 = vld [vmem:[%s3314_s2 + $0x168] sm:$0xff]  ;;  %v2263_v51 = vld [vmem:[%s3314_s2 + $0x160] sm:$0xff]  ;;  %v2501_v41 = vmov 5   ;;  %v2502_v42 = vmov 9  }
  0x22   :  { %517 = vmatpush.bf16.msra.mxu3 %v2244_v27  ;;  %v2254_v52 = vld [vmem:[%s3314_s2 + $0x118] sm:$0xff]  ;;  %v2253_v54 = vld [vmem:[%s3314_s2 + $0x110] sm:$0xff]  ;;  %v2252_v56 = vld [vmem:[%s3314_s2 + $0x108] sm:$0xff] }
  0x23   :  { %476 = vmatpush.bf16.msra.mxu0 %v2219_v28  ;;  %v2262_v53 = vld [vmem:[%s3314_s2 + $0x158] sm:$0xff]  ;;  %v2261_v55 = vld [vmem:[%s3314_s2 + $0x150] sm:$0xff]  ;;  %v2260_v57 = vld [vmem:[%s3314_s2 + $0x148] sm:$0xff] }
  0x24   :  { %490 = vmatpush.bf16.msra.mxu1 %v2227_v29  ;;  %v2251_v58 = vld [vmem:[%s3314_s2 + $0x100] sm:$0xff]  ;;  %v2014_v60 = vld [vmem:[%s3313_s1 + $0x10] sm:$0xf]  ;;  %v2218_v61 = vld [vmem:[%s3313_s1 + $0x24] sm:$0xf0] }
  0x25   :  { %504 = vmatpush.bf16.msra.mxu2 %v2235_v36  ;;  %v2259_v59 = vld [vmem:[%s3314_s2 + $0x140] sm:$0xff]  ;;  %v2215_v62 = vld [vmem:[%s3313_s1 + $0x14] sm:$0xf]  ;;  %v2016_v63 = vld [vmem:[%s3313_s1 + $0x28] sm:$0xf0]  ;;  %v2015_v0 = vor.u32 %v2218_v61, %v2014_v60  ;;  %v2497_v36 = vmov 1  }
  0x26   :  { %518 = vmatpush.bf16.msra.mxu3 %v2243_v37  ;;  %477 = vmatmul.bf16.vlgmr.msra.gmra.mxu0 %v1999_v40  ;;  %v2019_v1 = vor.u32 %v2215_v62, %v2016_v63  ;;  %v2422_v7 = vld [vmem:[%s3315_s3] ss:$0 sm:$0xff]  ;;  %v2739_v16 = vld [vmem:[%s3316_s4 + $0x8] sm:$0x3]  ;;  %v2500_v40 = vmov 8  }
  0x27   :  { %525 = vmatpush.bf16.msrb.mxu0 %v2258_v34  ;;  %491 = vmatmul.bf16.vlgmr.msra.gmra.mxu1 %v2003_v43  ;;  %v2742_v23 = vperm.slane %v2739_v16, 0  ;;  %v2496_v34 = vmov 3  }
  0x28   :  { %539 = vmatpush.bf16.msrb.mxu1 %v2266_v35  ;;  %505 = vmatmul.bf16.vlgmr.msra.gmra.mxu2 %v2007_v46 }
  0x29   :  { %519 = vmatmul.bf16.vlgmr.msra.gmra.mxu3 %v2011_v47 }
  0x2b   :  { %526 = vmatpush.bf16.msrb.mxu0 %v2257_v44 }
  0x2c   :  { %540 = vmatpush.bf16.msrb.mxu1 %v2265_v45 }
  0x2f   :  { %527 = vmatpush.bf16.msrb.mxu0 %v2256_v48  ;;  %v555_v48 = vld [vmem:[%s3316_s4] sm:$0xff]  ;;  %s37_s4 = sld [smem:[#allocation3]] }
  0x30   :  { %541 = vmatpush.bf16.msrb.mxu1 %v2264_v49  ;;  %v2780_v49 = vperm.slane %v555_v48, 0 }
  0x33   :  { %528 = vmatpush.bf16.msrb.mxu0 %v2255_v50  ;;  %v2782_v50 = vperm.slane %v555_v48, 1 }
  0x34   :  { %542 = vmatpush.bf16.msrb.mxu1 %v2263_v51  ;;  %v2784_v51 = vperm.slane %v555_v48, 2 }
  0x37   :  { %529 = vmatpush.bf16.msrb.mxu0 %v2254_v52 }
  0x38   :  { %543 = vmatpush.bf16.msrb.mxu1 %v2262_v53 }
  0x3b   :  { %530 = vmatpush.bf16.msrb.mxu0 %v2253_v54 }
  0x3c   :  { %544 = vmatpush.bf16.msrb.mxu1 %v2261_v55  ;;  %v2786_v55 = vperm.slane %v555_v48, 3 }
  0x3f   :  { %531 = vmatpush.bf16.msrb.mxu0 %v2252_v56 }
  0x40   :  { %545 = vmatpush.bf16.msrb.mxu1 %v2260_v57 }
  0x43   :  { %532 = vmatpush.bf16.msrb.mxu0 %v2251_v58 }
  0x44   :  { %546 = vmatpush.bf16.msrb.mxu1 %v2259_v59 }
  0x46   :  { %533 = vmatmul.bf16.vlgmr.msrb.gmra.mxu0 %v2015_v0  ;;  %v2793_v0 = vperm.slane %v555_v48, 4 }
  0x47   :  { %547 = vmatmul.bf16.vlgmr.msrb.gmra.mxu1 %v2019_v1 }
  0xa3   :  { %v478_v5 = vpop.f32.mrf.mxu0 }
  0xa4   :  { %v492_v6 = vpop.f32.mrf.mxu1  ;;  %v479_v8 = vadd.f32 %v2422_v7, %v478_v5 }
  0xa6   :  { %v493_v10 = vadd.f32 %v492_v6, %v479_v8 }
  0xab   :  { %v506_v9 = vpop.f32.mrf.mxu2  ;;  %v480_v11 = vpop.f32.mrf.mxu0 }
  0xac   :  { %v494_v12 = vpop.f32.mrf.mxu1  ;;  %v520_v13 = vpop.f32.mrf.mxu3  ;;  %v507_v14 = vadd.f32 %v506_v9, %v493_v10  ;;  %v481_v15 = vadd.f32 %v2422_v7, %v480_v11 }
  0xae   :  { %v521_v17 = vadd.f32 %v520_v13, %v507_v14  ;;  %v495_v18 = vadd.f32 %v494_v12, %v481_v15 }
  0xb3   :  { %v508_v19 = vpop.f32.mrf.mxu2 }
  0xb4   :  { %v509_v24 = vadd.f32 %v508_v19, %v495_v18  ;;  %v522_v26 = vpop.f32.mrf.mxu3  ;;  %v2800_v18 = vperm.slane %v555_v48, 6  ;;  %v2802_v19 = vperm.slane %v555_v48, 5 }
  0xb6   :  { %v523_v28 = vadd.f32 %v522_v26, %v509_v24 }
  0xc3   :  { %v534_v20 = vpop.f32.mrf.mxu0 }
  0xc4   :  { %v548_v21 = vpop.f32.mrf.mxu1  ;;  %v535_v22 = vadd.f32 %v534_v20, %v521_v17 }
  0xc6   :  { %v2744_v25 = vadd.f32 %v548_v21, %v535_v22  ;;  %v2804_v21 = vperm.slane %v555_v48, 7 }
  0xc8   :  { %v558_v27 = vadd.f32 %v2742_v23, %v2744_v25  ;;  %553 = vst [vmem:[#allocation6] sm:$0xff] %v2744_v25 }
  0xca   :  { %659 = vperm.xlu0 %2288, %v558_v27   ;;  %591 = vperm.xlu2 %2284, %v558_v27  }
  0xcb   :  { %562 = vperm.xlu1 %2282, %v558_v27   ;;  %v536_v29 = vpop.f32.mrf.mxu0 }
  0xcc   :  { %v537_v30 = vadd.f32 %v536_v29, %v523_v28  ;;  %v550_v31 = vpop.f32.mrf.mxu1 }
  0xce   :  { %v2749_v32 = vadd.f32 %v550_v31, %v537_v30 }
  0xd0   :  { %v559_v33 = vadd.f32 %v2742_v23, %v2749_v32  ;;  %554 = vst [vmem:[#allocation6 + $0x8] sm:$0xff] %v2749_v32 }
  0xd2   :  { %2292 = vset.pattern.permute.xlu0 %v2495_v4  ;;  %2285 = vset.pattern.permute.xlu2 %v2496_v34  ;;  %v743_v35 = vrot.slane %v559_v33, 7 }
  0xd3   :  { %2283 = vset.pattern.permute.xlu1 %v2497_v36  ;;  %567 = vperm.xlu0 %2292, %v559_v33  }
  0xd4   :  { %608 = vperm.xlu2 %2285, %v558_v27   ;;  %574 = vperm.xlu1 %2283, %v558_v27   ;;  %v2758_v37 = vsel %vm740_vm0, %v743_v35, %v558_v27  ;;  %v2811_v35 = vperm.slane %v2739_v16, 1 }
  0xdb   :  { %2293 = vset.pattern.permute.xlu0 %v2497_v36 }
  0xdc   :  { %2289 = vset.pattern.permute.xlu2 %v2498_v38  ;;  %2286 = vset.pattern.permute.xlu1 %v2499_v39 }
  0xdd   :  { %578 = vperm.xlu0 %2293, %v559_v33   ;;  %676 = vperm.xlu2 %2289, %v558_v27  }
  0xde   :  { %625 = vperm.xlu1 %2286, %v558_v27  }
  0xe5   :  { %2296 = vset.pattern.permute.xlu0 %v2499_v39  ;;  %2290 = vset.pattern.permute.xlu2 %v2500_v40 }
  0xe6   :  { %2287 = vset.pattern.permute.xlu1 %v2501_v41  ;;  %629 = vperm.xlu0 %2296, %v559_v33  }
  0xe7   :  { %693 = vperm.xlu2 %2290, %v558_v27   ;;  %642 = vperm.xlu1 %2287, %v558_v27  }
  0xee   :  { %2301 = vset.pattern.permute.xlu0 %v2502_v42 }
  0xef   :  { %2294 = vset.pattern.permute.xlu2 %v2494_v3  ;;  %2291 = vset.pattern.permute.xlu1 %v2502_v42 }
  0xf0   :  { %713 = vperm.xlu0 %2301, %v559_v33   ;;  %595 = vperm.xlu2 %2294, %v559_v33  }
  0xf1   :  { %709 = vperm.xlu1 %2291, %v558_v27  }
  0xf8   :  { %2297 = vset.pattern.permute.xlu2 %v2501_v41  ;;  %2303 = vset.pattern.permute.xlu0 %v2497_v36 }
  0xf9   :  { %2295 = vset.pattern.permute.xlu1 %v2496_v34  ;;  %646 = vperm.xlu2 %2297, %v559_v33  }
  0xfa   :  { %612 = vperm.xlu1 %2295, %v559_v33  }
 0x101   :  { %2298 = vset.pattern.permute.xlu2 %v2493_v2 }
 0x102   :  { %2299 = vset.pattern.permute.xlu1 %v2498_v38  ;;  %663 = vperm.xlu2 %2298, %v559_v33  }
 0x103   :  { %680 = vperm.xlu1 %2299, %v559_v33  }
 0x10a   :  { %2302 = vset.pattern.permute.xlu2 %v2495_v4 }
 0x10b   :  { %2300 = vset.pattern.permute.xlu1 %v2500_v40 }
 0x10c   :  { %697 = vperm.xlu1 %2300, %v559_v33  }
 0x114   :  { %2306 = vset.pattern.permute.xlu1 %v2499_v39 }
 0x124   :  { %v592_v43 = vpop.permute.xlu2 %591 }
 0x125   :  { %v599_v58 = vadd.f32 %v2784_v51, %v592_v43 }
 0x12e   :  { %v609_v44 = vpop.permute.xlu2 %608 }
 0x12f   :  { %v616_v61 = vadd.f32 %v2786_v55, %v609_v44 }
 0x137   :  { %v677_v45 = vpop.permute.xlu2 %676 }
 0x138   :  { %v684_v29 = vadd.f32 %v2804_v21, %v677_v45  ;;  %v727_v45 = vrot.slane %v2744_v25, 1 }
 0x13c   :  { %v660_v46 = vpop.permute.xlu0 %659 }
 0x13d   :  { %v563_v47 = vpop.permute.xlu1 %562  ;;  %v667_v26 = vadd.f32 %v2800_v18, %v660_v46 }
 0x13e   :  { %v571_v56 = vadd.f32 %v2780_v49, %v563_v47 }
 0x141   :  { %v694_v52 = vpop.permute.xlu2 %693 }
 0x142   :  { %v700_v33 = vadd.f32 %v694_v52, %v2742_v23 }
 0x145   :  { %v568_v53 = vpop.permute.xlu0 %567 }
 0x146   :  { %v575_v54 = vpop.permute.xlu1 %574  ;;  %v572_v7 = vadd.f32 %v2780_v49, %v568_v53 }
 0x147   :  { %v582_v57 = vadd.f32 %v2782_v50, %v575_v54 }
 0x149   :  { %vm584_vm1 = vcmp.gt.f32.partialorder %v582_v57, %v571_v56  ;;  %v588_v59 = vmax.f32 %v571_v56, %v582_v57 }
 0x14a   :  { %v586_v60 = vsel %vm584_vm1, 1, %v2495_v4  ;;  %v596_v5 = vpop.permute.xlu2 %595 }
 0x14b   :  { %vm601_vm2 = vcmp.gt.f32.partialorder %v599_v58, %v588_v59  ;;  %v605_v62 = vmax.f32 %v588_v59, %v599_v58  ;;  %v600_v12 = vadd.f32 %v2784_v51, %v596_v5 }
 0x14c   :  { %v603_v63 = vsel %vm601_vm2, 2, %v586_v60 }
 0x14d   :  { %vm618_vm3 = vcmp.gt.f32.partialorder %v616_v61, %v605_v62  ;;  %v622_v10 = vmax.f32 %v605_v62, %v616_v61 }
 0x14e   :  { %v620_v1 = vsel %vm618_vm3, 3, %v603_v63 }
 0x14f   :  { %v579_v6 = vpop.permute.xlu0 %578 }
 0x150   :  { %v583_v8 = vadd.f32 %v2782_v50, %v579_v6  ;;  %v626_v9 = vpop.permute.xlu1 %625 }
 0x151   :  { %v633_v11 = vadd.f32 %v2793_v0, %v626_v9 }
 0x152   :  { %vm585_vm4 = vcmp.gt.f32.partialorder %v583_v8, %v572_v7  ;;  %v589_v13 = vmax.f32 %v572_v7, %v583_v8  ;;  %v33_v8 = vlaneseq }
 0x153   :  { %v587_v14 = vsel %vm585_vm4, 1, %v2495_v4  ;;  %vm635_vm5 = vcmp.gt.f32.partialorder %v633_v11, %v622_v10  ;;  %v639_v22 = vmax.f32 %v622_v10, %v633_v11  ;;  %v647_v54 = vpop.permute.xlu2 %646 }
 0x154   :  { %vm602_vm6 = vcmp.gt.f32.partialorder %v600_v12, %v589_v13  ;;  %v637_v15 = vsel %vm635_vm5, 4, %v620_v1  ;;  %v606_v59 = vmax.f32 %v589_v13, %v600_v12  ;;  %v651_v5 = vadd.f32 %v2802_v19, %v647_v54 }
 0x155   :  { %v604_v17 = vsel %vm602_vm6, 2, %v587_v14 }
 0x158   :  { %v630_v16 = vpop.permute.xlu0 %629 }
 0x159   :  { %v643_v20 = vpop.permute.xlu1 %642  ;;  %v634_v61 = vadd.f32 %v2793_v0, %v630_v16 }
 0x15a   :  { %v650_v24 = vadd.f32 %v2802_v19, %v643_v20 }
 0x15c   :  { %vm652_vm7 = vcmp.gt.f32.partialorder %v650_v24, %v639_v22  ;;  %v656_v27 = vmax.f32 %v639_v22, %v650_v24  ;;  %v664_v63 = vpop.permute.xlu2 %663  ;;  %v38_v22 = vstv %s37_s4 }
 0x15d   :  { %v654_v28 = vsel %vm652_vm7, 5, %v637_v15  ;;  %v668_v9 = vadd.f32 %v2800_v18, %v664_v63 }
 0x15e   :  { %vm669_vm8 = vcmp.gt.f32.partialorder %v667_v26, %v656_v27  ;;  %v673_v30 = vmax.f32 %v656_v27, %v667_v26  ;;  %v43_v26 = vstv %s1995_s8 }
 0x15f   :  { %v671_v31 = vsel %vm669_vm8, 6, %v654_v28 }
 0x160   :  { %vm686_vm9 = vcmp.gt.f32.partialorder %v684_v29, %v673_v30  ;;  %v690_v43 = vmax.f32 %v673_v30, %v684_v29 }
 0x161   :  { %v688_v44 = vsel %vm686_vm9, 7, %v671_v31 }
 0x162   :  { %vm702_vm10 = vcmp.gt.f32.partialorder %v700_v33, %v690_v43  ;;  %v706_v47 = vmax.f32 %v690_v43, %v700_v33  ;;  %v714_v27 = vpop.permute.xlu0 %713 }
 0x163   :  { %v704_v48 = vsel %vm702_vm10, 8, %v688_v44  ;;  %v710_v46 = vpop.permute.xlu1 %709  ;;  %v718_v33 = vadd.f32 %v2811_v35, %v714_v27 }
 0x164   :  { %v717_v53 = vadd.f32 %v2811_v35, %v710_v46 }
 0x166   :  { %vm719_vm11 = vcmp.gt.f32.partialorder %v717_v53, %v706_v47  ;;  %v723_v56 = vmax.f32 %v706_v47, %v717_v53  ;;  %v728_v47 = vrot.slane %v2749_v32, 1 }
 0x167   :  { %v2815_v57 = vsel %vm719_vm11, 9, %v704_v48 }
 0x168   :  { %v2817_v52 = vadd.f32 %v727_v45, %v723_v56 }
 0x16a   :  { %812 = vperm.xlu1 %2306, %v2817_v52   ;;  %764 = vperm.xlu0 %2303, %v2817_v52  }
 0x16b   :  { %754 = vperm.xlu2 %2302, %v2817_v52  }
 0x16c   :  { %v613_v58 = vpop.permute.xlu1 %612 }
 0x16d   :  { %v617_v60 = vadd.f32 %v2786_v55, %v613_v58 }
 0x16f   :  { %vm619_vm12 = vcmp.gt.f32.partialorder %v617_v60, %v606_v59  ;;  %v623_v62 = vmax.f32 %v606_v59, %v617_v60 }
 0x170   :  { %v621_v1 = vsel %vm619_vm12, 3, %v604_v17  ;;  %v34_v17 = vshrl.u32 %v33_v8, 7 }
 0x171   :  { %vm636_vm13 = vcmp.gt.f32.partialorder %v634_v61, %v623_v62  ;;  %v640_v6 = vmax.f32 %v623_v62, %v634_v61 }
 0x172   :  { %v638_v7 = vsel %vm636_vm13, 4, %v621_v1  ;;  %2307 = vset.pattern.permute.xlu1 %v2501_v41  ;;  %2308 = vset.pattern.permute.xlu0 %v2493_v2  ;;  %vm35_vm2 = vcmp.eq.s32.totalorder %v34_v17, 0  ;;  %vm40_vm3 = vcmp.eq.s32.totalorder %v34_v17, 1 }
 0x173   :  { %2304 = vset.pattern.permute.xlu2 %v2494_v3  ;;  %828 = vperm.xlu1 %2307, %v2817_v52   ;;  %vm653_vm14 = vcmp.gt.f32.partialorder %v651_v5, %v640_v6  ;;  %v657_v10 = vmax.f32 %v640_v6, %v651_v5  ;;  %v39_v24 = vsel %vm35_vm2, %v38_v22, 0 }
 0x174   :  { %844 = vperm.xlu0 %2308, %v2817_v52   ;;  %780 = vperm.xlu2 %2304, %v2817_v52   ;;  %v655_v11 = vsel %vm653_vm14, 5, %v638_v7  ;;  %v2840_v31 = vsel %vm40_vm3, %v43_v26, %v39_v24 }
 0x175   :  { %vm670_vm15 = vcmp.gt.f32.partialorder %v668_v9, %v657_v10  ;;  %v674_v12 = vmax.f32 %v657_v10, %v668_v9  ;;  %v681_v13 = vpop.permute.xlu1 %680  ;;  %v2845_v46 = vadd.s32 4294967295, %v2840_v31 }
 0x176   :  { %v672_v14 = vsel %vm670_vm15, 6, %v655_v11  ;;  %v685_v15 = vadd.f32 %v2804_v21, %v681_v13 }
 0x177   :  { %vm734_vm6 = vcmp.eq.s32.totalorder %v2845_v46, 1 }
 0x178   :  { %vm687_vm1 = vcmp.gt.f32.partialorder %v685_v15, %v674_v12  ;;  %v691_v29 = vmax.f32 %v674_v12, %v685_v15 }
 0x179   :  { %v689_v20 = vsel %vm687_vm1, 7, %v672_v14 }
 0x17b   :  { %2311 = vset.pattern.permute.xlu1 %v2502_v42 }
 0x17c   :  { %2305 = vset.pattern.permute.xlu2 %v2496_v34  ;;  %892 = vperm.xlu1 %2311, %v2817_v52  }
 0x17d   :  { %796 = vperm.xlu2 %2305, %v2817_v52   ;;  %2316 = vset.pattern.permute.xlu0 %v2499_v39 }
 0x17e   :  { %v698_v28 = vpop.permute.xlu1 %697 }
 0x17f   :  { %v701_v30 = vadd.f32 %v698_v28, %v2742_v23 }
 0x181   :  { %vm703_vm4 = vcmp.gt.f32.partialorder %v701_v30, %v691_v29  ;;  %v707_v43 = vmax.f32 %v691_v29, %v701_v30 }
 0x182   :  { %v705_v44 = vsel %vm703_vm4, 8, %v689_v20 }
 0x183   :  { %vm720_vm5 = vcmp.gt.f32.partialorder %v718_v33, %v707_v43  ;;  %v724_v48 = vmax.f32 %v707_v43, %v718_v33 }
 0x184   :  { %v722_v53 = vsel %vm720_vm5, 9, %v705_v44  ;;  %2313 = vset.pattern.permute.xlu1 %v2497_v36 }
 0x185   :  { %v732_v54 = vadd.f32 %v728_v47, %v724_v48  ;;  %v750_v45 = vrot.slane %v722_v53, 7  ;;  %2309 = vset.pattern.permute.xlu2 %v2498_v38 }
 0x186   :  { %860 = vperm.xlu2 %2309, %v2817_v52  }
 0x187   :  { %816 = vperm.xlu0 %2316, %v732_v54   ;;  %768 = vperm.xlu1 %2313, %v732_v54   ;;  %v739_v56 = vrot.slane %v732_v54, 7  ;;  %v2853_v16 = vsel %vm740_vm0, %v750_v45, %v2815_v57 }
 0x189   :  { %v741_v58 = vsel %vm740_vm0, %v739_v56, %v2817_v52 }
 0x18a   :  { %v2860_v59 = vsel %vm734_vm6, %v741_v58, %v2758_v37  ;;  %v907_v58 = vrot.slane %v2744_v25, 2 }
 0x18e   :  { %2310 = vset.pattern.permute.xlu2 %v2500_v40 }
 0x18f   :  { %876 = vperm.xlu2 %2310, %v2817_v52   ;;  %2321 = vset.pattern.permute.xlu0 %v2502_v42 }
 0x190   :  { %2314 = vset.pattern.permute.xlu1 %v2494_v3  ;;  %896 = vperm.xlu0 %2321, %v732_v54  }
 0x191   :  { %784 = vperm.xlu1 %2314, %v732_v54  }
 0x197   :  { %2312 = vset.pattern.permute.xlu2 %v2495_v4 }
 0x198   :  { %758 = vperm.xlu2 %2312, %v732_v54   ;;  %2323 = vset.pattern.permute.xlu0 %v2497_v36 }
 0x199   :  { %2315 = vset.pattern.permute.xlu1 %v2496_v34 }
 0x19a   :  { %800 = vperm.xlu1 %2315, %v732_v54  }
 0x1a0   :  { %2317 = vset.pattern.permute.xlu2 %v2501_v41 }
 0x1a1   :  { %832 = vperm.xlu2 %2317, %v732_v54  }
 0x1a2   :  { %2319 = vset.pattern.permute.xlu1 %v2498_v38 }
 0x1a3   :  { %864 = vperm.xlu1 %2319, %v732_v54  }
 0x1a9   :  { %2318 = vset.pattern.permute.xlu2 %v2493_v2 }
 0x1aa   :  { %848 = vperm.xlu2 %2318, %v732_v54  }
 0x1ab   :  { %2320 = vset.pattern.permute.xlu1 %v2500_v40 }
 0x1ac   :  { %880 = vperm.xlu1 %2320, %v732_v54  }
 0x1b2   :  { %2322 = vset.pattern.permute.xlu2 %v2495_v4 }
 0x1b4   :  { %2326 = vset.pattern.permute.xlu1 %v2499_v39 }
 0x1c5   :  { %v755_v37 = vpop.permute.xlu2 %754 }
 0x1c6   :  { %v761_v62 = vadd.f32 %v755_v37, %v2780_v49 }
 0x1ce   :  { %v781_v57 = vpop.permute.xlu2 %780 }
 0x1cf   :  { %v787_v1 = vadd.f32 %v781_v57, %v2784_v51 }
 0x1d7   :  { %v797_v52 = vpop.permute.xlu2 %796 }
 0x1d8   :  { %v803_v9 = vadd.f32 %v797_v52, %v2786_v55 }
 0x1dc   :  { %v765_v60 = vpop.permute.xlu0 %764  ;;  %v813_v61 = vpop.permute.xlu1 %812 }
 0x1dd   :  { %v771_v63 = vadd.f32 %v765_v60, %v2782_v50  ;;  %v819_v13 = vadd.f32 %v813_v61, %v2793_v0 }
 0x1df   :  { %vm773_vm7 = vcmp.gt.f32.partialorder %v771_v63, %v761_v62  ;;  %v777_v5 = vmax.f32 %v761_v62, %v771_v63 }
 0x1e0   :  { %v775_v6 = vsel %vm773_vm7, 1, %v2495_v4  ;;  %v861_v7 = vpop.permute.xlu2 %860 }
 0x1e1   :  { %vm789_vm8 = vcmp.gt.f32.partialorder %v787_v1, %v777_v5  ;;  %v793_v10 = vmax.f32 %v777_v5, %v787_v1  ;;  %v867_v30 = vadd.f32 %v861_v7, %v2804_v21 }
 0x1e2   :  { %v791_v11 = vsel %vm789_vm8, 2, %v775_v6 }
 0x1e3   :  { %vm805_vm9 = vcmp.gt.f32.partialorder %v803_v9, %v793_v10  ;;  %v809_v12 = vmax.f32 %v793_v10, %v803_v9 }
 0x1e4   :  { %v807_v14 = vsel %vm805_vm9, 3, %v791_v11 }
 0x1e5   :  { %vm821_vm10 = vcmp.gt.f32.partialorder %v819_v13, %v809_v12  ;;  %v825_v15 = vmax.f32 %v809_v12, %v819_v13  ;;  %v829_v17 = vpop.permute.xlu1 %828 }
 0x1e6   :  { %v823_v20 = vsel %vm821_vm10, 4, %v807_v14  ;;  %v845_v22 = vpop.permute.xlu0 %844  ;;  %v835_v24 = vadd.f32 %v829_v17, %v2802_v19 }
 0x1e7   :  { %v851_v26 = vadd.f32 %v845_v22, %v2800_v18 }
 0x1e8   :  { %vm837_vm11 = vcmp.gt.f32.partialorder %v835_v24, %v825_v15  ;;  %v841_v27 = vmax.f32 %v825_v15, %v835_v24 }
 0x1e9   :  { %v839_v28 = vsel %vm837_vm11, 5, %v823_v20  ;;  %v877_v29 = vpop.permute.xlu2 %876  ;;  %vm913_vm11 = vcmp.eq.s32.totalorder %v2845_v46, 2 }
 0x1ea   :  { %vm853_vm12 = vcmp.gt.f32.partialorder %v851_v26, %v841_v27  ;;  %v857_v33 = vmax.f32 %v841_v27, %v851_v26  ;;  %v883_v47 = vadd.f32 %v877_v29, %v2742_v23 }
 0x1eb   :  { %v855_v43 = vsel %vm853_vm12, 6, %v839_v28 }
 0x1ec   :  { %vm869_vm13 = vcmp.gt.f32.partialorder %v867_v30, %v857_v33  ;;  %v873_v44 = vmax.f32 %v857_v33, %v867_v30 }
 0x1ed   :  { %v871_v48 = vsel %vm869_vm13, 7, %v855_v43 }
 0x1ee   :  { %vm885_vm14 = vcmp.gt.f32.partialorder %v883_v47, %v873_v44  ;;  %v889_v53 = vmax.f32 %v873_v44, %v883_v47  ;;  %v893_v54 = vpop.permute.xlu1 %892 }
 0x1ef   :  { %v887_v45 = vsel %vm885_vm14, 8, %v871_v48  ;;  %v899_v56 = vadd.f32 %v893_v54, %v2811_v35 }
 0x1f1   :  { %vm901_vm15 = vcmp.gt.f32.partialorder %v899_v56, %v889_v53  ;;  %v905_v37 = vmax.f32 %v889_v53, %v899_v56 }
 0x1f2   :  { %v2887_v57 = vsel %vm901_vm15, 9, %v887_v45  ;;  %v759_v60 = vpop.permute.xlu2 %758 }
 0x1f3   :  { %v2889_v52 = vadd.f32 %v907_v58, %v905_v37  ;;  %v762_v62 = vadd.f32 %v759_v60, %v2780_v49 }
 0x1f5   :  { %987 = vperm.xlu1 %2326, %v2889_v52   ;;  %939 = vperm.xlu0 %2323, %v2889_v52  }
 0x1f6   :  { %929 = vperm.xlu2 %2322, %v2889_v52  }
 0x1f9   :  { %v769_v61 = vpop.permute.xlu1 %768  ;;  %v817_v11 = vpop.permute.xlu0 %816 }
 0x1fa   :  { %v772_v63 = vadd.f32 %v769_v61, %v2782_v50  ;;  %v820_v15 = vadd.f32 %v817_v11, %v2793_v0  ;;  %v908_v61 = vrot.slane %v2749_v32, 2 }
 0x1fb   :  { %v833_v7 = vpop.permute.xlu2 %832 }
 0x1fc   :  { %vm774_vm1 = vcmp.gt.f32.partialorder %v772_v63, %v762_v62  ;;  %v778_v5 = vmax.f32 %v762_v62, %v772_v63  ;;  %v836_v24 = vadd.f32 %v833_v7, %v2802_v19 }
 0x1fd   :  { %2327 = vset.pattern.permute.xlu1 %v2501_v41  ;;  %2328 = vset.pattern.permute.xlu0 %v2493_v2  ;;  %v776_v9 = vsel %vm774_vm1, 1, %v2495_v4 }
 0x1fe   :  { %2324 = vset.pattern.permute.xlu2 %v2494_v3  ;;  %1003 = vperm.xlu1 %2327, %v2889_v52  }
 0x1ff   :  { %1019 = vperm.xlu0 %2328, %v2889_v52   ;;  %955 = vperm.xlu2 %2324, %v2889_v52  }
 0x202   :  { %v897_v53 = vpop.permute.xlu0 %896 }
 0x203   :  { %v785_v1 = vpop.permute.xlu1 %784  ;;  %v900_v58 = vadd.f32 %v897_v53, %v2811_v35 }
 0x204   :  { %v788_v6 = vadd.f32 %v785_v1, %v2784_v51  ;;  %v849_v20 = vpop.permute.xlu2 %848 }
 0x205   :  { %v852_v28 = vadd.f32 %v849_v20, %v2800_v18 }
 0x206   :  { %vm790_vm2 = vcmp.gt.f32.partialorder %v788_v6, %v778_v5  ;;  %2331 = vset.pattern.permute.xlu1 %v2502_v42  ;;  %v794_v13 = vmax.f32 %v778_v5, %v788_v6 }
 0x207   :  { %v792_v10 = vsel %vm790_vm2, 2, %v776_v9  ;;  %2325 = vset.pattern.permute.xlu2 %v2496_v34  ;;  %1067 = vperm.xlu1 %2331, %v2889_v52  }
 0x208   :  { %971 = vperm.xlu2 %2325, %v2889_v52   ;;  %2336 = vset.pattern.permute.xlu0 %v2499_v39 }
 0x20c   :  { %v801_v12 = vpop.permute.xlu1 %800 }
 0x20d   :  { %v804_v14 = vadd.f32 %v801_v12, %v2786_v55 }
 0x20f   :  { %vm806_vm3 = vcmp.gt.f32.partialorder %v804_v14, %v794_v13  ;;  %v810_v17 = vmax.f32 %v794_v13, %v804_v14  ;;  %2333 = vset.pattern.permute.xlu1 %v2497_v36 }
 0x210   :  { %v808_v22 = vsel %vm806_vm3, 3, %v792_v10  ;;  %2329 = vset.pattern.permute.xlu2 %v2498_v38 }
 0x211   :  { %vm822_vm4 = vcmp.gt.f32.partialorder %v820_v15, %v810_v17  ;;  %v826_v26 = vmax.f32 %v810_v17, %v820_v15  ;;  %1035 = vperm.xlu2 %2329, %v2889_v52  }
 0x212   :  { %v824_v27 = vsel %vm822_vm4, 4, %v808_v22 }
 0x213   :  { %vm838_vm5 = vcmp.gt.f32.partialorder %v836_v24, %v826_v26  ;;  %v842_v29 = vmax.f32 %v826_v26, %v836_v24 }
 0x214   :  { %v840_v30 = vsel %vm838_vm5, 5, %v824_v27 }
 0x215   :  { %vm854_vm7 = vcmp.gt.f32.partialorder %v852_v28, %v842_v29  ;;  %v858_v33 = vmax.f32 %v842_v29, %v852_v28  ;;  %v865_v43 = vpop.permute.xlu1 %864 }
 0x216   :  { %v856_v44 = vsel %vm854_vm7, 6, %v840_v30  ;;  %v868_v47 = vadd.f32 %v865_v43, %v2804_v21 }
 0x218   :  { %vm870_vm8 = vcmp.gt.f32.partialorder %v868_v47, %v858_v33  ;;  %v874_v45 = vmax.f32 %v858_v33, %v868_v47 }
 0x219   :  { %v872_v48 = vsel %vm870_vm8, 7, %v856_v44  ;;  %2330 = vset.pattern.permute.xlu2 %v2500_v40 }
 0x21a   :  { %1051 = vperm.xlu2 %2330, %v2889_v52  }
 0x21e   :  { %v881_v54 = vpop.permute.xlu1 %880 }
 0x21f   :  { %v884_v56 = vadd.f32 %v881_v54, %v2742_v23 }
 0x221   :  { %vm886_vm9 = vcmp.gt.f32.partialorder %v884_v56, %v874_v45  ;;  %v890_v37 = vmax.f32 %v874_v45, %v884_v56 }
 0x222   :  { %v888_v60 = vsel %vm886_vm9, 8, %v872_v48  ;;  %2332 = vset.pattern.permute.xlu2 %v2495_v4 }
 0x223   :  { %vm902_vm10 = vcmp.gt.f32.partialorder %v900_v58, %v890_v37  ;;  %v906_v62 = vmax.f32 %v890_v37, %v900_v58 }
 0x224   :  { %v904_v63 = vsel %vm902_vm10, 9, %v888_v60 }
 0x225   :  { %v912_v1 = vadd.f32 %v908_v61, %v906_v62  ;;  %v925_v5 = vrot.slane %v904_v63, 7 }
 0x227   :  { %991 = vperm.xlu0 %2336, %v912_v1   ;;  %943 = vperm.xlu1 %2333, %v912_v1   ;;  %v918_v6 = vrot.slane %v912_v1, 7  ;;  %v2926_v7 = vsel %vm740_vm0, %v925_v5, %v2887_v57 }
 0x228   :  { %933 = vperm.xlu2 %2332, %v912_v1  }
 0x229   :  { %v919_v9 = vsel %vm740_vm0, %v918_v6, %v2889_v52 }
 0x22a   :  { %v2933_v10 = vsel %vm913_vm11, %v919_v9, %v2860_v59 }
 0x22f   :  { %2341 = vset.pattern.permute.xlu0 %v2502_v42  ;;  %2334 = vset.pattern.permute.xlu1 %v2494_v3 }
 0x230   :  { %2337 = vset.pattern.permute.xlu2 %v2501_v41  ;;  %1071 = vperm.xlu0 %2341, %v912_v1  }
 0x231   :  { %959 = vperm.xlu1 %2334, %v912_v1   ;;  %1007 = vperm.xlu2 %2337, %v912_v1  }
 0x238   :  { %2343 = vset.pattern.permute.xlu0 %v2497_v36 }
 0x239   :  { %2335 = vset.pattern.permute.xlu1 %v2496_v34  ;;  %2338 = vset.pattern.permute.xlu2 %v2493_v2 }
 0x23a   :  { %975 = vperm.xlu1 %2335, %v912_v1   ;;  %1023 = vperm.xlu2 %2338, %v912_v1  }
 0x242   :  { %2339 = vset.pattern.permute.xlu1 %v2498_v38  ;;  %2342 = vset.pattern.permute.xlu2 %v2495_v4 }
 0x243   :  { %1039 = vperm.xlu1 %2339, %v912_v1  }
 0x24b   :  { %2340 = vset.pattern.permute.xlu1 %v2500_v40 }
 0x24c   :  { %1055 = vperm.xlu1 %2340, %v912_v1  }
 0x250   :  { %v930_v59 = vpop.permute.xlu2 %929 }
 0x251   :  { %v936_v13 = vadd.f32 %v930_v59, %v2780_v49  ;;  %v1082_v59 = vrot.slane %v2744_v25, 3 }
 0x254   :  { %2346 = vset.pattern.permute.xlu1 %v2499_v39 }
 0x259   :  { %v956_v57 = vpop.permute.xlu2 %955 }
 0x25a   :  { %v962_v15 = vadd.f32 %v956_v57, %v2784_v51 }
 0x262   :  { %v972_v52 = vpop.permute.xlu2 %971 }
 0x263   :  { %v978_v24 = vadd.f32 %v972_v52, %v2786_v55 }
 0x267   :  { %v940_v11 = vpop.permute.xlu0 %939  ;;  %v988_v12 = vpop.permute.xlu1 %987 }
 0x268   :  { %v946_v14 = vadd.f32 %v940_v11, %v2782_v50  ;;  %v994_v29 = vadd.f32 %v988_v12, %v2793_v0 }
 0x26a   :  { %vm948_vm12 = vcmp.gt.f32.partialorder %v946_v14, %v936_v13  ;;  %v952_v17 = vmax.f32 %v936_v13, %v946_v14 }
 0x26b   :  { %v950_v20 = vsel %vm948_vm12, 1, %v2495_v4  ;;  %v1036_v22 = vpop.permute.xlu2 %1035 }
 0x26c   :  { %vm964_vm13 = vcmp.gt.f32.partialorder %v962_v15, %v952_v17  ;;  %v968_v26 = vmax.f32 %v952_v17, %v962_v15  ;;  %v1042_v58 = vadd.f32 %v1036_v22, %v2804_v21 }
 0x26d   :  { %v966_v27 = vsel %vm964_vm13, 2, %v950_v20 }
 0x26e   :  { %vm980_vm14 = vcmp.gt.f32.partialorder %v978_v24, %v968_v26  ;;  %v984_v28 = vmax.f32 %v968_v26, %v978_v24 }
 0x26f   :  { %v982_v30 = vsel %vm980_vm14, 3, %v966_v27 }
 0x270   :  { %vm996_vm15 = vcmp.gt.f32.partialorder %v994_v29, %v984_v28  ;;  %v1000_v33 = vmax.f32 %v984_v28, %v994_v29  ;;  %v1004_v43 = vpop.permute.xlu1 %1003 }
 0x271   :  { %v998_v44 = vsel %vm996_vm15, 4, %v982_v30  ;;  %v1020_v47 = vpop.permute.xlu0 %1019  ;;  %v1010_v48 = vadd.f32 %v1004_v43, %v2802_v19 }
 0x272   :  { %v1026_v53 = vadd.f32 %v1020_v47, %v2800_v18 }
 0x273   :  { %vm1012_vm1 = vcmp.gt.f32.partialorder %v1010_v48, %v1000_v33  ;;  %v1016_v54 = vmax.f32 %v1000_v33, %v1010_v48 }
 0x274   :  { %v1014_v45 = vsel %vm1012_vm1, 5, %v998_v44  ;;  %v1052_v56 = vpop.permute.xlu2 %1051 }
 0x275   :  { %vm1028_vm2 = vcmp.gt.f32.partialorder %v1026_v53, %v1016_v54  ;;  %v1032_v37 = vmax.f32 %v1016_v54, %v1026_v53  ;;  %v1058_v62 = vadd.f32 %v1052_v56, %v2742_v23 }
 0x276   :  { %v1030_v60 = vsel %vm1028_vm2, 6, %v1014_v45  ;;  %vm1088_vm2 = vcmp.eq.s32.totalorder %v2845_v46, 3 }
 0x277   :  { %vm1044_vm3 = vcmp.gt.f32.partialorder %v1042_v58, %v1032_v37  ;;  %v1048_v61 = vmax.f32 %v1032_v37, %v1042_v58 }
 0x278   :  { %v1046_v63 = vsel %vm1044_vm3, 7, %v1030_v60 }
 0x279   :  { %vm1060_vm4 = vcmp.gt.f32.partialorder %v1058_v62, %v1048_v61  ;;  %v1064_v1 = vmax.f32 %v1048_v61, %v1058_v62  ;;  %v1068_v5 = vpop.permute.xlu1 %1067 }
 0x27a   :  { %v1062_v6 = vsel %vm1060_vm4, 8, %v1046_v63  ;;  %v1074_v9 = vadd.f32 %v1068_v5, %v2811_v35 }
 0x27c   :  { %vm1076_vm5 = vcmp.gt.f32.partialorder %v1074_v9, %v1064_v1  ;;  %v1080_v57 = vmax.f32 %v1064_v1, %v1074_v9 }
 0x27d   :  { %v2957_v52 = vsel %vm1076_vm5, 9, %v1062_v6 }
 0x27e   :  { %v2959_v11 = vadd.f32 %v1082_v59, %v1080_v57 }
 0x280   :  { %1162 = vperm.xlu1 %2346, %v2959_v11   ;;  %1114 = vperm.xlu0 %2343, %v2959_v11  }
 0x281   :  { %1104 = vperm.xlu2 %2342, %v2959_v11  }
 0x282   :  { %v934_v25 = vpop.permute.xlu2 %933 }
 0x283   :  { %v937_v13 = vadd.f32 %v934_v25, %v2780_v49 }
 0x288   :  { %2347 = vset.pattern.permute.xlu1 %v2501_v41  ;;  %2348 = vset.pattern.permute.xlu0 %v2493_v2 }
 0x289   :  { %2344 = vset.pattern.permute.xlu2 %v2494_v3  ;;  %1178 = vperm.xlu1 %2347, %v2959_v11  }
 0x28a   :  { %1194 = vperm.xlu0 %2348, %v2959_v11   ;;  %1130 = vperm.xlu2 %2344, %v2959_v11  }
 0x28b   :  { %v1008_v22 = vpop.permute.xlu2 %1007 }
 0x28c   :  { %v1011_v48 = vadd.f32 %v1008_v22, %v2802_v19 }
 0x291   :  { %2351 = vset.pattern.permute.xlu1 %v2502_v42 }
 0x292   :  { %2345 = vset.pattern.permute.xlu2 %v2496_v34  ;;  %1242 = vperm.xlu1 %2351, %v2959_v11  }
 0x293   :  { %1146 = vperm.xlu2 %2345, %v2959_v11   ;;  %2356 = vset.pattern.permute.xlu0 %v2499_v39 }
 0x294   :  { %v1024_v44 = vpop.permute.xlu2 %1023 }
 0x295   :  { %v1027_v45 = vadd.f32 %v1024_v44, %v2800_v18 }
 0x299   :  { %v944_v12 = vpop.permute.xlu1 %943  ;;  %v992_v27 = vpop.permute.xlu0 %991 }
 0x29a   :  { %v947_v14 = vadd.f32 %v944_v12, %v2782_v50  ;;  %2353 = vset.pattern.permute.xlu1 %v2497_v36  ;;  %v995_v33 = vadd.f32 %v992_v27, %v2793_v0  ;;  %v1083_v12 = vrot.slane %v2749_v32, 3 }
 0x29b   :  { %2349 = vset.pattern.permute.xlu2 %v2498_v38 }
 0x29c   :  { %vm949_vm7 = vcmp.gt.f32.partialorder %v947_v14, %v937_v13  ;;  %1210 = vperm.xlu2 %2349, %v2959_v11   ;;  %v953_v17 = vmax.f32 %v937_v13, %v947_v14 }
 0x29d   :  { %v951_v24 = vsel %vm949_vm7, 1, %v2495_v4 }
 0x2a2   :  { %v1072_v1 = vpop.permute.xlu0 %1071 }
 0x2a3   :  { %v960_v15 = vpop.permute.xlu1 %959  ;;  %v1075_v59 = vadd.f32 %v1072_v1, %v2811_v35 }
 0x2a4   :  { %v963_v20 = vadd.f32 %v960_v15, %v2784_v51  ;;  %2350 = vset.pattern.permute.xlu2 %v2500_v40 }
 0x2a5   :  { %1226 = vperm.xlu2 %2350, %v2959_v11  }
 0x2a6   :  { %vm965_vm8 = vcmp.gt.f32.partialorder %v963_v20, %v953_v17  ;;  %v969_v29 = vmax.f32 %v953_v17, %v963_v20 }
 0x2a7   :  { %v967_v26 = vsel %vm965_vm8, 2, %v951_v24 }
 0x2ac   :  { %v976_v28 = vpop.permute.xlu1 %975 }
 0x2ad   :  { %v979_v30 = vadd.f32 %v976_v28, %v2786_v55  ;;  %2352 = vset.pattern.permute.xlu2 %v2495_v4 }
 0x2af   :  { %vm981_vm9 = vcmp.gt.f32.partialorder %v979_v30, %v969_v29  ;;  %v985_v43 = vmax.f32 %v969_v29, %v979_v30 }
 0x2b0   :  { %v983_v47 = vsel %vm981_vm9, 3, %v967_v26 }
 0x2b1   :  { %vm997_vm10 = vcmp.gt.f32.partialorder %v995_v33, %v985_v43  ;;  %v1001_v53 = vmax.f32 %v985_v43, %v995_v33 }
 0x2b2   :  { %v999_v54 = vsel %vm997_vm10, 4, %v983_v47 }
 0x2b3   :  { %vm1013_vm12 = vcmp.gt.f32.partialorder %v1011_v48, %v1001_v53  ;;  %v1017_v56 = vmax.f32 %v1001_v53, %v1011_v48 }
 0x2b4   :  { %v1015_v58 = vsel %vm1013_vm12, 5, %v999_v54 }
 0x2b5   :  { %vm1029_vm13 = vcmp.gt.f32.partialorder %v1027_v45, %v1017_v56  ;;  %v1033_v37 = vmax.f32 %v1017_v56, %v1027_v45  ;;  %v1040_v60 = vpop.permute.xlu1 %1039 }
 0x2b6   :  { %v1031_v61 = vsel %vm1029_vm13, 6, %v1015_v58  ;;  %v1043_v62 = vadd.f32 %v1040_v60, %v2804_v21 }
 0x2b8   :  { %vm1045_vm14 = vcmp.gt.f32.partialorder %v1043_v62, %v1033_v37  ;;  %v1049_v6 = vmax.f32 %v1033_v37, %v1043_v62 }
 0x2b9   :  { %v1047_v63 = vsel %vm1045_vm14, 7, %v1031_v61 }
 0x2be   :  { %v1056_v5 = vpop.permute.xlu1 %1055 }
 0x2bf   :  { %v1059_v9 = vadd.f32 %v1056_v5, %v2742_v23 }
 0x2c1   :  { %vm1061_vm15 = vcmp.gt.f32.partialorder %v1059_v9, %v1049_v6  ;;  %v1065_v57 = vmax.f32 %v1049_v6, %v1059_v9 }
 0x2c2   :  { %v1063_v25 = vsel %vm1061_vm15, 8, %v1047_v63 }
 0x2c3   :  { %vm1077_vm1 = vcmp.gt.f32.partialorder %v1075_v59, %v1065_v57  ;;  %v1081_v13 = vmax.f32 %v1065_v57, %v1075_v59 }
 0x2c4   :  { %v1079_v14 = vsel %vm1077_vm1, 9, %v1063_v25 }
 0x2c5   :  { %v1087_v15 = vadd.f32 %v1083_v12, %v1081_v13  ;;  %v1100_v17 = vrot.slane %v1079_v14, 7 }
 0x2c7   :  { %1166 = vperm.xlu0 %2356, %v1087_v15   ;;  %1118 = vperm.xlu1 %2353, %v1087_v15   ;;  %v1093_v20 = vrot.slane %v1087_v15, 7  ;;  %v2996_v22 = vsel %vm740_vm0, %v1100_v17, %v2957_v52 }
 0x2c8   :  { %1108 = vperm.xlu2 %2352, %v1087_v15  }
 0x2c9   :  { %v1094_v24 = vsel %vm740_vm0, %v1093_v20, %v2959_v11 }
 0x2ca   :  { %v3003_v32 = vsel %vm1088_vm2, %v1094_v24, %v2933_v10  ;;  %v3026_v24 = vld [vmem:[#allocation6] sm:$0xff] }
 0x2cf   :  { %2361 = vset.pattern.permute.xlu0 %v2502_v42  ;;  %2354 = vset.pattern.permute.xlu1 %v2494_v3 }
 0x2d0   :  { %2357 = vset.pattern.permute.xlu2 %v2501_v41  ;;  %1246 = vperm.xlu0 %2361, %v1087_v15  }
 0x2d1   :  { %1134 = vperm.xlu1 %2354, %v1087_v15   ;;  %1182 = vperm.xlu2 %2357, %v1087_v15  }
 0x2d8   :  { %2363 = vset.pattern.permute.xlu0 %v2497_v36 }
 0x2d9   :  { %2355 = vset.pattern.permute.xlu1 %v2496_v34  ;;  %2358 = vset.pattern.permute.xlu2 %v2493_v2 }
 0x2da   :  { %1150 = vperm.xlu1 %2355, %v1087_v15   ;;  %1198 = vperm.xlu2 %2358, %v1087_v15  }
 0x2db   :  { %v1105_v52 = vpop.permute.xlu2 %1104 }
 0x2dc   :  { %v1111_v28 = vadd.f32 %v1105_v52, %v2780_v49  ;;  %v1257_v52 = vrot.slane %v3026_v24, 4 }
 0x2e2   :  { %2359 = vset.pattern.permute.xlu1 %v2498_v38  ;;  %2362 = vset.pattern.permute.xlu2 %v2495_v4 }
 0x2e3   :  { %1214 = vperm.xlu1 %2359, %v1087_v15  }
 0x2e4   :  { %v1131_v10 = vpop.permute.xlu2 %1130 }
 0x2e5   :  { %v1137_v30 = vadd.f32 %v1131_v10, %v2784_v51 }
 0x2eb   :  { %2360 = vset.pattern.permute.xlu1 %v2500_v40 }
 0x2ec   :  { %1230 = vperm.xlu1 %2360, %v1087_v15  }
 0x2ed   :  { %v1147_v11 = vpop.permute.xlu2 %1146 }
 0x2ee   :  { %v1153_v47 = vadd.f32 %v1147_v11, %v2786_v55 }
 0x2f2   :  { %v1115_v26 = vpop.permute.xlu0 %1114  ;;  %v1163_v27 = vpop.permute.xlu1 %1162 }
 0x2f3   :  { %v1121_v29 = vadd.f32 %v1115_v26, %v2782_v50  ;;  %v1169_v45 = vadd.f32 %v1163_v27, %v2793_v0 }
 0x2f4   :  { %2366 = vset.pattern.permute.xlu1 %v2499_v39 }
 0x2f5   :  { %vm1123_vm3 = vcmp.gt.f32.partialorder %v1121_v29, %v1111_v28  ;;  %v1127_v33 = vmax.f32 %v1111_v28, %v1121_v29 }
 0x2f6   :  { %v1125_v43 = vsel %vm1123_vm3, 1, %v2495_v4  ;;  %v1211_v44 = vpop.permute.xlu2 %1210 }
 0x2f7   :  { %vm1139_vm4 = vcmp.gt.f32.partialorder %v1137_v30, %v1127_v33  ;;  %v1143_v48 = vmax.f32 %v1127_v33, %v1137_v30  ;;  %v1217_v9 = vadd.f32 %v1211_v44, %v2804_v21 }
 0x2f8   :  { %v1141_v53 = vsel %vm1139_vm4, 2, %v1125_v43 }
 0x2f9   :  { %vm1155_vm5 = vcmp.gt.f32.partialorder %v1153_v47, %v1143_v48  ;;  %v1159_v54 = vmax.f32 %v1143_v48, %v1153_v47 }
 0x2fa   :  { %v1157_v56 = vsel %vm1155_vm5, 3, %v1141_v53 }
 0x2fb   :  { %vm1171_vm7 = vcmp.gt.f32.partialorder %v1169_v45, %v1159_v54  ;;  %v1175_v58 = vmax.f32 %v1159_v54, %v1169_v45  ;;  %v1179_v37 = vpop.permute.xlu1 %1178 }
 0x2fc   :  { %v1173_v60 = vsel %vm1171_vm7, 4, %v1157_v56  ;;  %v1195_v61 = vpop.permute.xlu0 %1194  ;;  %v1185_v62 = vadd.f32 %v1179_v37, %v2802_v19 }
 0x2fd   :  { %v1201_v63 = vadd.f32 %v1195_v61, %v2800_v18 }
 0x2fe   :  { %vm1187_vm8 = vcmp.gt.f32.partialorder %v1185_v62, %v1175_v58  ;;  %v1191_v1 = vmax.f32 %v1175_v58, %v1185_v62 }
 0x2ff   :  { %v1189_v5 = vsel %vm1187_vm8, 5, %v1173_v60  ;;  %v1227_v6 = vpop.permute.xlu2 %1226 }
 0x300   :  { %vm1203_vm9 = vcmp.gt.f32.partialorder %v1201_v63, %v1191_v1  ;;  %v1207_v59 = vmax.f32 %v1191_v1, %v1201_v63  ;;  %v1233_v12 = vadd.f32 %v1227_v6, %v2742_v23 }
 0x301   :  { %v1205_v57 = vsel %vm1203_vm9, 6, %v1189_v5 }
 0x302   :  { %vm1219_vm10 = vcmp.gt.f32.partialorder %v1217_v9, %v1207_v59  ;;  %v1223_v25 = vmax.f32 %v1207_v59, %v1217_v9 }
 0x303   :  { %v1221_v13 = vsel %vm1219_vm10, 7, %v1205_v57  ;;  %vm1263_vm10 = vcmp.eq.s32.totalorder %v2845_v46, 4 }
 0x304   :  { %vm1235_vm12 = vcmp.gt.f32.partialorder %v1233_v12, %v1223_v25  ;;  %v1239_v14 = vmax.f32 %v1223_v25, %v1233_v12  ;;  %v1243_v15 = vpop.permute.xlu1 %1242 }
 0x305   :  { %v1237_v17 = vsel %vm1235_vm12, 8, %v1221_v13  ;;  %v1249_v20 = vadd.f32 %v1243_v15, %v2811_v35 }
 0x307   :  { %vm1251_vm13 = vcmp.gt.f32.partialorder %v1249_v20, %v1239_v14  ;;  %v1255_v10 = vmax.f32 %v1239_v14, %v1249_v20 }
 0x308   :  { %v3029_v11 = vsel %vm1251_vm13, 9, %v1237_v17 }
 0x309   :  { %v3031_v26 = vadd.f32 %v1257_v52, %v1255_v10 }
 0x30b   :  { %1337 = vperm.xlu1 %2366, %v3031_v26   ;;  %1289 = vperm.xlu0 %2363, %v3031_v26  }
 0x30c   :  { %1279 = vperm.xlu2 %2362, %v3031_v26  }
 0x313   :  { %2367 = vset.pattern.permute.xlu1 %v2501_v41  ;;  %2368 = vset.pattern.permute.xlu0 %v2493_v2 }
 0x314   :  { %2364 = vset.pattern.permute.xlu2 %v2494_v3  ;;  %1353 = vperm.xlu1 %2367, %v3031_v26  }
 0x315   :  { %1369 = vperm.xlu0 %2368, %v3031_v26   ;;  %1305 = vperm.xlu2 %2364, %v3031_v26  }
 0x31c   :  { %2371 = vset.pattern.permute.xlu1 %v2502_v42 }
 0x31d   :  { %2365 = vset.pattern.permute.xlu2 %v2496_v34  ;;  %1417 = vperm.xlu1 %2371, %v3031_v26  }
 0x31e   :  { %1321 = vperm.xlu2 %2365, %v3031_v26   ;;  %2376 = vset.pattern.permute.xlu0 %v2499_v39 }
 0x322   :  { %v1109_v27 = vpop.permute.xlu2 %1108 }
 0x323   :  { %v1112_v29 = vadd.f32 %v1109_v27, %v2780_v49 }
 0x325   :  { %2373 = vset.pattern.permute.xlu1 %v2497_v36 }
 0x326   :  { %2369 = vset.pattern.permute.xlu2 %v2498_v38 }
 0x327   :  { %1385 = vperm.xlu2 %2369, %v3031_v26  }
 0x32b   :  { %v1183_v47 = vpop.permute.xlu2 %1182 }
 0x32c   :  { %v1186_v63 = vadd.f32 %v1183_v47, %v2802_v19 }
 0x32f   :  { %2370 = vset.pattern.permute.xlu2 %v2500_v40 }
 0x330   :  { %1401 = vperm.xlu2 %2370, %v3031_v26  }
 0x334   :  { %v1199_v61 = vpop.permute.xlu2 %1198 }
 0x335   :  { %v1202_v6 = vadd.f32 %v1199_v61, %v2800_v18 }
 0x338   :  { %2372 = vset.pattern.permute.xlu2 %v2495_v4 }
 0x339   :  { %v1119_v28 = vpop.permute.xlu1 %1118  ;;  %v1167_v54 = vpop.permute.xlu0 %1166 }
 0x33a   :  { %v1122_v30 = vadd.f32 %v1119_v28, %v2782_v50  ;;  %v1170_v37 = vadd.f32 %v1167_v54, %v2793_v0 }
 0x33c   :  { %vm1124_vm14 = vcmp.gt.f32.partialorder %v1122_v30, %v1112_v29  ;;  %v1128_v43 = vmax.f32 %v1112_v29, %v1122_v30  ;;  %v3064_v29 = vld [vmem:[#allocation6 + $0x8] sm:$0xff] }
 0x33d   :  { %v1126_v48 = vsel %vm1124_vm14, 1, %v2495_v4  ;;  %v1258_v30 = vrot.slane %v3064_v29, 4 }
 0x342   :  { %v1247_v15 = vpop.permute.xlu0 %1246 }
 0x343   :  { %v1135_v33 = vpop.permute.xlu1 %1134  ;;  %v1250_v10 = vadd.f32 %v1247_v15, %v2811_v35 }
 0x344   :  { %v1138_v44 = vadd.f32 %v1135_v33, %v2784_v51 }
 0x346   :  { %vm1140_vm15 = vcmp.gt.f32.partialorder %v1138_v44, %v1128_v43  ;;  %v1144_v56 = vmax.f32 %v1128_v43, %v1138_v44 }
 0x347   :  { %v1142_v53 = vsel %vm1140_vm15, 2, %v1126_v48 }
 0x34c   :  { %v1151_v45 = vpop.permute.xlu1 %1150 }
 0x34d   :  { %v1154_v58 = vadd.f32 %v1151_v45, %v2786_v55 }
 0x34f   :  { %vm1156_vm1 = vcmp.gt.f32.partialorder %v1154_v58, %v1144_v56  ;;  %v1160_v60 = vmax.f32 %v1144_v56, %v1154_v58 }
 0x350   :  { %v1158_v62 = vsel %vm1156_vm1, 3, %v1142_v53 }
 0x351   :  { %vm1172_vm3 = vcmp.gt.f32.partialorder %v1170_v37, %v1160_v60  ;;  %v1176_v1 = vmax.f32 %v1160_v60, %v1170_v37 }
 0x352   :  { %v1174_v5 = vsel %vm1172_vm3, 4, %v1158_v62 }
 0x353   :  { %vm1188_vm4 = vcmp.gt.f32.partialorder %v1186_v63, %v1176_v1  ;;  %v1192_v9 = vmax.f32 %v1176_v1, %v1186_v63 }
 0x354   :  { %v1190_v59 = vsel %vm1188_vm4, 5, %v1174_v5 }
 0x355   :  { %vm1204_vm5 = vcmp.gt.f32.partialorder %v1202_v6, %v1192_v9  ;;  %v1208_v57 = vmax.f32 %v1192_v9, %v1202_v6  ;;  %v1215_v25 = vpop.permute.xlu1 %1214 }
 0x356   :  { %v1206_v12 = vsel %vm1204_vm5, 6, %v1190_v59  ;;  %v1218_v13 = vadd.f32 %v1215_v25, %v2804_v21 }
 0x358   :  { %vm1220_vm7 = vcmp.gt.f32.partialorder %v1218_v13, %v1208_v57  ;;  %v1224_v20 = vmax.f32 %v1208_v57, %v1218_v13 }
 0x359   :  { %v1222_v14 = vsel %vm1220_vm7, 7, %v1206_v12 }
 0x35e   :  { %v1231_v17 = vpop.permute.xlu1 %1230 }
 0x35f   :  { %v1234_v52 = vadd.f32 %v1231_v17, %v2742_v23 }
 0x361   :  { %vm1236_vm8 = vcmp.gt.f32.partialorder %v1234_v52, %v1224_v20  ;;  %v1240_v27 = vmax.f32 %v1224_v20, %v1234_v52 }
 0x362   :  { %v1238_v28 = vsel %vm1236_vm8, 8, %v1222_v14 }
 0x363   :  { %vm1252_vm9 = vcmp.gt.f32.partialorder %v1250_v10, %v1240_v27  ;;  %v1256_v33 = vmax.f32 %v1240_v27, %v1250_v10 }
 0x364   :  { %v1254_v43 = vsel %vm1252_vm9, 9, %v1238_v28 }
 0x365   :  { %v1262_v44 = vadd.f32 %v1258_v30, %v1256_v33  ;;  %v1275_v47 = vrot.slane %v1254_v43, 7 }
 0x366   :  { %v1280_v48 = vpop.permute.xlu2 %1279 }
 0x367   :  { %1341 = vperm.xlu0 %2376, %v1262_v44   ;;  %1293 = vperm.xlu1 %2373, %v1262_v44   ;;  %v1268_v53 = vrot.slane %v1262_v44, 7  ;;  %v3070_v54 = vsel %vm740_vm0, %v1275_v47, %v3029_v11  ;;  %v1286_v37 = vadd.f32 %v1280_v48, %v2780_v49 }
 0x368   :  { %1283 = vperm.xlu2 %2372, %v1262_v44  }
 0x369   :  { %v1269_v45 = vsel %vm740_vm0, %v1268_v53, %v3031_v26 }
 0x36a   :  { %v3077_v56 = vsel %vm1263_vm10, %v1269_v45, %v3003_v32 }
 0x36f   :  { %2381 = vset.pattern.permute.xlu0 %v2502_v42  ;;  %2374 = vset.pattern.permute.xlu1 %v2494_v3  ;;  %v1306_v58 = vpop.permute.xlu2 %1305 }
 0x370   :  { %2377 = vset.pattern.permute.xlu2 %v2501_v41  ;;  %1421 = vperm.xlu0 %2381, %v1262_v44   ;;  %v1312_v61 = vadd.f32 %v1306_v58, %v2784_v51 }
 0x371   :  { %1309 = vperm.xlu1 %2374, %v1262_v44   ;;  %1357 = vperm.xlu2 %2377, %v1262_v44  }
 0x378   :  { %v1322_v11 = vpop.permute.xlu2 %1321  ;;  %2383 = vset.pattern.permute.xlu0 %v2497_v36 }
 0x379   :  { %2375 = vset.pattern.permute.xlu1 %v2496_v34  ;;  %2378 = vset.pattern.permute.xlu2 %v2493_v2  ;;  %v1328_v5 = vadd.f32 %v1322_v11, %v2786_v55 }
 0x37a   :  { %1325 = vperm.xlu1 %2375, %v1262_v44   ;;  %1373 = vperm.xlu2 %2378, %v1262_v44  }
 0x37d   :  { %v1290_v32 = vpop.permute.xlu0 %1289  ;;  %v1338_v26 = vpop.permute.xlu1 %1337 }
 0x37e   :  { %v1296_v60 = vadd.f32 %v1290_v32, %v2782_v50  ;;  %v1344_v57 = vadd.f32 %v1338_v26, %v2793_v0  ;;  %v1432_v32 = vrot.slane %v3026_v24, 5 }
 0x380   :  { %vm1298_vm12 = vcmp.gt.f32.partialorder %v1296_v60, %v1286_v37  ;;  %v1302_v62 = vmax.f32 %v1286_v37, %v1296_v60 }
 0x381   :  { %v1300_v63 = vsel %vm1298_vm12, 1, %v2495_v4  ;;  %v1386_v1 = vpop.permute.xlu2 %1385 }
 0x382   :  { %vm1314_vm13 = vcmp.gt.f32.partialorder %v1312_v61, %v1302_v62  ;;  %v1318_v6 = vmax.f32 %v1302_v62, %v1312_v61  ;;  %2379 = vset.pattern.permute.xlu1 %v2498_v38  ;;  %2382 = vset.pattern.permute.xlu2 %v2495_v4  ;;  %v1392_v28 = vadd.f32 %v1386_v1, %v2804_v21 }
 0x383   :  { %v1316_v9 = vsel %vm1314_vm13, 2, %v1300_v63  ;;  %1389 = vperm.xlu1 %2379, %v1262_v44  }
 0x384   :  { %vm1330_vm14 = vcmp.gt.f32.partialorder %v1328_v5, %v1318_v6  ;;  %v1334_v59 = vmax.f32 %v1318_v6, %v1328_v5 }
 0x385   :  { %v1332_v25 = vsel %vm1330_vm14, 3, %v1316_v9 }
 0x386   :  { %vm1346_vm15 = vcmp.gt.f32.partialorder %v1344_v57, %v1334_v59  ;;  %v1350_v12 = vmax.f32 %v1334_v59, %v1344_v57  ;;  %v1354_v13 = vpop.permute.xlu1 %1353 }
 0x387   :  { %v1348_v14 = vsel %vm1346_vm15, 4, %v1332_v25  ;;  %v1370_v15 = vpop.permute.xlu0 %1369  ;;  %v1360_v17 = vadd.f32 %v1354_v13, %v2802_v19 }
 0x388   :  { %v1376_v20 = vadd.f32 %v1370_v15, %v2800_v18 }
 0x389   :  { %vm1362_vm1 = vcmp.gt.f32.partialorder %v1360_v17, %v1350_v12  ;;  %v1366_v52 = vmax.f32 %v1350_v12, %v1360_v17 }
 0x38a   :  { %v1364_v10 = vsel %vm1362_vm1, 5, %v1348_v14  ;;  %v1402_v27 = vpop.permute.xlu2 %1401 }
 0x38b   :  { %vm1378_vm3 = vcmp.gt.f32.partialorder %v1376_v20, %v1366_v52  ;;  %v1382_v30 = vmax.f32 %v1366_v52, %v1376_v20  ;;  %2380 = vset.pattern.permute.xlu1 %v2500_v40  ;;  %v1408_v47 = vadd.f32 %v1402_v27, %v2742_v23 }
 0x38c   :  { %v1380_v33 = vsel %vm1378_vm3, 6, %v1364_v10  ;;  %1405 = vperm.xlu1 %2380, %v1262_v44  }
 0x38d   :  { %vm1394_vm4 = vcmp.gt.f32.partialorder %v1392_v28, %v1382_v30  ;;  %v1398_v43 = vmax.f32 %v1382_v30, %v1392_v28 }
 0x38e   :  { %v1396_v48 = vsel %vm1394_vm4, 7, %v1380_v33 }
 0x38f   :  { %vm1410_vm5 = vcmp.gt.f32.partialorder %v1408_v47, %v1398_v43  ;;  %v1414_v53 = vmax.f32 %v1398_v43, %v1408_v47  ;;  %v1418_v45 = vpop.permute.xlu1 %1417 }
 0x390   :  { %v1412_v58 = vsel %vm1410_vm5, 8, %v1396_v48  ;;  %v1424_v11 = vadd.f32 %v1418_v45, %v2811_v35  ;;  %vm1438_vm5 = vcmp.eq.s32.totalorder %v2845_v46, 5 }
 0x392   :  { %vm1426_vm7 = vcmp.gt.f32.partialorder %v1424_v11, %v1414_v53  ;;  %v1430_v26 = vmax.f32 %v1414_v53, %v1424_v11 }
 0x393   :  { %v3100_v37 = vsel %vm1426_vm7, 9, %v1412_v58 }
 0x394   :  { %v3102_v60 = vadd.f32 %v1432_v32, %v1430_v26  ;;  %2386 = vset.pattern.permute.xlu1 %v2499_v39 }
 0x396   :  { %1512 = vperm.xlu1 %2386, %v3102_v60   ;;  %1464 = vperm.xlu0 %2383, %v3102_v60  }
 0x397   :  { %1454 = vperm.xlu2 %2382, %v3102_v60  }
 0x39e   :  { %2387 = vset.pattern.permute.xlu1 %v2501_v41  ;;  %2388 = vset.pattern.permute.xlu0 %v2493_v2 }
 0x39f   :  { %2384 = vset.pattern.permute.xlu2 %v2494_v3  ;;  %1528 = vperm.xlu1 %2387, %v3102_v60  }
 0x3a0   :  { %1544 = vperm.xlu0 %2388, %v3102_v60   ;;  %1480 = vperm.xlu2 %2384, %v3102_v60  }
 0x3a7   :  { %2391 = vset.pattern.permute.xlu1 %v2497_v36 }
 0x3a8   :  { %2385 = vset.pattern.permute.xlu2 %v2496_v34  ;;  %2394 = vset.pattern.permute.xlu0 %v2499_v39 }
 0x3a9   :  { %1496 = vperm.xlu2 %2385, %v3102_v60  }
 0x3b1   :  { %2389 = vset.pattern.permute.xlu2 %v2498_v38 }
 0x3b2   :  { %1560 = vperm.xlu2 %2389, %v3102_v60  }
 0x3ba   :  { %2390 = vset.pattern.permute.xlu2 %v2495_v4 }
 0x3c2   :  { %v1284_v44 = vpop.permute.xlu2 %1283 }
 0x3c3   :  { %v1287_v62 = vadd.f32 %v1284_v44, %v2780_v49 }
 0x3cb   :  { %v1358_v1 = vpop.permute.xlu2 %1357 }
 0x3cc   :  { %v1361_v10 = vadd.f32 %v1358_v1, %v2802_v19 }
 0x3d4   :  { %v1374_v13 = vpop.permute.xlu2 %1373 }
 0x3d5   :  { %v1377_v30 = vadd.f32 %v1374_v13, %v2800_v18 }
 0x3d9   :  { %v1294_v61 = vpop.permute.xlu1 %1293  ;;  %v1342_v25 = vpop.permute.xlu0 %1341 }
 0x3da   :  { %v1297_v63 = vadd.f32 %v1294_v61, %v2782_v50  ;;  %v1345_v17 = vadd.f32 %v1342_v25, %v2793_v0 }
 0x3dc   :  { %vm1299_vm8 = vcmp.gt.f32.partialorder %v1297_v63, %v1287_v62  ;;  %v1303_v6 = vmax.f32 %v1287_v62, %v1297_v63 }
 0x3dd   :  { %v1301_v59 = vsel %vm1299_vm8, 1, %v2495_v4 }
 0x3e2   :  { %v1422_v32 = vpop.permute.xlu0 %1421 }
 0x3e3   :  { %v1310_v5 = vpop.permute.xlu1 %1309  ;;  %v1425_v63 = vadd.f32 %v1422_v32, %v2811_v35 }
 0x3e4   :  { %v1313_v9 = vadd.f32 %v1310_v5, %v2784_v51 }
 0x3e6   :  { %vm1315_vm9 = vcmp.gt.f32.partialorder %v1313_v9, %v1303_v6  ;;  %v1319_v14 = vmax.f32 %v1303_v6, %v1313_v9  ;;  %v1433_v6 = vrot.slane %v3064_v29, 5 }
 0x3e7   :  { %v1317_v57 = vsel %vm1315_vm9, 2, %v1301_v59 }
 0x3ec   :  { %v1326_v12 = vpop.permute.xlu1 %1325 }
 0x3ed   :  { %v1329_v15 = vadd.f32 %v1326_v12, %v2786_v55 }
 0x3ef   :  { %vm1331_vm12 = vcmp.gt.f32.partialorder %v1329_v15, %v1319_v14  ;;  %v1335_v20 = vmax.f32 %v1319_v14, %v1329_v15 }
 0x3f0   :  { %v1333_v52 = vsel %vm1331_vm12, 3, %v1317_v57 }
 0x3f1   :  { %vm1347_vm13 = vcmp.gt.f32.partialorder %v1345_v17, %v1335_v20  ;;  %v1351_v27 = vmax.f32 %v1335_v20, %v1345_v17  ;;  %v1455_v47 = vpop.permute.xlu2 %1454 }
 0x3f2   :  { %v1349_v28 = vsel %vm1347_vm13, 4, %v1333_v52  ;;  %v1461_v17 = vadd.f32 %v1455_v47, %v2780_v49 }
 0x3f3   :  { %vm1363_vm14 = vcmp.gt.f32.partialorder %v1361_v10, %v1351_v27  ;;  %v1367_v33 = vmax.f32 %v1351_v27, %v1361_v10 }
 0x3f4   :  { %v1365_v43 = vsel %vm1363_vm14, 5, %v1349_v28 }
 0x3f5   :  { %vm1379_vm15 = vcmp.gt.f32.partialorder %v1377_v30, %v1367_v33  ;;  %v1383_v48 = vmax.f32 %v1367_v33, %v1377_v30  ;;  %v1390_v53 = vpop.permute.xlu1 %1389 }
 0x3f6   :  { %v1381_v45 = vsel %vm1379_vm15, 6, %v1365_v43  ;;  %v1393_v58 = vadd.f32 %v1390_v53, %v2804_v21 }
 0x3f8   :  { %vm1395_vm1 = vcmp.gt.f32.partialorder %v1393_v58, %v1383_v48  ;;  %v1399_v44 = vmax.f32 %v1383_v48, %v1393_v58 }
 0x3f9   :  { %v1397_v11 = vsel %vm1395_vm1, 7, %v1381_v45 }
 0x3fa   :  { %v1481_v61 = vpop.permute.xlu2 %1480 }
 0x3fb   :  { %v1487_v28 = vadd.f32 %v1481_v61, %v2784_v51 }
 0x3fe   :  { %v1406_v26 = vpop.permute.xlu1 %1405 }
 0x3ff   :  { %v1409_v62 = vadd.f32 %v1406_v26, %v2742_v23 }
 0x401   :  { %vm1411_vm3 = vcmp.gt.f32.partialorder %v1409_v62, %v1399_v44  ;;  %v1415_v1 = vmax.f32 %v1399_v44, %v1409_v62 }
 0x402   :  { %v1413_v5 = vsel %vm1411_vm3, 8, %v1397_v11 }
 0x403   :  { %vm1427_vm4 = vcmp.gt.f32.partialorder %v1425_v63, %v1415_v1  ;;  %v1431_v9 = vmax.f32 %v1415_v1, %v1425_v63  ;;  %v1497_v20 = vpop.permute.xlu2 %1496 }
 0x404   :  { %v1429_v59 = vsel %vm1427_vm4, 9, %v1413_v5  ;;  %v1503_v33 = vadd.f32 %v1497_v20, %v2786_v55 }
 0x405   :  { %v1437_v57 = vadd.f32 %v1433_v6, %v1431_v9  ;;  %v1450_v25 = vrot.slane %v1429_v59, 7 }
 0x407   :  { %1516 = vperm.xlu0 %2394, %v1437_v57   ;;  %1468 = vperm.xlu1 %2391, %v1437_v57   ;;  %v1443_v12 = vrot.slane %v1437_v57, 7  ;;  %v3136_v13 = vsel %vm740_vm0, %v1450_v25, %v3100_v37 }
 0x408   :  { %1458 = vperm.xlu2 %2390, %v1437_v57   ;;  %v1465_v14 = vpop.permute.xlu0 %1464  ;;  %v1513_v15 = vpop.permute.xlu1 %1512 }
 0x409   :  { %v1471_v52 = vadd.f32 %v1465_v14, %v2782_v50  ;;  %v1444_v10 = vsel %vm740_vm0, %v1443_v12, %v3102_v60  ;;  %v1519_v53 = vadd.f32 %v1513_v15, %v2793_v0 }
 0x40a   :  { %v3145_v27 = vsel %vm1438_vm5, %v1444_v10, %v3077_v56 }
 0x40b   :  { %vm1473_vm7 = vcmp.gt.f32.partialorder %v1471_v52, %v1461_v17  ;;  %v1477_v37 = vmax.f32 %v1461_v17, %v1471_v52 }
 0x40c   :  { %v1475_v30 = vsel %vm1473_vm7, 1, %v2495_v4  ;;  %v1561_v44 = vpop.permute.xlu2 %1560 }
 0x40d   :  { %vm1489_vm8 = vcmp.gt.f32.partialorder %v1487_v28, %v1477_v37  ;;  %v1493_v43 = vmax.f32 %v1477_v37, %v1487_v28  ;;  %v1567_v1 = vadd.f32 %v1561_v44, %v2804_v21 }
 0x40e   :  { %v1491_v47 = vsel %vm1489_vm8, 2, %v1475_v30 }
 0x40f   :  { %vm1505_vm9 = vcmp.gt.f32.partialorder %v1503_v33, %v1493_v43  ;;  %v1509_v48 = vmax.f32 %v1493_v43, %v1503_v33  ;;  %2401 = vset.pattern.permute.xlu0 %v2502_v42  ;;  %2392 = vset.pattern.permute.xlu1 %v2494_v3 }
 0x410   :  { %v1507_v56 = vsel %vm1505_vm9, 3, %v1491_v47  ;;  %2395 = vset.pattern.permute.xlu2 %v2501_v41  ;;  %1596 = vperm.xlu0 %2401, %v1437_v57  }
 0x411   :  { %vm1521_vm12 = vcmp.gt.f32.partialorder %v1519_v53, %v1509_v48  ;;  %v1525_v45 = vmax.f32 %v1509_v48, %v1519_v53  ;;  %1484 = vperm.xlu1 %2392, %v1437_v57   ;;  %1532 = vperm.xlu2 %2395, %v1437_v57   ;;  %v1529_v58 = vpop.permute.xlu1 %1528 }
 0x412   :  { %v1523_v11 = vsel %vm1521_vm12, 4, %v1507_v56  ;;  %v1545_v32 = vpop.permute.xlu0 %1544  ;;  %v1535_v26 = vadd.f32 %v1529_v58, %v2802_v19 }
 0x413   :  { %v1551_v61 = vadd.f32 %v1545_v32, %v2800_v18 }
 0x414   :  { %vm1537_vm13 = vcmp.gt.f32.partialorder %v1535_v26, %v1525_v45  ;;  %v1541_v62 = vmax.f32 %v1525_v45, %v1535_v26 }
 0x415   :  { %v1539_v63 = vsel %vm1537_vm13, 5, %v1523_v11 }
 0x416   :  { %vm1553_vm14 = vcmp.gt.f32.partialorder %v1551_v61, %v1541_v62  ;;  %v1557_v5 = vmax.f32 %v1541_v62, %v1551_v61 }
 0x417   :  { %v1555_v6 = vsel %vm1553_vm14, 6, %v1539_v63 }
 0x418   :  { %vm1569_vm15 = vcmp.gt.f32.partialorder %v1567_v1, %v1557_v5  ;;  %2403 = vset.pattern.permute.xlu0 %v2497_v36  ;;  %v1573_v52 = vmax.f32 %v1557_v5, %v1567_v1 }
 0x419   :  { %2393 = vset.pattern.permute.xlu1 %v2496_v34  ;;  %2396 = vset.pattern.permute.xlu2 %v2493_v2  ;;  %v1571_v9 = vsel %vm1569_vm15, 7, %v1555_v6 }
 0x41a   :  { %1500 = vperm.xlu1 %2393, %v1437_v57   ;;  %1548 = vperm.xlu2 %2396, %v1437_v57  }
 0x422   :  { %2398 = vset.pattern.permute.xlu1 %v2498_v38  ;;  %2397 = vset.pattern.permute.xlu2 %v2500_v40 }
 0x423   :  { %1564 = vperm.xlu1 %2398, %v1437_v57   ;;  %1576 = vperm.xlu2 %2397, %v3102_v60  }
 0x42b   :  { %2399 = vset.pattern.permute.xlu1 %v2500_v40  ;;  %2402 = vset.pattern.permute.xlu2 %v2495_v4 }
 0x42c   :  { %1580 = vperm.xlu1 %2399, %v1437_v57  }
 0x434   :  { %2400 = vset.pattern.permute.xlu1 %v2502_v42 }
 0x435   :  { %1592 = vperm.xlu1 %2400, %v3102_v60  }
 0x43d   :  { %2406 = vset.pattern.permute.xlu1 %v2499_v39 }
 0x462   :  { %v1459_v59 = vpop.permute.xlu2 %1458 }
 0x463   :  { %v1462_v15 = vadd.f32 %v1459_v59, %v2780_v49 }
 0x46b   :  { %v1533_v25 = vpop.permute.xlu2 %1532 }
 0x46c   :  { %v1536_v11 = vadd.f32 %v1533_v25, %v2802_v19 }
 0x474   :  { %v1549_v12 = vpop.permute.xlu2 %1548 }
 0x475   :  { %v1552_v44 = vadd.f32 %v1549_v12, %v2800_v18 }
 0x479   :  { %v1469_v14 = vpop.permute.xlu1 %1468  ;;  %v1517_v43 = vpop.permute.xlu0 %1516 }
 0x47a   :  { %v1472_v17 = vadd.f32 %v1469_v14, %v2782_v50  ;;  %v1520_v56 = vadd.f32 %v1517_v43, %v2793_v0 }
 0x47c   :  { %vm1474_vm1 = vcmp.gt.f32.partialorder %v1472_v17, %v1462_v15  ;;  %v1478_v37 = vmax.f32 %v1462_v15, %v1472_v17 }
 0x47d   :  { %v1577_v20 = vpop.permute.xlu2 %1576  ;;  %v1476_v30 = vsel %vm1474_vm1, 1, %v2495_v4 }
 0x47e   :  { %v1583_v10 = vadd.f32 %v1577_v20, %v2742_v23 }
 0x480   :  { %vm1585_vm3 = vcmp.gt.f32.partialorder %v1583_v10, %v1573_v52 }
 0x481   :  { %v1587_v57 = vsel %vm1585_vm3, 8, %v1571_v9  ;;  %vm1613_vm3 = vcmp.eq.s32.totalorder %v2845_v46, 6 }
 0x482   :  { %v1597_v59 = vpop.permute.xlu0 %1596 }
 0x483   :  { %v1485_v28 = vpop.permute.xlu1 %1484  ;;  %v1600_v17 = vadd.f32 %v1597_v59, %v2811_v35 }
 0x484   :  { %v1488_v60 = vadd.f32 %v1485_v28, %v2784_v51 }
 0x486   :  { %vm1490_vm4 = vcmp.gt.f32.partialorder %v1488_v60, %v1478_v37  ;;  %v1494_v48 = vmax.f32 %v1478_v37, %v1488_v60  ;;  %v1608_v60 = vrot.slane %v3064_v29, 6 }
 0x487   :  { %v1492_v33 = vsel %vm1490_vm4, 2, %v1476_v30 }
 0x48c   :  { %v1501_v47 = vpop.permute.xlu1 %1500 }
 0x48d   :  { %v1504_v53 = vadd.f32 %v1501_v47, %v2786_v55 }
 0x48f   :  { %vm1506_vm7 = vcmp.gt.f32.partialorder %v1504_v53, %v1494_v48  ;;  %v1510_v45 = vmax.f32 %v1494_v48, %v1504_v53  ;;  %v1607_v53 = vrot.slane %v3026_v24, 6 }
 0x490   :  { %v1508_v58 = vsel %vm1506_vm7, 3, %v1492_v33  ;;  %v1589_v33 = vmax.f32 %v1573_v52, %v1583_v10 }
 0x491   :  { %vm1522_vm8 = vcmp.gt.f32.partialorder %v1520_v56, %v1510_v45  ;;  %v1526_v32 = vmax.f32 %v1510_v45, %v1520_v56 }
 0x492   :  { %v1524_v26 = vsel %vm1522_vm8, 4, %v1508_v58 }
 0x493   :  { %vm1538_vm9 = vcmp.gt.f32.partialorder %v1536_v11, %v1526_v32  ;;  %v1542_v61 = vmax.f32 %v1526_v32, %v1536_v11 }
 0x494   :  { %v1540_v62 = vsel %vm1538_vm9, 5, %v1524_v26 }
 0x495   :  { %vm1554_vm12 = vcmp.gt.f32.partialorder %v1552_v44, %v1542_v61  ;;  %v1558_v63 = vmax.f32 %v1542_v61, %v1552_v44  ;;  %v1565_v1 = vpop.permute.xlu1 %1564 }
 0x496   :  { %v1556_v5 = vsel %vm1554_vm12, 6, %v1540_v62  ;;  %v1568_v6 = vadd.f32 %v1565_v1, %v2804_v21 }
 0x498   :  { %vm1570_vm13 = vcmp.gt.f32.partialorder %v1568_v6, %v1558_v63  ;;  %v1574_v15 = vmax.f32 %v1558_v63, %v1568_v6 }
 0x499   :  { %v1572_v9 = vsel %vm1570_vm13, 7, %v1556_v5 }
 0x49e   :  { %v1581_v14 = vpop.permute.xlu1 %1580 }
 0x49f   :  { %v1584_v25 = vadd.f32 %v1581_v14, %v2742_v23 }
 0x4a1   :  { %vm1586_vm14 = vcmp.gt.f32.partialorder %v1584_v25, %v1574_v15  ;;  %v1590_v12 = vmax.f32 %v1574_v15, %v1584_v25 }
 0x4a2   :  { %v1588_v20 = vsel %vm1586_vm14, 8, %v1572_v9 }
 0x4a3   :  { %vm1602_vm15 = vcmp.gt.f32.partialorder %v1600_v17, %v1590_v12  ;;  %v1606_v37 = vmax.f32 %v1590_v12, %v1600_v17 }
 0x4a4   :  { %v1604_v28 = vsel %vm1602_vm15, 9, %v1588_v20 }
 0x4a5   :  { %v1612_v43 = vadd.f32 %v1608_v60, %v1606_v37  ;;  %v1625_v48 = vrot.slane %v1604_v28, 7 }
 0x4a7   :  { %v1593_v30 = vpop.permute.xlu1 %1592  ;;  %v1618_v32 = vrot.slane %v1612_v43, 7 }
 0x4a8   :  { %v1599_v47 = vadd.f32 %v1593_v30, %v2811_v35 }
 0x4aa   :  { %vm1601_vm1 = vcmp.gt.f32.partialorder %v1599_v47, %v1589_v33  ;;  %v1605_v56 = vmax.f32 %v1589_v33, %v1599_v47 }
 0x4ab   :  { %v1603_v45 = vsel %vm1601_vm1, 9, %v1587_v57 }
 0x4ac   :  { %v1611_v58 = vadd.f32 %v1607_v53, %v1605_v56  ;;  %v3184_v11 = vsel %vm740_vm0, %v1625_v48, %v1603_v45 }
 0x4ae   :  { %1687 = vperm.xlu1 %2406, %v1611_v58   ;;  %1639 = vperm.xlu0 %2403, %v1611_v58   ;;  %v1619_v52 = vsel %vm740_vm0, %v1618_v32, %v1611_v58 }
 0x4af   :  { %1629 = vperm.xlu2 %2402, %v1611_v58   ;;  %v3191_v10 = vsel %vm1613_vm3, %v1619_v52, %v3145_v27 }
 0x4b6   :  { %2407 = vset.pattern.permute.xlu1 %v2501_v41  ;;  %2408 = vset.pattern.permute.xlu0 %v2493_v2 }
 0x4b7   :  { %2404 = vset.pattern.permute.xlu2 %v2494_v3  ;;  %1703 = vperm.xlu1 %2407, %v1611_v58  }
 0x4b8   :  { %1719 = vperm.xlu0 %2408, %v1611_v58   ;;  %1655 = vperm.xlu2 %2404, %v1611_v58  }
 0x4bf   :  { %2411 = vset.pattern.permute.xlu1 %v2497_v36 }
 0x4c0   :  { %2414 = vset.pattern.permute.xlu0 %v2499_v39  ;;  %2405 = vset.pattern.permute.xlu2 %v2496_v34 }
 0x4c1   :  { %1643 = vperm.xlu1 %2411, %v1612_v43   ;;  %1691 = vperm.xlu0 %2414, %v1612_v43  }
 0x4c2   :  { %1671 = vperm.xlu2 %2405, %v1611_v58  }
 0x4c9   :  { %2412 = vset.pattern.permute.xlu1 %v2494_v3  ;;  %2420 = vset.pattern.permute.xlu0 %v2502_v42 }
 0x4ca   :  { %2409 = vset.pattern.permute.xlu2 %v2498_v38  ;;  %1659 = vperm.xlu1 %2412, %v1612_v43  }
 0x4cb   :  { %1771 = vperm.xlu0 %2420, %v1612_v43   ;;  %1735 = vperm.xlu2 %2409, %v1611_v58  }
 0x4d2   :  { %2413 = vset.pattern.permute.xlu1 %v2496_v34 }
 0x4d3   :  { %2410 = vset.pattern.permute.xlu2 %v2495_v4  ;;  %1675 = vperm.xlu1 %2413, %v1612_v43  }
 0x4d4   :  { %1633 = vperm.xlu2 %2410, %v1612_v43  }
 0x4db   :  { %2418 = vset.pattern.permute.xlu1 %v2498_v38 }
 0x4dc   :  { %2415 = vset.pattern.permute.xlu2 %v2501_v41  ;;  %1739 = vperm.xlu1 %2418, %v1612_v43  }
 0x4dd   :  { %1707 = vperm.xlu2 %2415, %v1612_v43  }
 0x4e4   :  { %2419 = vset.pattern.permute.xlu1 %v2500_v40 }
 0x4e5   :  { %2416 = vset.pattern.permute.xlu2 %v2493_v2  ;;  %1755 = vperm.xlu1 %2419, %v1612_v43  }
 0x4e6   :  { %1723 = vperm.xlu2 %2416, %v1612_v43  }
 0x4ed   :  { %2421 = vset.pattern.permute.xlu1 %v2502_v42 }
 0x4ee   :  { %2417 = vset.pattern.permute.xlu2 %v2500_v40  ;;  %1767 = vperm.xlu1 %2421, %v1611_v58  }
 0x4ef   :  { %1751 = vperm.xlu2 %2417, %v1611_v58  }
 0x509   :  { %v1630_v3 = vpop.permute.xlu2 %1629 }
 0x50a   :  { %v1636_v41 = vadd.f32 %v1630_v3, %v2780_v49 }
 0x512   :  { %v1656_v34 = vpop.permute.xlu2 %1655 }
 0x513   :  { %v1662_v57 = vadd.f32 %v1656_v34, %v2784_v51 }
 0x51c   :  { %v1672_v36 = vpop.permute.xlu2 %1671 }
 0x51d   :  { %v1678_v42 = vadd.f32 %v1672_v36, %v2786_v55 }
 0x520   :  { %v1688_v38 = vpop.permute.xlu1 %1687  ;;  %v1640_v39 = vpop.permute.xlu0 %1639 }
 0x521   :  { %v1646_v27 = vadd.f32 %v1640_v39, %v2782_v50  ;;  %v1694_v62 = vadd.f32 %v1688_v38, %v2793_v0 }
 0x523   :  { %vm1648_vm4 = vcmp.gt.f32.partialorder %v1646_v27, %v1636_v41  ;;  %v1652_v2 = vmax.f32 %v1636_v41, %v1646_v27 }
 0x524   :  { %v1650_v26 = vsel %vm1648_vm4, 1, %v2495_v4 }
 0x525   :  { %vm1664_vm7 = vcmp.gt.f32.partialorder %v1662_v57, %v1652_v2  ;;  %v1668_v40 = vmax.f32 %v1652_v2, %v1662_v57  ;;  %v1736_v44 = vpop.permute.xlu2 %1735 }
 0x526   :  { %v1666_v61 = vsel %vm1664_vm7, 2, %v1650_v26  ;;  %v1742_v12 = vadd.f32 %v1736_v44, %v2804_v21 }
 0x527   :  { %vm1680_vm8 = vcmp.gt.f32.partialorder %v1678_v42, %v1668_v40  ;;  %v1684_v63 = vmax.f32 %v1668_v40, %v1678_v42 }
 0x528   :  { %v1682_v1 = vsel %vm1680_vm8, 3, %v1666_v61 }
 0x529   :  { %v1704_v5 = vpop.permute.xlu1 %1703  ;;  %vm1696_vm9 = vcmp.gt.f32.partialorder %v1694_v62, %v1684_v63  ;;  %v1700_v6 = vmax.f32 %v1684_v63, %v1694_v62 }
 0x52a   :  { %v1698_v9 = vsel %vm1696_vm9, 4, %v1682_v1  ;;  %v1710_v59 = vadd.f32 %v1704_v5, %v2802_v19  ;;  %v1720_v14 = vpop.permute.xlu0 %1719 }
 0x52b   :  { %v1726_v25 = vadd.f32 %v1720_v14, %v2800_v18 }
 0x52c   :  { %vm1712_vm12 = vcmp.gt.f32.partialorder %v1710_v59, %v1700_v6  ;;  %v1716_v15 = vmax.f32 %v1700_v6, %v1710_v59 }
 0x52d   :  { %v1714_v17 = vsel %vm1712_vm12, 5, %v1698_v9 }
 0x52e   :  { %vm1728_vm13 = vcmp.gt.f32.partialorder %v1726_v25, %v1716_v15  ;;  %v1732_v20 = vmax.f32 %v1716_v15, %v1726_v25  ;;  %v1634_v28 = vpop.permute.xlu2 %1633  ;;  %v1783_v15 = vrot.slane %v3064_v29, 7  ;;  %v2423_v29 = vld [vmem:[%s3317_s5] ss:$0 sm:$0xff]  ;;  %s2503_s5 = smov [#allocation6]  }
 0x52f   :  { %v1730_v37 = vsel %vm1728_vm13, 6, %v1714_v17  ;;  %v1637_v33 = vadd.f32 %v1634_v28, %v2780_v49  ;;  %v1782_v28 = vrot.slane %v3026_v24, 7  ;;  %s1976_s0 = sshll.u32 %s2503_s5, 4  ;;  %s1977_s0 = int_to_ptr.vmem [resolvable:$true] %s1976_s0 }
 0x530   :  { %vm1744_vm14 = vcmp.gt.f32.partialorder %v1742_v12, %v1732_v20  ;;  %v1748_v39 = vmax.f32 %v1732_v20, %v1742_v12  ;;  %1984 = dma.vmem_to_hbm [thread:$0]  %s1977_s0, 256, %s1979_s13, [#allocation7], %s2504_s14, %s2504_s14, %s2505_s15  }
 0x531   :  { %v1746_v60 = vsel %vm1744_vm14, 7, %v1730_v37 }
 0x533   :  { %v1644_v30 = vpop.permute.xlu1 %1643  ;;  %v1692_v52 = vpop.permute.xlu0 %1691 }
 0x534   :  { %v1647_v43 = vadd.f32 %v1644_v30, %v2782_v50  ;;  %v1695_v49 = vadd.f32 %v1692_v52, %v2793_v0 }
 0x536   :  { %vm1649_vm15 = vcmp.gt.f32.partialorder %v1647_v43, %v1637_v33  ;;  %v1653_v53 = vmax.f32 %v1637_v33, %v1647_v43 }
 0x537   :  { %v1708_v47 = vpop.permute.xlu2 %1707  ;;  %v1651_v45 = vsel %vm1649_vm15, 1, %v2495_v4 }
 0x538   :  { %v1711_v27 = vadd.f32 %v1708_v47, %v2802_v19 }
 0x53c   :  { %v1660_v48 = vpop.permute.xlu1 %1659 }
 0x53d   :  { %v1663_v56 = vadd.f32 %v1660_v48, %v2784_v51  ;;  %v1772_v62 = vpop.permute.xlu0 %1771  ;;  %v3243_v48 = vand.u32 127, %v33_v8 }
 0x53f   :  { %vm1665_vm1 = vcmp.gt.f32.partialorder %v1663_v56, %v1653_v53  ;;  %v1669_v34 = vmax.f32 %v1653_v53, %v1663_v56 }
 0x540   :  { %v1667_v58 = vsel %vm1665_vm1, 2, %v1651_v45  ;;  %v1724_v32 = vpop.permute.xlu2 %1723 }
 0x541   :  { %v1727_v2 = vadd.f32 %v1724_v32, %v2800_v18  ;;  %v1775_v18 = vadd.f32 %v1772_v62, %v2811_v35 }
 0x545   :  { %v1676_v3 = vpop.permute.xlu1 %1675 }
 0x546   :  { %v1679_v36 = vadd.f32 %v1676_v3, %v2786_v55 }
 0x548   :  { %vm1681_vm4 = vcmp.gt.f32.partialorder %v1679_v36, %v1669_v34  ;;  %v1685_v50 = vmax.f32 %v1669_v34, %v1679_v36 }
 0x549   :  { %v1683_v38 = vsel %vm1681_vm4, 3, %v1667_v58  ;;  %v1752_v41 = vpop.permute.xlu2 %1751  ;;  %vm1788_vm4 = vcmp.eq.s32.totalorder %v2845_v46, 7 }
 0x54a   :  { %vm1697_vm7 = vcmp.gt.f32.partialorder %v1695_v49, %v1685_v50  ;;  %v1701_v51 = vmax.f32 %v1685_v50, %v1695_v49  ;;  %v1758_v4 = vadd.f32 %v1752_v41, %v2742_v23 }
 0x54b   :  { %v1699_v57 = vsel %vm1697_vm7, 4, %v1683_v38  ;;  %vm1810_vm7 = vcmask 1041408  }
 0x54c   :  { %vm1760_vm8 = vcmp.gt.f32.partialorder %v1758_v4, %v1748_v39  ;;  %vm1713_vm9 = vcmp.gt.f32.partialorder %v1711_v27, %v1701_v51  ;;  %v1717_v26 = vmax.f32 %v1701_v51, %v1711_v27  ;;  %v1764_v17 = vmax.f32 %v1748_v39, %v1758_v4 }
 0x54d   :  { %v1762_v55 = vsel %vm1760_vm8, 8, %v1746_v60  ;;  %v1715_v42 = vsel %vm1713_vm9, 5, %v1699_v57  ;;  %vm1797_vm9 = vcmp.gt.s32.totalorder %v2840_v31, 7 }
 0x54e   :  { %v1740_v0 = vpop.permute.xlu1 %1739  ;;  %vm1729_vm12 = vcmp.gt.f32.partialorder %v1727_v2, %v1717_v26  ;;  %v1733_v40 = vmax.f32 %v1717_v26, %v1727_v2 }
 0x54f   :  { %v1731_v44 = vsel %vm1729_vm12, 6, %v1715_v42  ;;  %v1743_v61 = vadd.f32 %v1740_v0, %v2804_v21 }
 0x551   :  { %vm1745_vm13 = vcmp.gt.f32.partialorder %v1743_v61, %v1733_v40  ;;  %v1749_v1 = vmax.f32 %v1733_v40, %v1743_v61 }
 0x552   :  { %v1747_v19 = vsel %vm1745_vm13, 7, %v1731_v44  ;;  %vm1622_vm13 = vcmp.gt.s32.totalorder %v2840_v31, 6 }
 0x557   :  { %v1756_v63 = vpop.permute.xlu1 %1755 }
 0x558   :  { %v1759_v5 = vadd.f32 %v1756_v63, %v2742_v23 }
 0x55a   :  { %vm1761_vm14 = vcmp.gt.f32.partialorder %v1759_v5, %v1749_v1  ;;  %v1765_v6 = vmax.f32 %v1749_v1, %v1759_v5 }
 0x55b   :  { %v1763_v9 = vsel %vm1761_vm14, 8, %v1747_v19  ;;  %v1627_v19 = vsel %vm1622_vm13, %v3184_v11, 0 }
 0x55c   :  { %vm1777_vm15 = vcmp.gt.f32.partialorder %v1775_v18, %v1765_v6  ;;  %v1781_v14 = vmax.f32 %v1765_v6, %v1775_v18 }
 0x55d   :  { %v1779_v59 = vsel %vm1777_vm15, 9, %v1763_v9  ;;  %vm1831_vm15 = vcmp.eq.s32.totalorder %v3243_v48, 7 }
 0x55e   :  { %v1787_v21 = vadd.f32 %v1783_v15, %v1781_v14  ;;  %v1800_v20 = vrot.slane %v1779_v59, 7 }
 0x560   :  { %v1768_v25 = vpop.permute.xlu1 %1767  ;;  %v1793_v60 = vrot.slane %v1787_v21, 7 }
 0x561   :  { %v1774_v12 = vadd.f32 %v1768_v25, %v2811_v35 }
 0x563   :  { %vm1776_vm1 = vcmp.gt.f32.partialorder %v1774_v12, %v1764_v17  ;;  %v1780_v23 = vmax.f32 %v1764_v17, %v1774_v12 }
 0x564   :  { %v1778_v37 = vsel %vm1776_vm1, 9, %v1762_v55  ;;  %vm1447_vm1 = vcmp.gt.s32.totalorder %v2840_v31, 5 }
 0x565   :  { %v1786_v30 = vadd.f32 %v1782_v28, %v1780_v23  ;;  %v1801_v33 = vsel %vm740_vm0, %v1800_v20, %v1778_v37  ;;  %v1452_v20 = vsel %vm1447_vm1, %v3136_v13, 0 }
 0x566   :  { %v1802_v39 = vsel %vm1797_vm9, %v1801_v33, 0 }
 0x567   :  { %v1794_v43 = vsel %vm740_vm0, %v1793_v60, %v1786_v30 }
 0x568   :  { %v1796_v35 = vsel %vm1788_vm4, %v1794_v43, %v3191_v10  ;;  %vm1867_vm4 = vcmp.eq.s32.totalorder %v3243_v48, 5 }
 0x569   :  { %v1809_v47 = vadd.f32 %v2423_v29, %v1796_v35 }
 0x56b   :  { %v1811_v24 = vsel %vm1810_vm7, %v1809_v47, -inf }
 0x56c   :  { %1812 = vmax.xlane.f32.xlu2 %v1811_v24 }
 0x5df   :  { %v1813_v53 = vpop.xlane.xlu2 %1812 }
 0x5e0   :  { %vm1814_vm8 = vcmp.eq.f32.partialorder %v1809_v47, %v1813_v53 }
 0x5e1   :  { %v1815_v56 = vsel %vm1814_vm8, %v3243_v48, 128 }
 0x5e2   :  { %v1816_v45 = vsel %vm1810_vm7, %v1815_v56, 2147483647 }
 0x5e3   :  { %v1818_v58 = vshra.s32 %v1816_v45, 16  ;;  %v1817_v52 = vand.u32 65535, %v1816_v45 }
 0x5e5   :  { %v1820_v32 = vcvt.s32.f32 %v1818_v58  ;;  %v1819_v10 = vcvt.s32.f32 %v1817_v52 }
 0x5e7   :  { %1821 = vmin.xlane.f32.xlu1 %v1820_v32 }
 0x65a   :  { %v1822_v3 = vpop.xlane.xlu1 %1821 }
 0x65b   :  { %vm1823_vm0 = vcmp.eq.f32.partialorder %v1820_v32, %v1822_v3  ;;  %v1828_v36 = vcvt.f32.s32 %v1822_v3 }
 0x65c   :  { %v1824_v34 = vsel %vm1823_vm0, %v1819_v10, inf  ;;  %vm1272_vm0 = vcmp.gt.s32.totalorder %v2840_v31, 4 }
 0x65d   :  { %1825 = vmin.xlane.f32.xlu0 %v1824_v34  ;;  %v1829_v50 = vshll.u32 %v1828_v36, 16  ;;  %v1277_v58 = vsel %vm1272_vm0, %v3070_v54, 0 }
 0x6d0   :  { %v1826_v49 = vpop.xlane.xlu0 %1825 }
 0x6d1   :  { %v1827_v8 = vcvt.f32.s32 %v1826_v49 }
 0x6d3   :  { %v3248_v38 = vadd.s32 %v1829_v50, %v1827_v8 }
 0x6d5   :  { %vm1833_vm12 = vcmp.eq.s32.totalorder %v3243_v48, %v3248_v38  ;;  %v1832_v17 = vsel %vm1831_vm15, %v3248_v38, 0 }
 0x6d6   :  { %v1834_v41 = vsel %vm1833_vm12, %v1802_v39, 0  ;;  %vm1903_vm12 = vcmp.eq.s32.totalorder %v3243_v48, 3 }
 0x6d7   :  { %v1835_v27 = vsel %vm1810_vm7, %v1834_v41, 0 }
 0x6d8   :  { %v1837_v51 = vshrl.u32 %v1835_v27, 16  ;;  %v1836_v57 = vand.u32 65535, %v1835_v27 }
 0x6da   :  { %v1839_v4 = vcvt.s32.f32 %v1837_v51  ;;  %v1838_v2 = vcvt.s32.f32 %v1836_v57 }
 0x6dc   :  { %1842 = vadd.xlane.f32.xlu2 %v1839_v4 }
 0x6e4   :  { %1840 = vadd.xlane.f32.xlu2 %v1838_v2 }
 0x74f   :  { %v1843_v26 = vpop.xlane.xlu2 %1842 }
 0x750   :  { %v1845_v55 = vcvt.f32.s32 %v1843_v26 }
 0x752   :  { %v1846_v0 = vshll.u32 %v1845_v55, 16 }
 0x757   :  { %v1841_v42 = vpop.xlane.xlu2 %1840 }
 0x758   :  { %v1844_v40 = vcvt.f32.s32 %v1841_v42 }
 0x75a   :  { %v1847_v44 = vadd.s32 %v1846_v0, %v1844_v40 }
 0x75c   :  { %v1848_v61 = vsel %vm1613_vm3, %v3248_v38, %v1847_v44  ;;  %vm1849_vm3 = vcmp.eq.s32.totalorder %v3243_v48, 6 }
 0x75d   :  { %vm1851_vm14 = vcmp.eq.s32.totalorder %v3243_v48, %v1848_v61  ;;  %v1850_v21 = vsel %vm1849_vm3, %v1848_v61, %v1832_v17  ;;  %vm1939_vm3 = vcmp.eq.s32.totalorder %v3243_v48, 1 }
 0x75e   :  { %v1852_v62 = vsel %vm1851_vm14, %v1627_v19, 0  ;;  %vm1921_vm14 = vcmp.eq.s32.totalorder %v3243_v48, 2 }
 0x75f   :  { %v1853_v63 = vsel %vm1810_vm7, %v1852_v62, 0 }
 0x760   :  { %v1855_v1 = vshrl.u32 %v1853_v63, 16  ;;  %v1854_v5 = vand.u32 65535, %v1853_v63 }
 0x762   :  { %v1857_v18 = vcvt.s32.f32 %v1855_v1  ;;  %v1856_v6 = vcvt.s32.f32 %v1854_v5 }
 0x764   :  { %1860 = vadd.xlane.f32.xlu1 %v1857_v18  ;;  %1858 = vadd.xlane.f32.xlu2 %v1856_v6 }
 0x7d7   :  { %v1861_v9 = vpop.xlane.xlu1 %1860  ;;  %v1859_v59 = vpop.xlane.xlu2 %1858 }
 0x7d8   :  { %v1863_v14 = vcvt.f32.s32 %v1861_v9  ;;  %v1862_v25 = vcvt.f32.s32 %v1859_v59 }
 0x7da   :  { %v1864_v15 = vshll.u32 %v1863_v14, 16 }
 0x7dc   :  { %v1865_v11 = vadd.s32 %v1864_v15, %v1862_v25 }
 0x7de   :  { %v1866_v12 = vsel %vm1438_vm5, %v3248_v38, %v1865_v11  ;;  %vm1885_vm5 = vcmp.eq.s32.totalorder %v3243_v48, 4 }
 0x7df   :  { %vm1869_vm8 = vcmp.eq.s32.totalorder %v3243_v48, %v1866_v12  ;;  %v1868_v28 = vsel %vm1867_vm4, %v1866_v12, %v1850_v21 }
 0x7e0   :  { %v1870_v23 = vsel %vm1869_vm8, %v1452_v20, 0 }
 0x7e1   :  { %v1871_v37 = vsel %vm1810_vm7, %v1870_v23, 0 }
 0x7e2   :  { %v1873_v60 = vshrl.u32 %v1871_v37, 16  ;;  %v1872_v30 = vand.u32 65535, %v1871_v37 }
 0x7e4   :  { %v1875_v33 = vcvt.s32.f32 %v1873_v60  ;;  %v1874_v29 = vcvt.s32.f32 %v1872_v30 }
 0x7e6   :  { %1878 = vadd.xlane.f32.xlu0 %v1875_v33  ;;  %1876 = vadd.xlane.f32.xlu1 %v1874_v29 }
 0x859   :  { %v1879_v43 = vpop.xlane.xlu0 %1878  ;;  %v1877_v35 = vpop.xlane.xlu1 %1876 }
 0x85a   :  { %v1881_v47 = vcvt.f32.s32 %v1879_v43  ;;  %v1880_v53 = vcvt.f32.s32 %v1877_v35 }
 0x85c   :  { %v1882_v24 = vshll.u32 %v1881_v47, 16 }
 0x85e   :  { %v1883_v13 = vadd.s32 %v1882_v24, %v1880_v53 }
 0x860   :  { %v1884_v56 = vsel %vm1263_vm10, %v3248_v38, %v1883_v13  ;;  %vm1097_vm10 = vcmp.gt.s32.totalorder %v2840_v31, 3 }
 0x861   :  { %v1886_v45 = vsel %vm1885_vm5, %v1884_v56, %v1868_v28  ;;  %vm1887_vm9 = vcmp.eq.s32.totalorder %v3243_v48, %v1884_v56  ;;  %v1102_v51 = vsel %vm1097_vm10, %v2996_v22, 0 }
 0x862   :  { %v1888_v32 = vsel %vm1887_vm9, %v1277_v58, 0 }
 0x863   :  { %v1889_v52 = vsel %vm1810_vm7, %v1888_v32, 0 }
 0x864   :  { %v1891_v3 = vshrl.u32 %v1889_v52, 16  ;;  %v1890_v10 = vand.u32 65535, %v1889_v52 }
 0x866   :  { %v1893_v34 = vcvt.s32.f32 %v1891_v3  ;;  %v1892_v36 = vcvt.s32.f32 %v1890_v10 }
 0x868   :  { %1896 = vadd.xlane.f32.xlu2 %v1893_v34  ;;  %1894 = vadd.xlane.f32.xlu0 %v1892_v36 }
 0x8db   :  { %v1897_v49 = vpop.xlane.xlu2 %1896  ;;  %v1895_v50 = vpop.xlane.xlu0 %1894 }
 0x8dc   :  { %v1899_v8 = vcvt.f32.s32 %v1897_v49  ;;  %v1898_v41 = vcvt.f32.s32 %v1895_v50 }
 0x8de   :  { %v1900_v39 = vshll.u32 %v1899_v8, 16 }
 0x8e0   :  { %v1901_v27 = vadd.s32 %v1900_v39, %v1898_v41 }
 0x8e2   :  { %v1902_v54 = vsel %vm1088_vm2, %v3248_v38, %v1901_v27  ;;  %vm922_vm2 = vcmp.gt.s32.totalorder %v2840_v31, 2 }
 0x8e3   :  { %vm1905_vm13 = vcmp.eq.s32.totalorder %v3243_v48, %v1902_v54  ;;  %v1904_v4 = vsel %vm1903_vm12, %v1902_v54, %v1886_v45  ;;  %v927_v1 = vsel %vm922_vm2, %v2926_v7, 0 }
 0x8e4   :  { %v1906_v57 = vsel %vm1905_vm13, %v1102_v51, 0 }
 0x8e5   :  { %v1907_v2 = vsel %vm1810_vm7, %v1906_v57, 0 }
 0x8e6   :  { %v1909_v26 = vshrl.u32 %v1907_v2, 16  ;;  %v1908_v55 = vand.u32 65535, %v1907_v2 }
 0x8e8   :  { %v1911_v42 = vcvt.s32.f32 %v1909_v26  ;;  %v1910_v0 = vcvt.s32.f32 %v1908_v55 }
 0x8ea   :  { %1914 = vadd.xlane.f32.xlu1 %v1911_v42  ;;  %1912 = vadd.xlane.f32.xlu2 %v1910_v0 }
 0x95d   :  { %v1915_v40 = vpop.xlane.xlu1 %1914  ;;  %v1913_v44 = vpop.xlane.xlu2 %1912 }
 0x95e   :  { %v1917_v61 = vcvt.f32.s32 %v1915_v40  ;;  %v1916_v62 = vcvt.f32.s32 %v1913_v44 }
 0x960   :  { %v1918_v19 = vshll.u32 %v1917_v61, 16 }
 0x962   :  { %v1919_v63 = vadd.s32 %v1918_v19, %v1916_v62 }
 0x964   :  { %v1920_v22 = vsel %vm913_vm11, %v3248_v38, %v1919_v63  ;;  %vm747_vm11 = vcmp.gt.s32.totalorder %v2840_v31, 1 }
 0x965   :  { %vm1923_vm15 = vcmp.eq.s32.totalorder %v3243_v48, %v1920_v22  ;;  %v1922_v5 = vsel %vm1921_vm14, %v1920_v22, %v1904_v4  ;;  %v752_v28 = vsel %vm747_vm11, %v2853_v16, 0 }
 0x966   :  { %v1924_v18 = vsel %vm1923_vm15, %v927_v1, 0 }
 0x967   :  { %v1925_v6 = vsel %vm1810_vm7, %v1924_v18, 0 }
 0x968   :  { %v1927_v9 = vshrl.u32 %v1925_v6, 16  ;;  %v1926_v59 = vand.u32 65535, %v1925_v6 }
 0x96a   :  { %v1929_v14 = vcvt.s32.f32 %v1927_v9  ;;  %v1928_v15 = vcvt.s32.f32 %v1926_v59 }
 0x96c   :  { %1932 = vadd.xlane.f32.xlu0 %v1929_v14  ;;  %1930 = vadd.xlane.f32.xlu1 %v1928_v15 }
 0x9df   :  { %v1933_v25 = vpop.xlane.xlu0 %1932  ;;  %v1931_v11 = vpop.xlane.xlu1 %1930 }
 0x9e0   :  { %v1935_v17 = vcvt.f32.s32 %v1933_v25  ;;  %v1934_v12 = vcvt.f32.s32 %v1931_v11 }
 0x9e2   :  { %v1936_v21 = vshll.u32 %v1935_v17, 16 }
 0x9e4   :  { %v1937_v20 = vadd.s32 %v1936_v21, %v1934_v12 }
 0x9e6   :  { %v1938_v7 = vsel %vm734_vm6, %v3248_v38, %v1937_v20  ;;  %vm1956_vm6 = vcmp.eq.s32.totalorder %v2845_v46, 0 }
 0x9e7   :  { %vm1941_vm1 = vcmp.eq.s32.totalorder %v3243_v48, %v1938_v7  ;;  %v1940_v23 = vsel %vm1939_vm3, %v1938_v7, %v1922_v5 }
 0x9e8   :  { %v1942_v37 = vsel %vm1941_vm1, %v752_v28, 0 }
 0x9e9   :  { %v1943_v60 = vsel %vm1810_vm7, %v1942_v37, 0  ;;  %vm1958_vm7 = vcmp.eq.s32.totalorder %v3243_v48, 0 }
 0x9ea   :  { %v1945_v30 = vshrl.u32 %v1943_v60, 16  ;;  %v1944_v33 = vand.u32 65535, %v1943_v60 }
 0x9ec   :  { %v1947_v29 = vcvt.s32.f32 %v1945_v30  ;;  %v1946_v43 = vcvt.s32.f32 %v1944_v33 }
 0x9ee   :  { %1950 = vadd.xlane.f32.xlu2 %v1947_v29  ;;  %1948 = vadd.xlane.f32.xlu0 %v1946_v43 }
 0xa61   :  { %v1951_v31 = vpop.xlane.xlu2 %1950  ;;  %v1949_v16 = vpop.xlane.xlu0 %1948 }
 0xa62   :  { %v1953_v35 = vcvt.f32.s32 %v1951_v31  ;;  %v1952_v24 = vcvt.f32.s32 %v1949_v16 }
 0xa64   :  { %v1954_v47 = vshll.u32 %v1953_v35, 16 }
 0xa66   :  { %v1955_v53 = vadd.s32 %v1954_v47, %v1952_v24 }
 0xa68   :  { %v1957_v13 = vsel %vm1956_vm6, %v3248_v38, %v1955_v53 }
 0xa69   :  { %v1959_v56 = vsel %vm1958_vm7, %v1957_v13, %v1940_v23 }
 0xa6a   :  { %1960 = vst [vmem:[#allocation4] sm:$0x3] %v1959_v56 }
 0xa6b   :  { %1971 = dma.vmem_to_hbm [thread:$0]  %s1967_s17, 32, %s1969_s7, [#allocation5]  }
 0xa6c   :  { %2488 = dma.done.wait [#allocation5], 32  }
 0xa6d   :  { %2489 = vsyncadd [#allocation5], 4294967264 }
 0xa6e   :  { %2490 = dma.done.wait [#allocation7], 256  }
 0xa6f   :  { %2491 = vsyncadd [#allocation7], 4294967040 }
 0xa70   :  { %1993 = vsyncpa [#allocation5], 1 }
 0xa71   :  { %1994 = vsyncpa [#allocation7], 1 }

</bundles_post_ra>
